<compile_context>
chip_gen: v7x
topology: tpu7x:2x2x1
jax: 0.10.0
libtpu: 0.0.40
codegen_flags: <defaults>
</compile_context>

<pallas_src>
import jax
import jax.numpy as jnp
from jax import lax
from jax.experimental import pallas as pl
from jax.experimental.pallas import tpu as pltpu

_F32 = 4  # bytes


def _round_up(x, m):
    return (x + m - 1) // m * m


def _sigmoid(z):
    # tanh lowers to a single EUP op (separate VLIW slot); exact logistic identity.
    return 0.5 * (jnp.tanh(0.5 * z) + 1.0)


# ---------------------------------------------------------------------------
# VMEM budget (generation-aware)
# ---------------------------------------------------------------------------
def _vmem_limit_bytes():
    try:
        cap = int(pltpu.get_tpu_info().vmem_capacity_bytes)
    except Exception:
        cap = 64 * 1024 * 1024
    # Leave headroom for compiler-internal scratch; cap well below physical.
    return max(16 * 1024 * 1024, min(int(cap * 0.75), 100 * 1024 * 1024))


_VMEM_LIMIT = _vmem_limit_bytes()
_WORK_BUDGET = int(_VMEM_LIMIT * 0.85)


# ---------------------------------------------------------------------------
# Pallas kernels
# ---------------------------------------------------------------------------
def _proj_kernel(x_ref, w_ref, b_ref, o_ref):
    """Row-tiled input projection: o = x @ W_ih_packed + (b_ih + b_hh).

    x_ref : (ROW_TILE, D_in)
    w_ref : (D_in, Gp)     Gp = 4*Hp, gate-major columns [i|f|g|o], lane padded
    b_ref : (1, Gp)
    o_ref : (ROW_TILE, Gp)
    """
    o_ref[...] = (
        jnp.dot(x_ref[...], w_ref[...], preferred_element_type=jnp.float32)
        + b_ref[...]
    )


def _rec_body(xp_ref, whh_ref, y_ref, hn_ref, h_scr, c_scr):
    """Shared LSTM recurrence body over one time chunk.

    xp_ref : (T_TILE, B_TILE, 4*Hp)  pre-projected inputs, gates [i|f|g|o]
    whh_ref: (Hp, 4*Hp)              packed hidden->gate weights
    y_ref  : (T_TILE, B_TILE, Hp)    per-timestep hidden states (or None)
    hn_ref : (B_TILE, Hp)            final hidden state (written on last chunk)
    h_scr/c_scr : (B_TILE, Hp) VMEM scratch carried across the chunk grid axis
    """
    t_tile = xp_ref.shape[0]
    Hp = hn_ref.shape[-1]

    @pl.when(pl.program_id(1) == 0)
    def _():
        h_scr[...] = jnp.zeros_like(h_scr)
        c_scr[...] = jnp.zeros_like(c_scr)

    whh = whh_ref[...]  # hoisted: loaded once per chunk, not per timestep

    def step(t, carry):
        h, c = carry
        # Single (B, Hp) x (Hp, 4Hp) matmul per step; input proj already done.
        pre = xp_ref[t] + jnp.dot(h, whh, preferred_element_type=jnp.float32)
        # Lane-aligned gate slices (Hp is a multiple of 128).
        i = _sigmoid(pre[:, 0 * Hp:1 * Hp])
        f = _sigmoid(pre[:, 1 * Hp:2 * Hp])
        g = jnp.tanh(pre[:, 2 * Hp:3 * Hp])
        o = _sigmoid(pre[:, 3 * Hp:4 * Hp])
        c_new = f * c + i * g
        h_new = o * jnp.tanh(c_new)
        if y_ref is not None:
            y_ref[t] = h_new
        return h_new, c_new

    unroll = True if t_tile <= 32 else 8
    h_fin, c_fin = lax.fori_loop(
        0, t_tile, step, (h_scr[...], c_scr[...]), unroll=unroll
    )
    h_scr[...] = h_fin
    c_scr[...] = c_fin

    @pl.when(pl.program_id(1) == pl.num_programs(1) - 1)
    def _():
        hn_ref[...] = h_fin


def _make_rec_kernel(write_y):
    if write_y:
        def kernel(xp_ref, whh_ref, y_ref, hn_ref, h_scr, c_scr):
            _rec_body(xp_ref, whh_ref, y_ref, hn_ref, h_scr, c_scr)
    else:
        def kernel(xp_ref, whh_ref, hn_ref, h_scr, c_scr):
            _rec_body(xp_ref, whh_ref, None, hn_ref, h_scr, c_scr)
    return kernel


def _head_kernel(hn_ref, w1_ref, b1_ref, w2_ref, b2_ref, out_ref):
    """relu(hn) -> fc_1 -> relu -> fc, fused in one kernel (tiny shapes)."""
    h = jnp.maximum(hn_ref[...], 0.0)
    z = jnp.dot(h, w1_ref[...], preferred_element_type=jnp.float32) + b1_ref[...]
    z = jnp.maximum(z, 0.0)
    out_ref[...] = (
        jnp.dot(z, w2_ref[...], preferred_element_type=jnp.float32) + b2_ref[...]
    )


# ---------------------------------------------------------------------------
# Tile-size heuristics (static; derived from shapes + VMEM budget)
# ---------------------------------------------------------------------------
def _pick_row_tile(M, D, G, budget):
    """Largest multiple-of-8 divisor of M fitting the budget, >= 2 grid steps."""
    resident = 2 * _F32 * (D * G + G)          # W_ih + bias (double-buffered)
    avail = max(budget - resident, 0)
    best = None
    for t in range(8, M + 1, 8):
        if M % t:
            continue
        if 2 * _F32 * t * (D + G) <= avail:    # x tile + out tile, 2 buffers each
            best = t
    if best is None:
        return M                                # full-array block is always legal
    # Prefer >= 2 grid steps (megacore sharding on the parallel axis).
    half = M // 2
    if best == M and M >= 16 and half % 8 == 0 and M % half == 0 \
            and 2 * _F32 * half * (D + G) <= avail:
        best = half
    return best


def _pick_t_tile(T, B_tile, Hp, Gp, budget, with_y):
    """Largest divisor of T whose per-chunk tiles fit the remaining budget."""
    resident = 2 * _F32 * (Hp * Gp)            # W_hh (double-buffered)
    resident += 2 * _F32 * (B_tile * Hp)       # hn output buffers
    resident += 2 * _F32 * (B_tile * Hp)       # h/c scratch
    avail = max(budget - resident, 0)
    per_t = 2 * _F32 * B_tile * Gp             # xp tile, double-buffered
    if with_y:
        per_t += 2 * _F32 * B_tile * Hp        # y tile, double-buffered
    best = 1
    for t in range(1, T + 1):
        if T % t:
            continue
        if t * per_t <= avail:
            best = t
    return best


# ---------------------------------------------------------------------------
# Wrappers (glue)
# ---------------------------------------------------------------------------
_VMEM = pl.BlockSpec(memory_space=pltpu.MemorySpace.VMEM)


def _input_proj(x2d, wih, b):
    """(M, D) @ (D, Gp) + b  as one pipelined, row-tiled matmul."""
    M, D = x2d.shape
    G = wih.shape[-1]
    row_tile = _pick_row_tile(M, D, G, _WORK_BUDGET)
    return pl.pallas_call(
        _proj_kernel,
        out_shape=jax.ShapeDtypeStruct((M, G), jnp.float32),
        grid_spec=pltpu.PrefetchScalarGridSpec(
            num_scalar_prefetch=0,
            grid=(M // row_tile,),
            in_specs=[
                pl.BlockSpec((row_tile, D), lambda i: (i, 0)),
                pl.BlockSpec((D, G), lambda i: (0, 0)),
                pl.BlockSpec((1, G), lambda i: (0, 0)),
            ],
            out_specs=pl.BlockSpec((row_tile, G), lambda i: (i, 0)),
        ),
        compiler_params=pltpu.CompilerParams(
            dimension_semantics=("parallel",), vmem_limit_bytes=_VMEM_LIMIT
        ),
    )(x2d, wih, b)


def _lstm_recurrence(xp_tm, whh, write_y):
    """Time-chunked recurrence; h/c live in VMEM scratch across chunks.

    Returns (y, hn) when write_y else hn.  Grid = (batch_shards, time_chunks);
    batch axis is 'parallel' (v7x megacore), time axis is 'arbitrary' (carry).
    """
    T, B, Gp = xp_tm.shape
    Hp = whh.shape[0]
    nb = 2 if (B % 16 == 0) else 1      # only shard batch when halves stay 8-aligned
    B_tile = B // nb
    t_tile = _pick_t_tile(T, B_tile, Hp, Gp, _WORK_BUDGET, write_y)
    n_chunks = T // t_tile

    in_specs = [
        pl.BlockSpec((t_tile, B_tile, Gp), lambda b, c: (c, b, 0)),
        pl.BlockSpec((Hp, Gp), lambda b, c: (0, 0)),
    ]
    hn_shape = jax.ShapeDtypeStruct((B, Hp), jnp.float32)
    hn_spec = pl.BlockSpec((B_tile, Hp), lambda b, c: (b, 0))
    if write_y:
        out_shape = (jax.ShapeDtypeStruct((T, B, Hp), jnp.float32), hn_shape)
        out_specs = (
            pl.BlockSpec((t_tile, B_tile, Hp), lambda b, c: (c, b, 0)),
            hn_spec,
        )
    else:
        out_shape = hn_shape
        out_specs = hn_spec

    return pl.pallas_call(
        _make_rec_kernel(write_y),
        out_shape=out_shape,
        grid_spec=pltpu.PrefetchScalarGridSpec(
            num_scalar_prefetch=0,
            grid=(nb, n_chunks),
            in_specs=in_specs,
            out_specs=out_specs,
            scratch_shapes=[
                pltpu.VMEM((B_tile, Hp), jnp.float32),  # h carry
                pltpu.VMEM((B_tile, Hp), jnp.float32),  # c carry
            ],
        ),
        compiler_params=pltpu.CompilerParams(
            dimension_semantics=("parallel", "arbitrary"),
            vmem_limit_bytes=_VMEM_LIMIT,
        ),
    )(xp_tm, whh)


def _mlp_head(hn_flat, w1, b1, w2, b2):
    N = hn_flat.shape[0]
    C = w2.shape[-1]
    return pl.pallas_call(
        _head_kernel,
        out_shape=jax.ShapeDtypeStruct((N, C), jnp.float32),
        in_specs=[_VMEM] * 5,
        out_specs=_VMEM,
        compiler_params=pltpu.CompilerParams(vmem_limit_bytes=_VMEM_LIMIT),
    )(hn_flat, w1, b1, w2, b2)


@jax.jit
def lstm_forward(x, packed):
    """x: (B, T, D_in) float32.  Returns (num_layers * B, num_classes)."""
    B, T, _ = x.shape
    layers = packed["lstm"]
    L = len(layers)
    # Single XLA transpose of the (small) input; all later tensors stay
    # time-major so no further transposes are needed.
    cur = jnp.transpose(x, (1, 0, 2))          # (T, B, D_in)
    hns = []
    for li, layer in enumerate(layers):
        D = layer["wih"].shape[0]
        Gp = layer["wih"].shape[1]              # 4*Hp
        # Hoisted input projection: one big MXU matmul, bias folded in.
        xp = _input_proj(cur.reshape(T * B, D), layer["wih"], layer["b"])
        xp = xp.reshape(T, B, Gp)               # metadata reshape (contiguous)
        if li == L - 1:
            hn = _lstm_recurrence(xp, layer["whh"], write_y=False)
        else:
            y, hn = _lstm_recurrence(xp, layer["whh"], write_y=True)
            cur = y                             # (T, B, Hp), padded hidden
        hns.append(hn)                          # (B, Hp)
    # hn.view(-1, hidden_size): layer-major stacking, matches PyTorch.
    hn_all = jnp.concatenate(hns, axis=0)       # (L*B, Hp), padded cols are 0
    return _mlp_head(hn_all, packed["w1"], packed["b1"], packed["w2"], packed["b2"])


# ---------------------------------------------------------------------------
# Parameter init (raw PyTorch layout) + packing into the padded kernel layout
# ---------------------------------------------------------------------------
def init_params(key, input_size, hidden_size, num_layers, num_classes):
    H = hidden_size
    k = 1.0 / (H ** 0.5)
    raw = {"lstm": []}
    for layer in range(num_layers):
        d_in = input_size if layer == 0 else H
        key, k1, k2, k3, k4 = jax.random.split(key, 5)
        raw["lstm"].append(
            {
                "w_ih": jax.random.uniform(k1, (4 * H, d_in), jnp.float32, -k, k),
                "w_hh": jax.random.uniform(k2, (4 * H, H), jnp.float32, -k, k),
                "b_ih": jax.random.uniform(k3, (4 * H,), jnp.float32, -k, k),
                "b_hh": jax.random.uniform(k4, (4 * H,), jnp.float32, -k, k),
            }
        )
    key, k1, k2, k3, k4 = jax.random.split(key, 5)
    kf1 = 1.0 / (H ** 0.5)
    kf2 = 1.0 / (128.0 ** 0.5)
    raw["fc1_w"] = jax.random.uniform(k1, (128, H), jnp.float32, -kf1, kf1)
    raw["fc1_b"] = jax.random.uniform(k2, (128,), jnp.float32, -kf1, kf1)
    raw["fc2_w"] = jax.random.uniform(k3, (num_classes, 128), jnp.float32, -kf2, kf2)
    raw["fc2_b"] = jax.random.uniform(k4, (num_classes,), jnp.float32, -kf2, kf2)
    return raw


def _pack_layer(w_ih, w_hh, b_ih, b_hh, H, Hp, in_rows):
    """Pack into lane-padded, gate-major right-multiply layout [i|f|g|o]."""
    Gp = 4 * Hp
    d_in = w_ih.shape[1]
    wih_t = w_ih.T          # (d_in, 4H)
    whh_t = w_hh.T          # (H, 4H)
    b = b_ih + b_hh
    wih_p = jnp.zeros((in_rows, Gp), jnp.float32)
    whh_p = jnp.zeros((Hp, Gp), jnp.float32)
    b_p = jnp.zeros((1, Gp), jnp.float32)
    for g in range(4):
        wih_p = wih_p.at[:d_in, g * Hp:g * Hp + H].set(wih_t[:, g * H:(g + 1) * H])
        whh_p = whh_p.at[:H, g * Hp:g * Hp + H].set(whh_t[:, g * H:(g + 1) * H])
        b_p = b_p.at[:, g * Hp:g * Hp + H].set(b[None, g * H:(g + 1) * H])
    return {"wih": wih_p, "whh": whh_p, "b": b_p}


def pack_params(raw, input_size, hidden_size):
    H = hidden_size
    Hp = _round_up(H, 128)
    packed = {"lstm": []}
    for li, lw in enumerate(raw["lstm"]):
        in_rows = input_size if li == 0 else Hp
        packed["lstm"].append(
            _pack_layer(lw["w_ih"], lw["w_hh"], lw["b_ih"], lw["b_hh"], H, Hp, in_rows)
        )
    # fc_1 weights padded to Hp rows (padded hidden columns are exactly 0).
    packed["w1"] = jnp.zeros((Hp, 128), jnp.float32).at[:H, :].set(raw["fc1_w"].T)
    packed["b1"] = raw["fc1_b"][None, :]
    packed["w2"] = raw["fc2_w"].T
    packed["b2"] = raw["fc2_b"][None, :]
    return packed


# ---------------------------------------------------------------------------
# Pure-JAX reference (unpadded math, standard sigmoid) for a sanity check
# ---------------------------------------------------------------------------
def reference_forward(x, raw):
    x_tm = jnp.transpose(x, (1, 0, 2))
    T, B, _ = x_tm.shape
    hns = []
    cur = x_tm
    for lw in raw["lstm"]:
        H = lw["w_hh"].shape[1]
        wih = lw["w_ih"].T
        whh = lw["w_hh"].T
        b = lw["b_ih"] + lw["b_hh"]
        h = jnp.zeros((B, H), jnp.float32)
        c = jnp.zeros((B, H), jnp.float32)
        ys = []
        for t in range(T):
            pre = cur[t] @ wih + h @ whh + b
            i = jax.nn.sigmoid(pre[:, :H])
            f = jax.nn.sigmoid(pre[:, H:2 * H])
            g = jnp.tanh(pre[:, 2 * H:3 * H])
            o = jax.nn.sigmoid(pre[:, 3 * H:])
            c = f * c + i * g
            h = o * jnp.tanh(c)
            ys.append(h)
        cur = jnp.stack(ys, axis=0)
        hns.append(h)
    hn_all = jnp.concatenate(hns, axis=0)
    z = jnp.maximum(hn_all, 0.0) @ raw["fc1_w"].T + raw["fc1_b"]
    z = jnp.maximum(z, 0.0)
    return z @ raw["fc2_w"].T + raw["fc2_b"]


if __name__ == "__main__":
    # Small config consistent with the module's forward signature.
    batch, seq_length = 2, 8
    input_size, hidden_size, num_layers, num_classes = 16, 32, 2, 10

    key = jax.random.PRNGKey(0)
    key, xk, pk = jax.random.split(key, 3)
    x = jax.random.normal(xk, (batch, seq_length, input_size), jnp.float32)
    raw = init_params(pk, input_size, hidden_size, num_layers, num_classes)
    packed = pack_params(raw, input_size, hidden_size)

    out = lstm_forward(x, packed)
    out = jax.block_until_ready(out)
    assert out.shape == (num_layers * batch, num_classes), out.shape

    ref = reference_forward(x, raw)
    err = float(jnp.max(jnp.abs(out - ref)))
    assert err < 1e-3, err

    print("KERNEL_OK")
</pallas_src>

<mosaic_0001>
module attributes {stable_mosaic.version = 11 : i64} {
  func.func @kernel(%arg0: i32, %arg1: i32, %arg2: memref<8x2x512xf32, #tpu.memory_space<vmem>>, %arg3: memref<128x512xf32, #tpu.memory_space<vmem>>, %arg4: memref<8x2x128xf32, #tpu.memory_space<vmem>>, %arg5: memref<2x128xf32, #tpu.memory_space<vmem>>, %arg6: memref<2x128xf32, #tpu.memory_space<vmem>>, %arg7: memref<2x128xf32, #tpu.memory_space<vmem>>) attributes {dimension_semantics = [#tpu.dimension_semantics<parallel>, #tpu.dimension_semantics<arbitrary>], iteration_bounds = array<i64: 1, 1>, scalar_prefetch = 0 : i64, scratch_operands = 2 : i64, tpu.core_type = #tpu.core_type<tc>, window_params = [{transform_indices = @transform_0, window_bounds = array<i64: 8, 2, 512>}, {pipeline_mode = #tpu.pipeline_mode<synchronous>, transform_indices = @transform_1, window_bounds = array<i64: 128, 512>}, {transform_indices = @transform_2, window_bounds = array<i64: 8, 2, 128>}, {transform_indices = @transform_3, window_bounds = array<i64: 2, 128>}]} {
    %c0_i32 = arith.constant 0 : i32
    %0 = arith.cmpi eq, %arg1, %c0_i32 : i32
    %1 = arith.extui %0 : i1 to i32
    %c0_i32_0 = arith.constant 0 : i32
    %2 = arith.cmpi ne, %1, %c0_i32_0 : i32
    scf.if %2 {
      %cst_124 = arith.constant 0.000000e+00 : f32
      %331 = vector.broadcast %cst_124 : f32 to vector<2x128xf32>
      %c0_125 = arith.constant 0 : index
      %c0_126 = arith.constant 0 : index
      %332 = vector.load %arg6[%c0_125, %c0_126] : memref<2x128xf32, #tpu.memory_space<vmem>>, vector<2x128xf32>
      tpu.vector_store %arg6[%c0_125, %c0_126], %331 {strides = array<i32>} : memref<2x128xf32, #tpu.memory_space<vmem>>, vector<2x128xf32>,
      %cst_127 = arith.constant 0.000000e+00 : f32
      %333 = vector.broadcast %cst_127 : f32 to vector<2x128xf32>
      %c0_128 = arith.constant 0 : index
      %c0_129 = arith.constant 0 : index
      %334 = vector.load %arg7[%c0_128, %c0_129] : memref<2x128xf32, #tpu.memory_space<vmem>>, vector<2x128xf32>
      tpu.vector_store %arg7[%c0_128, %c0_129], %333 {strides = array<i32>} : memref<2x128xf32, #tpu.memory_space<vmem>>, vector<2x128xf32>,
    } else {
    }
    %c0 = arith.constant 0 : index
    %c0_1 = arith.constant 0 : index
    %3 = vector.load %arg3[%c0, %c0_1] : memref<128x512xf32, #tpu.memory_space<vmem>>, vector<128x512xf32>
    %c0_2 = arith.constant 0 : index
    %c0_3 = arith.constant 0 : index
    %4 = vector.load %arg6[%c0_2, %c0_3] : memref<2x128xf32, #tpu.memory_space<vmem>>, vector<2x128xf32>
    %c0_4 = arith.constant 0 : index
    %c0_5 = arith.constant 0 : index
    %5 = vector.load %arg7[%c0_4, %c0_5] : memref<2x128xf32, #tpu.memory_space<vmem>>, vector<2x128xf32>
    %c0_i32_6 = arith.constant 0 : i32
    %6 = arith.index_cast %c0_i32_6 : i32 to index
    %c0_7 = arith.constant 0 : index
    %c0_8 = arith.constant 0 : index
    %7 = vector.load %arg2[%6, %c0_7, %c0_8] : memref<8x2x512xf32, #tpu.memory_space<vmem>>, vector<1x2x512xf32>
    %8 = vector.shape_cast %7 : vector<1x2x512xf32> to vector<2x512xf32>
    %cst = arith.constant dense<0.000000e+00> : vector<2x512xf32>
    %9 = tpu.matmul %4, %3, %cst {dimension_numbers = #tpu.dot_dimension_numbers<[1], [0], [0], [1], [0, 0, 1, 1], [], []>} : vector<2x128xf32>, vector<128x512xf32>, vector<2x512xf32> -> vector<2x512xf32>
    %10 = arith.addf %8, %9 : vector<2x512xf32>
    %11 = vector.extract_strided_slice %10 {offsets = [0, 0], sizes = [2, 128], strides = [1, 1]} : vector<2x512xf32> to vector<2x128xf32>
    %cst_9 = arith.constant 5.000000e-01 : f32
    %12 = vector.broadcast %cst_9 : f32 to vector<2x128xf32>
    %13 = arith.mulf %12, %11 : vector<2x128xf32>
    %14 = math.tanh %13 : vector<2x128xf32>
    %cst_10 = arith.constant 1.000000e+00 : f32
    %15 = vector.broadcast %cst_10 : f32 to vector<2x128xf32>
    %16 = arith.addf %14, %15 : vector<2x128xf32>
    %cst_11 = arith.constant 5.000000e-01 : f32
    %17 = vector.broadcast %cst_11 : f32 to vector<2x128xf32>
    %18 = arith.mulf %17, %16 : vector<2x128xf32>
    %19 = vector.extract_strided_slice %10 {offsets = [0, 128], sizes = [2, 128], strides = [1, 1]} : vector<2x512xf32> to vector<2x128xf32>
    %cst_12 = arith.constant 5.000000e-01 : f32
    %20 = vector.broadcast %cst_12 : f32 to vector<2x128xf32>
    %21 = arith.mulf %20, %19 : vector<2x128xf32>
    %22 = math.tanh %21 : vector<2x128xf32>
    %cst_13 = arith.constant 1.000000e+00 : f32
    %23 = vector.broadcast %cst_13 : f32 to vector<2x128xf32>
    %24 = arith.addf %22, %23 : vector<2x128xf32>
    %cst_14 = arith.constant 5.000000e-01 : f32
    %25 = vector.broadcast %cst_14 : f32 to vector<2x128xf32>
    %26 = arith.mulf %25, %24 : vector<2x128xf32>
    %27 = vector.extract_strided_slice %10 {offsets = [0, 256], sizes = [2, 128], strides = [1, 1]} : vector<2x512xf32> to vector<2x128xf32>
    %28 = math.tanh %27 : vector<2x128xf32>
    %29 = vector.extract_strided_slice %10 {offsets = [0, 384], sizes = [2, 128], strides = [1, 1]} : vector<2x512xf32> to vector<2x128xf32>
    %cst_15 = arith.constant 5.000000e-01 : f32
    %30 = vector.broadcast %cst_15 : f32 to vector<2x128xf32>
    %31 = arith.mulf %30, %29 : vector<2x128xf32>
    %32 = math.tanh %31 : vector<2x128xf32>
    %cst_16 = arith.constant 1.000000e+00 : f32
    %33 = vector.broadcast %cst_16 : f32 to vector<2x128xf32>
    %34 = arith.addf %32, %33 : vector<2x128xf32>
    %cst_17 = arith.constant 5.000000e-01 : f32
    %35 = vector.broadcast %cst_17 : f32 to vector<2x128xf32>
    %36 = arith.mulf %35, %34 : vector<2x128xf32>
    %37 = arith.mulf %26, %5 : vector<2x128xf32>
    %38 = arith.mulf %18, %28 : vector<2x128xf32>
    %39 = arith.addf %37, %38 : vector<2x128xf32>
    %40 = math.tanh %39 : vector<2x128xf32>
    %41 = arith.mulf %36, %40 : vector<2x128xf32>
    %42 = arith.index_cast %c0_i32_6 : i32 to index
    %c0_18 = arith.constant 0 : index
    %c0_19 = arith.constant 0 : index
    %43 = vector.load %arg4[%42, %c0_18, %c0_19] : memref<8x2x128xf32, #tpu.memory_space<vmem>>, vector<1x2x128xf32>
    %44 = vector.shape_cast %43 : vector<1x2x128xf32> to vector<2x128xf32>
    %45 = vector.shape_cast %41 : vector<2x128xf32> to vector<1x2x128xf32>
    tpu.vector_store %arg4[%42, %c0_18, %c0_19], %45 {strides = array<i32>} : memref<8x2x128xf32, #tpu.memory_space<vmem>>, vector<1x2x128xf32>,
    %c1_i32 = arith.constant 1 : i32
    %46 = arith.index_cast %c1_i32 : i32 to index
    %c0_20 = arith.constant 0 : index
    %c0_21 = arith.constant 0 : index
    %47 = vector.load %arg2[%46, %c0_20, %c0_21] : memref<8x2x512xf32, #tpu.memory_space<vmem>>, vector<1x2x512xf32>
    %48 = vector.shape_cast %47 : vector<1x2x512xf32> to vector<2x512xf32>
    %cst_22 = arith.constant dense<0.000000e+00> : vector<2x512xf32>
    %49 = tpu.matmul %41, %3, %cst_22 {dimension_numbers = #tpu.dot_dimension_numbers<[1], [0], [0], [1], [0, 0, 1, 1], [], []>} : vector<2x128xf32>, vector<128x512xf32>, vector<2x512xf32> -> vector<2x512xf32>
    %50 = arith.addf %48, %49 : vector<2x512xf32>
    %51 = vector.extract_strided_slice %50 {offsets = [0, 0], sizes = [2, 128], strides = [1, 1]} : vector<2x512xf32> to vector<2x128xf32>
    %cst_23 = arith.constant 5.000000e-01 : f32
    %52 = vector.broadcast %cst_23 : f32 to vector<2x128xf32>
    %53 = arith.mulf %52, %51 : vector<2x128xf32>
    %54 = math.tanh %53 : vector<2x128xf32>
    %cst_24 = arith.constant 1.000000e+00 : f32
    %55 = vector.broadcast %cst_24 : f32 to vector<2x128xf32>
    %56 = arith.addf %54, %55 : vector<2x128xf32>
    %cst_25 = arith.constant 5.000000e-01 : f32
    %57 = vector.broadcast %cst_25 : f32 to vector<2x128xf32>
    %58 = arith.mulf %57, %56 : vector<2x128xf32>
    %59 = vector.extract_strided_slice %50 {offsets = [0, 128], sizes = [2, 128], strides = [1, 1]} : vector<2x512xf32> to vector<2x128xf32>
    %cst_26 = arith.constant 5.000000e-01 : f32
    %60 = vector.broadcast %cst_26 : f32 to vector<2x128xf32>
    %61 = arith.mulf %60, %59 : vector<2x128xf32>
    %62 = math.tanh %61 : vector<2x128xf32>
    %cst_27 = arith.constant 1.000000e+00 : f32
    %63 = vector.broadcast %cst_27 : f32 to vector<2x128xf32>
    %64 = arith.addf %62, %63 : vector<2x128xf32>
    %cst_28 = arith.constant 5.000000e-01 : f32
    %65 = vector.broadcast %cst_28 : f32 to vector<2x128xf32>
    %66 = arith.mulf %65, %64 : vector<2x128xf32>
    %67 = vector.extract_strided_slice %50 {offsets = [0, 256], sizes = [2, 128], strides = [1, 1]} : vector<2x512xf32> to vector<2x128xf32>
    %68 = math.tanh %67 : vector<2x128xf32>
    %69 = vector.extract_strided_slice %50 {offsets = [0, 384], sizes = [2, 128], strides = [1, 1]} : vector<2x512xf32> to vector<2x128xf32>
    %cst_29 = arith.constant 5.000000e-01 : f32
    %70 = vector.broadcast %cst_29 : f32 to vector<2x128xf32>
    %71 = arith.mulf %70, %69 : vector<2x128xf32>
    %72 = math.tanh %71 : vector<2x128xf32>
    %cst_30 = arith.constant 1.000000e+00 : f32
    %73 = vector.broadcast %cst_30 : f32 to vector<2x128xf32>
    %74 = arith.addf %72, %73 : vector<2x128xf32>
    %cst_31 = arith.constant 5.000000e-01 : f32
    %75 = vector.broadcast %cst_31 : f32 to vector<2x128xf32>
    %76 = arith.mulf %75, %74 : vector<2x128xf32>
    %77 = arith.mulf %66, %39 : vector<2x128xf32>
    %78 = arith.mulf %58, %68 : vector<2x128xf32>
    %79 = arith.addf %77, %78 : vector<2x128xf32>
    %80 = math.tanh %79 : vector<2x128xf32>
    %81 = arith.mulf %76, %80 : vector<2x128xf32>
    %82 = arith.index_cast %c1_i32 : i32 to index
    %c0_32 = arith.constant 0 : index
    %c0_33 = arith.constant 0 : index
    %83 = vector.load %arg4[%82, %c0_32, %c0_33] : memref<8x2x128xf32, #tpu.memory_space<vmem>>, vector<1x2x128xf32>
    %84 = vector.shape_cast %83 : vector<1x2x128xf32> to vector<2x128xf32>
    %85 = vector.shape_cast %81 : vector<2x128xf32> to vector<1x2x128xf32>
    tpu.vector_store %arg4[%82, %c0_32, %c0_33], %85 {strides = array<i32>} : memref<8x2x128xf32, #tpu.memory_space<vmem>>, vector<1x2x128xf32>,
    %c2_i32 = arith.constant 2 : i32
    %86 = arith.index_cast %c2_i32 : i32 to index
    %c0_34 = arith.constant 0 : index
    %c0_35 = arith.constant 0 : index
    %87 = vector.load %arg2[%86, %c0_34, %c0_35] : memref<8x2x512xf32, #tpu.memory_space<vmem>>, vector<1x2x512xf32>
    %88 = vector.shape_cast %87 : vector<1x2x512xf32> to vector<2x512xf32>
    %cst_36 = arith.constant dense<0.000000e+00> : vector<2x512xf32>
    %89 = tpu.matmul %81, %3, %cst_36 {dimension_numbers = #tpu.dot_dimension_numbers<[1], [0], [0], [1], [0, 0, 1, 1], [], []>} : vector<2x128xf32>, vector<128x512xf32>, vector<2x512xf32> -> vector<2x512xf32>
    %90 = arith.addf %88, %89 : vector<2x512xf32>
    %91 = vector.extract_strided_slice %90 {offsets = [0, 0], sizes = [2, 128], strides = [1, 1]} : vector<2x512xf32> to vector<2x128xf32>
    %cst_37 = arith.constant 5.000000e-01 : f32
    %92 = vector.broadcast %cst_37 : f32 to vector<2x128xf32>
    %93 = arith.mulf %92, %91 : vector<2x128xf32>
    %94 = math.tanh %93 : vector<2x128xf32>
    %cst_38 = arith.constant 1.000000e+00 : f32
    %95 = vector.broadcast %cst_38 : f32 to vector<2x128xf32>
    %96 = arith.addf %94, %95 : vector<2x128xf32>
    %cst_39 = arith.constant 5.000000e-01 : f32
    %97 = vector.broadcast %cst_39 : f32 to vector<2x128xf32>
    %98 = arith.mulf %97, %96 : vector<2x128xf32>
    %99 = vector.extract_strided_slice %90 {offsets = [0, 128], sizes = [2, 128], strides = [1, 1]} : vector<2x512xf32> to vector<2x128xf32>
    %cst_40 = arith.constant 5.000000e-01 : f32
    %100 = vector.broadcast %cst_40 : f32 to vector<2x128xf32>
    %101 = arith.mulf %100, %99 : vector<2x128xf32>
    %102 = math.tanh %101 : vector<2x128xf32>
    %cst_41 = arith.constant 1.000000e+00 : f32
    %103 = vector.broadcast %cst_41 : f32 to vector<2x128xf32>
    %104 = arith.addf %102, %103 : vector<2x128xf32>
    %cst_42 = arith.constant 5.000000e-01 : f32
    %105 = vector.broadcast %cst_42 : f32 to vector<2x128xf32>
    %106 = arith.mulf %105, %104 : vector<2x128xf32>
    %107 = vector.extract_strided_slice %90 {offsets = [0, 256], sizes = [2, 128], strides = [1, 1]} : vector<2x512xf32> to vector<2x128xf32>
    %108 = math.tanh %107 : vector<2x128xf32>
    %109 = vector.extract_strided_slice %90 {offsets = [0, 384], sizes = [2, 128], strides = [1, 1]} : vector<2x512xf32> to vector<2x128xf32>
    %cst_43 = arith.constant 5.000000e-01 : f32
    %110 = vector.broadcast %cst_43 : f32 to vector<2x128xf32>
    %111 = arith.mulf %110, %109 : vector<2x128xf32>
    %112 = math.tanh %111 : vector<2x128xf32>
    %cst_44 = arith.constant 1.000000e+00 : f32
    %113 = vector.broadcast %cst_44 : f32 to vector<2x128xf32>
    %114 = arith.addf %112, %113 : vector<2x128xf32>
    %cst_45 = arith.constant 5.000000e-01 : f32
    %115 = vector.broadcast %cst_45 : f32 to vector<2x128xf32>
    %116 = arith.mulf %115, %114 : vector<2x128xf32>
    %117 = arith.mulf %106, %79 : vector<2x128xf32>
    %118 = arith.mulf %98, %108 : vector<2x128xf32>
    %119 = arith.addf %117, %118 : vector<2x128xf32>
    %120 = math.tanh %119 : vector<2x128xf32>
    %121 = arith.mulf %116, %120 : vector<2x128xf32>
    %122 = arith.index_cast %c2_i32 : i32 to index
    %c0_46 = arith.constant 0 : index
    %c0_47 = arith.constant 0 : index
    %123 = vector.load %arg4[%122, %c0_46, %c0_47] : memref<8x2x128xf32, #tpu.memory_space<vmem>>, vector<1x2x128xf32>
    %124 = vector.shape_cast %123 : vector<1x2x128xf32> to vector<2x128xf32>
    %125 = vector.shape_cast %121 : vector<2x128xf32> to vector<1x2x128xf32>
    tpu.vector_store %arg4[%122, %c0_46, %c0_47], %125 {strides = array<i32>} : memref<8x2x128xf32, #tpu.memory_space<vmem>>, vector<1x2x128xf32>,
    %c3_i32 = arith.constant 3 : i32
    %126 = arith.index_cast %c3_i32 : i32 to index
    %c0_48 = arith.constant 0 : index
    %c0_49 = arith.constant 0 : index
    %127 = vector.load %arg2[%126, %c0_48, %c0_49] : memref<8x2x512xf32, #tpu.memory_space<vmem>>, vector<1x2x512xf32>
    %128 = vector.shape_cast %127 : vector<1x2x512xf32> to vector<2x512xf32>
    %cst_50 = arith.constant dense<0.000000e+00> : vector<2x512xf32>
    %129 = tpu.matmul %121, %3, %cst_50 {dimension_numbers = #tpu.dot_dimension_numbers<[1], [0], [0], [1], [0, 0, 1, 1], [], []>} : vector<2x128xf32>, vector<128x512xf32>, vector<2x512xf32> -> vector<2x512xf32>
    %130 = arith.addf %128, %129 : vector<2x512xf32>
    %131 = vector.extract_strided_slice %130 {offsets = [0, 0], sizes = [2, 128], strides = [1, 1]} : vector<2x512xf32> to vector<2x128xf32>
    %cst_51 = arith.constant 5.000000e-01 : f32
    %132 = vector.broadcast %cst_51 : f32 to vector<2x128xf32>
    %133 = arith.mulf %132, %131 : vector<2x128xf32>
    %134 = math.tanh %133 : vector<2x128xf32>
    %cst_52 = arith.constant 1.000000e+00 : f32
    %135 = vector.broadcast %cst_52 : f32 to vector<2x128xf32>
    %136 = arith.addf %134, %135 : vector<2x128xf32>
    %cst_53 = arith.constant 5.000000e-01 : f32
    %137 = vector.broadcast %cst_53 : f32 to vector<2x128xf32>
    %138 = arith.mulf %137, %136 : vector<2x128xf32>
    %139 = vector.extract_strided_slice %130 {offsets = [0, 128], sizes = [2, 128], strides = [1, 1]} : vector<2x512xf32> to vector<2x128xf32>
    %cst_54 = arith.constant 5.000000e-01 : f32
    %140 = vector.broadcast %cst_54 : f32 to vector<2x128xf32>
    %141 = arith.mulf %140, %139 : vector<2x128xf32>
    %142 = math.tanh %141 : vector<2x128xf32>
    %cst_55 = arith.constant 1.000000e+00 : f32
    %143 = vector.broadcast %cst_55 : f32 to vector<2x128xf32>
    %144 = arith.addf %142, %143 : vector<2x128xf32>
    %cst_56 = arith.constant 5.000000e-01 : f32
    %145 = vector.broadcast %cst_56 : f32 to vector<2x128xf32>
    %146 = arith.mulf %145, %144 : vector<2x128xf32>
    %147 = vector.extract_strided_slice %130 {offsets = [0, 256], sizes = [2, 128], strides = [1, 1]} : vector<2x512xf32> to vector<2x128xf32>
    %148 = math.tanh %147 : vector<2x128xf32>
    %149 = vector.extract_strided_slice %130 {offsets = [0, 384], sizes = [2, 128], strides = [1, 1]} : vector<2x512xf32> to vector<2x128xf32>
    %cst_57 = arith.constant 5.000000e-01 : f32
    %150 = vector.broadcast %cst_57 : f32 to vector<2x128xf32>
    %151 = arith.mulf %150, %149 : vector<2x128xf32>
    %152 = math.tanh %151 : vector<2x128xf32>
    %cst_58 = arith.constant 1.000000e+00 : f32
    %153 = vector.broadcast %cst_58 : f32 to vector<2x128xf32>
    %154 = arith.addf %152, %153 : vector<2x128xf32>
    %cst_59 = arith.constant 5.000000e-01 : f32
    %155 = vector.broadcast %cst_59 : f32 to vector<2x128xf32>
    %156 = arith.mulf %155, %154 : vector<2x128xf32>
    %157 = arith.mulf %146, %119 : vector<2x128xf32>
    %158 = arith.mulf %138, %148 : vector<2x128xf32>
    %159 = arith.addf %157, %158 : vector<2x128xf32>
    %160 = math.tanh %159 : vector<2x128xf32>
    %161 = arith.mulf %156, %160 : vector<2x128xf32>
    %162 = arith.index_cast %c3_i32 : i32 to index
    %c0_60 = arith.constant 0 : index
    %c0_61 = arith.constant 0 : index
    %163 = vector.load %arg4[%162, %c0_60, %c0_61] : memref<8x2x128xf32, #tpu.memory_space<vmem>>, vector<1x2x128xf32>
    %164 = vector.shape_cast %163 : vector<1x2x128xf32> to vector<2x128xf32>
    %165 = vector.shape_cast %161 : vector<2x128xf32> to vector<1x2x128xf32>
    tpu.vector_store %arg4[%162, %c0_60, %c0_61], %165 {strides = array<i32>} : memref<8x2x128xf32, #tpu.memory_space<vmem>>, vector<1x2x128xf32>,
    %c4_i32 = arith.constant 4 : i32
    %166 = arith.index_cast %c4_i32 : i32 to index
    %c0_62 = arith.constant 0 : index
    %c0_63 = arith.constant 0 : index
    %167 = vector.load %arg2[%166, %c0_62, %c0_63] : memref<8x2x512xf32, #tpu.memory_space<vmem>>, vector<1x2x512xf32>
    %168 = vector.shape_cast %167 : vector<1x2x512xf32> to vector<2x512xf32>
    %cst_64 = arith.constant dense<0.000000e+00> : vector<2x512xf32>
    %169 = tpu.matmul %161, %3, %cst_64 {dimension_numbers = #tpu.dot_dimension_numbers<[1], [0], [0], [1], [0, 0, 1, 1], [], []>} : vector<2x128xf32>, vector<128x512xf32>, vector<2x512xf32> -> vector<2x512xf32>
    %170 = arith.addf %168, %169 : vector<2x512xf32>
    %171 = vector.extract_strided_slice %170 {offsets = [0, 0], sizes = [2, 128], strides = [1, 1]} : vector<2x512xf32> to vector<2x128xf32>
    %cst_65 = arith.constant 5.000000e-01 : f32
    %172 = vector.broadcast %cst_65 : f32 to vector<2x128xf32>
    %173 = arith.mulf %172, %171 : vector<2x128xf32>
    %174 = math.tanh %173 : vector<2x128xf32>
    %cst_66 = arith.constant 1.000000e+00 : f32
    %175 = vector.broadcast %cst_66 : f32 to vector<2x128xf32>
    %176 = arith.addf %174, %175 : vector<2x128xf32>
    %cst_67 = arith.constant 5.000000e-01 : f32
    %177 = vector.broadcast %cst_67 : f32 to vector<2x128xf32>
    %178 = arith.mulf %177, %176 : vector<2x128xf32>
    %179 = vector.extract_strided_slice %170 {offsets = [0, 128], sizes = [2, 128], strides = [1, 1]} : vector<2x512xf32> to vector<2x128xf32>
    %cst_68 = arith.constant 5.000000e-01 : f32
    %180 = vector.broadcast %cst_68 : f32 to vector<2x128xf32>
    %181 = arith.mulf %180, %179 : vector<2x128xf32>
    %182 = math.tanh %181 : vector<2x128xf32>
    %cst_69 = arith.constant 1.000000e+00 : f32
    %183 = vector.broadcast %cst_69 : f32 to vector<2x128xf32>
    %184 = arith.addf %182, %183 : vector<2x128xf32>
    %cst_70 = arith.constant 5.000000e-01 : f32
    %185 = vector.broadcast %cst_70 : f32 to vector<2x128xf32>
    %186 = arith.mulf %185, %184 : vector<2x128xf32>
    %187 = vector.extract_strided_slice %170 {offsets = [0, 256], sizes = [2, 128], strides = [1, 1]} : vector<2x512xf32> to vector<2x128xf32>
    %188 = math.tanh %187 : vector<2x128xf32>
    %189 = vector.extract_strided_slice %170 {offsets = [0, 384], sizes = [2, 128], strides = [1, 1]} : vector<2x512xf32> to vector<2x128xf32>
    %cst_71 = arith.constant 5.000000e-01 : f32
    %190 = vector.broadcast %cst_71 : f32 to vector<2x128xf32>
    %191 = arith.mulf %190, %189 : vector<2x128xf32>
    %192 = math.tanh %191 : vector<2x128xf32>
    %cst_72 = arith.constant 1.000000e+00 : f32
    %193 = vector.broadcast %cst_72 : f32 to vector<2x128xf32>
    %194 = arith.addf %192, %193 : vector<2x128xf32>
    %cst_73 = arith.constant 5.000000e-01 : f32
    %195 = vector.broadcast %cst_73 : f32 to vector<2x128xf32>
    %196 = arith.mulf %195, %194 : vector<2x128xf32>
    %197 = arith.mulf %186, %159 : vector<2x128xf32>
    %198 = arith.mulf %178, %188 : vector<2x128xf32>
    %199 = arith.addf %197, %198 : vector<2x128xf32>
    %200 = math.tanh %199 : vector<2x128xf32>
    %201 = arith.mulf %196, %200 : vector<2x128xf32>
    %202 = arith.index_cast %c4_i32 : i32 to index
    %c0_74 = arith.constant 0 : index
    %c0_75 = arith.constant 0 : index
    %203 = vector.load %arg4[%202, %c0_74, %c0_75] : memref<8x2x128xf32, #tpu.memory_space<vmem>>, vector<1x2x128xf32>
    %204 = vector.shape_cast %203 : vector<1x2x128xf32> to vector<2x128xf32>
    %205 = vector.shape_cast %201 : vector<2x128xf32> to vector<1x2x128xf32>
    tpu.vector_store %arg4[%202, %c0_74, %c0_75], %205 {strides = array<i32>} : memref<8x2x128xf32, #tpu.memory_space<vmem>>, vector<1x2x128xf32>,
    %c5_i32 = arith.constant 5 : i32
    %206 = arith.index_cast %c5_i32 : i32 to index
    %c0_76 = arith.constant 0 : index
    %c0_77 = arith.constant 0 : index
    %207 = vector.load %arg2[%206, %c0_76, %c0_77] : memref<8x2x512xf32, #tpu.memory_space<vmem>>, vector<1x2x512xf32>
    %208 = vector.shape_cast %207 : vector<1x2x512xf32> to vector<2x512xf32>
    %cst_78 = arith.constant dense<0.000000e+00> : vector<2x512xf32>
    %209 = tpu.matmul %201, %3, %cst_78 {dimension_numbers = #tpu.dot_dimension_numbers<[1], [0], [0], [1], [0, 0, 1, 1], [], []>} : vector<2x128xf32>, vector<128x512xf32>, vector<2x512xf32> -> vector<2x512xf32>
    %210 = arith.addf %208, %209 : vector<2x512xf32>
    %211 = vector.extract_strided_slice %210 {offsets = [0, 0], sizes = [2, 128], strides = [1, 1]} : vector<2x512xf32> to vector<2x128xf32>
    %cst_79 = arith.constant 5.000000e-01 : f32
    %212 = vector.broadcast %cst_79 : f32 to vector<2x128xf32>
    %213 = arith.mulf %212, %211 : vector<2x128xf32>
    %214 = math.tanh %213 : vector<2x128xf32>
    %cst_80 = arith.constant 1.000000e+00 : f32
    %215 = vector.broadcast %cst_80 : f32 to vector<2x128xf32>
    %216 = arith.addf %214, %215 : vector<2x128xf32>
    %cst_81 = arith.constant 5.000000e-01 : f32
    %217 = vector.broadcast %cst_81 : f32 to vector<2x128xf32>
    %218 = arith.mulf %217, %216 : vector<2x128xf32>
    %219 = vector.extract_strided_slice %210 {offsets = [0, 128], sizes = [2, 128], strides = [1, 1]} : vector<2x512xf32> to vector<2x128xf32>
    %cst_82 = arith.constant 5.000000e-01 : f32
    %220 = vector.broadcast %cst_82 : f32 to vector<2x128xf32>
    %221 = arith.mulf %220, %219 : vector<2x128xf32>
    %222 = math.tanh %221 : vector<2x128xf32>
    %cst_83 = arith.constant 1.000000e+00 : f32
    %223 = vector.broadcast %cst_83 : f32 to vector<2x128xf32>
    %224 = arith.addf %222, %223 : vector<2x128xf32>
    %cst_84 = arith.constant 5.000000e-01 : f32
    %225 = vector.broadcast %cst_84 : f32 to vector<2x128xf32>
    %226 = arith.mulf %225, %224 : vector<2x128xf32>
    %227 = vector.extract_strided_slice %210 {offsets = [0, 256], sizes = [2, 128], strides = [1, 1]} : vector<2x512xf32> to vector<2x128xf32>
    %228 = math.tanh %227 : vector<2x128xf32>
    %229 = vector.extract_strided_slice %210 {offsets = [0, 384], sizes = [2, 128], strides = [1, 1]} : vector<2x512xf32> to vector<2x128xf32>
    %cst_85 = arith.constant 5.000000e-01 : f32
    %230 = vector.broadcast %cst_85 : f32 to vector<2x128xf32>
    %231 = arith.mulf %230, %229 : vector<2x128xf32>
    %232 = math.tanh %231 : vector<2x128xf32>
    %cst_86 = arith.constant 1.000000e+00 : f32
    %233 = vector.broadcast %cst_86 : f32 to vector<2x128xf32>
    %234 = arith.addf %232, %233 : vector<2x128xf32>
    %cst_87 = arith.constant 5.000000e-01 : f32
    %235 = vector.broadcast %cst_87 : f32 to vector<2x128xf32>
    %236 = arith.mulf %235, %234 : vector<2x128xf32>
    %237 = arith.mulf %226, %199 : vector<2x128xf32>
    %238 = arith.mulf %218, %228 : vector<2x128xf32>
    %239 = arith.addf %237, %238 : vector<2x128xf32>
    %240 = math.tanh %239 : vector<2x128xf32>
    %241 = arith.mulf %236, %240 : vector<2x128xf32>
    %242 = arith.index_cast %c5_i32 : i32 to index
    %c0_88 = arith.constant 0 : index
    %c0_89 = arith.constant 0 : index
    %243 = vector.load %arg4[%242, %c0_88, %c0_89] : memref<8x2x128xf32, #tpu.memory_space<vmem>>, vector<1x2x128xf32>
    %244 = vector.shape_cast %243 : vector<1x2x128xf32> to vector<2x128xf32>
    %245 = vector.shape_cast %241 : vector<2x128xf32> to vector<1x2x128xf32>
    tpu.vector_store %arg4[%242, %c0_88, %c0_89], %245 {strides = array<i32>} : memref<8x2x128xf32, #tpu.memory_space<vmem>>, vector<1x2x128xf32>,
    %c6_i32 = arith.constant 6 : i32
    %246 = arith.index_cast %c6_i32 : i32 to index
    %c0_90 = arith.constant 0 : index
    %c0_91 = arith.constant 0 : index
    %247 = vector.load %arg2[%246, %c0_90, %c0_91] : memref<8x2x512xf32, #tpu.memory_space<vmem>>, vector<1x2x512xf32>
    %248 = vector.shape_cast %247 : vector<1x2x512xf32> to vector<2x512xf32>
    %cst_92 = arith.constant dense<0.000000e+00> : vector<2x512xf32>
    %249 = tpu.matmul %241, %3, %cst_92 {dimension_numbers = #tpu.dot_dimension_numbers<[1], [0], [0], [1], [0, 0, 1, 1], [], []>} : vector<2x128xf32>, vector<128x512xf32>, vector<2x512xf32> -> vector<2x512xf32>
    %250 = arith.addf %248, %249 : vector<2x512xf32>
    %251 = vector.extract_strided_slice %250 {offsets = [0, 0], sizes = [2, 128], strides = [1, 1]} : vector<2x512xf32> to vector<2x128xf32>
    %cst_93 = arith.constant 5.000000e-01 : f32
    %252 = vector.broadcast %cst_93 : f32 to vector<2x128xf32>
    %253 = arith.mulf %252, %251 : vector<2x128xf32>
    %254 = math.tanh %253 : vector<2x128xf32>
    %cst_94 = arith.constant 1.000000e+00 : f32
    %255 = vector.broadcast %cst_94 : f32 to vector<2x128xf32>
    %256 = arith.addf %254, %255 : vector<2x128xf32>
    %cst_95 = arith.constant 5.000000e-01 : f32
    %257 = vector.broadcast %cst_95 : f32 to vector<2x128xf32>
    %258 = arith.mulf %257, %256 : vector<2x128xf32>
    %259 = vector.extract_strided_slice %250 {offsets = [0, 128], sizes = [2, 128], strides = [1, 1]} : vector<2x512xf32> to vector<2x128xf32>
    %cst_96 = arith.constant 5.000000e-01 : f32
    %260 = vector.broadcast %cst_96 : f32 to vector<2x128xf32>
    %261 = arith.mulf %260, %259 : vector<2x128xf32>
    %262 = math.tanh %261 : vector<2x128xf32>
    %cst_97 = arith.constant 1.000000e+00 : f32
    %263 = vector.broadcast %cst_97 : f32 to vector<2x128xf32>
    %264 = arith.addf %262, %263 : vector<2x128xf32>
    %cst_98 = arith.constant 5.000000e-01 : f32
    %265 = vector.broadcast %cst_98 : f32 to vector<2x128xf32>
    %266 = arith.mulf %265, %264 : vector<2x128xf32>
    %267 = vector.extract_strided_slice %250 {offsets = [0, 256], sizes = [2, 128], strides = [1, 1]} : vector<2x512xf32> to vector<2x128xf32>
    %268 = math.tanh %267 : vector<2x128xf32>
    %269 = vector.extract_strided_slice %250 {offsets = [0, 384], sizes = [2, 128], strides = [1, 1]} : vector<2x512xf32> to vector<2x128xf32>
    %cst_99 = arith.constant 5.000000e-01 : f32
    %270 = vector.broadcast %cst_99 : f32 to vector<2x128xf32>
    %271 = arith.mulf %270, %269 : vector<2x128xf32>
    %272 = math.tanh %271 : vector<2x128xf32>
    %cst_100 = arith.constant 1.000000e+00 : f32
    %273 = vector.broadcast %cst_100 : f32 to vector<2x128xf32>
    %274 = arith.addf %272, %273 : vector<2x128xf32>
    %cst_101 = arith.constant 5.000000e-01 : f32
    %275 = vector.broadcast %cst_101 : f32 to vector<2x128xf32>
    %276 = arith.mulf %275, %274 : vector<2x128xf32>
    %277 = arith.mulf %266, %239 : vector<2x128xf32>
    %278 = arith.mulf %258, %268 : vector<2x128xf32>
    %279 = arith.addf %277, %278 : vector<2x128xf32>
    %280 = math.tanh %279 : vector<2x128xf32>
    %281 = arith.mulf %276, %280 : vector<2x128xf32>
    %282 = arith.index_cast %c6_i32 : i32 to index
    %c0_102 = arith.constant 0 : index
    %c0_103 = arith.constant 0 : index
    %283 = vector.load %arg4[%282, %c0_102, %c0_103] : memref<8x2x128xf32, #tpu.memory_space<vmem>>, vector<1x2x128xf32>
    %284 = vector.shape_cast %283 : vector<1x2x128xf32> to vector<2x128xf32>
    %285 = vector.shape_cast %281 : vector<2x128xf32> to vector<1x2x128xf32>
    tpu.vector_store %arg4[%282, %c0_102, %c0_103], %285 {strides = array<i32>} : memref<8x2x128xf32, #tpu.memory_space<vmem>>, vector<1x2x128xf32>,
    %c7_i32 = arith.constant 7 : i32
    %286 = arith.index_cast %c7_i32 : i32 to index
    %c0_104 = arith.constant 0 : index
    %c0_105 = arith.constant 0 : index
    %287 = vector.load %arg2[%286, %c0_104, %c0_105] : memref<8x2x512xf32, #tpu.memory_space<vmem>>, vector<1x2x512xf32>
    %288 = vector.shape_cast %287 : vector<1x2x512xf32> to vector<2x512xf32>
    %cst_106 = arith.constant dense<0.000000e+00> : vector<2x512xf32>
    %289 = tpu.matmul %281, %3, %cst_106 {dimension_numbers = #tpu.dot_dimension_numbers<[1], [0], [0], [1], [0, 0, 1, 1], [], []>} : vector<2x128xf32>, vector<128x512xf32>, vector<2x512xf32> -> vector<2x512xf32>
    %290 = arith.addf %288, %289 : vector<2x512xf32>
    %291 = vector.extract_strided_slice %290 {offsets = [0, 0], sizes = [2, 128], strides = [1, 1]} : vector<2x512xf32> to vector<2x128xf32>
    %cst_107 = arith.constant 5.000000e-01 : f32
    %292 = vector.broadcast %cst_107 : f32 to vector<2x128xf32>
    %293 = arith.mulf %292, %291 : vector<2x128xf32>
    %294 = math.tanh %293 : vector<2x128xf32>
    %cst_108 = arith.constant 1.000000e+00 : f32
    %295 = vector.broadcast %cst_108 : f32 to vector<2x128xf32>
    %296 = arith.addf %294, %295 : vector<2x128xf32>
    %cst_109 = arith.constant 5.000000e-01 : f32
    %297 = vector.broadcast %cst_109 : f32 to vector<2x128xf32>
    %298 = arith.mulf %297, %296 : vector<2x128xf32>
    %299 = vector.extract_strided_slice %290 {offsets = [0, 128], sizes = [2, 128], strides = [1, 1]} : vector<2x512xf32> to vector<2x128xf32>
    %cst_110 = arith.constant 5.000000e-01 : f32
    %300 = vector.broadcast %cst_110 : f32 to vector<2x128xf32>
    %301 = arith.mulf %300, %299 : vector<2x128xf32>
    %302 = math.tanh %301 : vector<2x128xf32>
    %cst_111 = arith.constant 1.000000e+00 : f32
    %303 = vector.broadcast %cst_111 : f32 to vector<2x128xf32>
    %304 = arith.addf %302, %303 : vector<2x128xf32>
    %cst_112 = arith.constant 5.000000e-01 : f32
    %305 = vector.broadcast %cst_112 : f32 to vector<2x128xf32>
    %306 = arith.mulf %305, %304 : vector<2x128xf32>
    %307 = vector.extract_strided_slice %290 {offsets = [0, 256], sizes = [2, 128], strides = [1, 1]} : vector<2x512xf32> to vector<2x128xf32>
    %308 = math.tanh %307 : vector<2x128xf32>
    %309 = vector.extract_strided_slice %290 {offsets = [0, 384], sizes = [2, 128], strides = [1, 1]} : vector<2x512xf32> to vector<2x128xf32>
    %cst_113 = arith.constant 5.000000e-01 : f32
    %310 = vector.broadcast %cst_113 : f32 to vector<2x128xf32>
    %311 = arith.mulf %310, %309 : vector<2x128xf32>
    %312 = math.tanh %311 : vector<2x128xf32>
    %cst_114 = arith.constant 1.000000e+00 : f32
    %313 = vector.broadcast %cst_114 : f32 to vector<2x128xf32>
    %314 = arith.addf %312, %313 : vector<2x128xf32>
    %cst_115 = arith.constant 5.000000e-01 : f32
    %315 = vector.broadcast %cst_115 : f32 to vector<2x128xf32>
    %316 = arith.mulf %315, %314 : vector<2x128xf32>
    %317 = arith.mulf %306, %279 : vector<2x128xf32>
    %318 = arith.mulf %298, %308 : vector<2x128xf32>
    %319 = arith.addf %317, %318 : vector<2x128xf32>
    %320 = math.tanh %319 : vector<2x128xf32>
    %321 = arith.mulf %316, %320 : vector<2x128xf32>
    %322 = arith.index_cast %c7_i32 : i32 to index
    %c0_116 = arith.constant 0 : index
    %c0_117 = arith.constant 0 : index
    %323 = vector.load %arg4[%322, %c0_116, %c0_117] : memref<8x2x128xf32, #tpu.memory_space<vmem>>, vector<1x2x128xf32>
    %324 = vector.shape_cast %323 : vector<1x2x128xf32> to vector<2x128xf32>
    %325 = vector.shape_cast %321 : vector<2x128xf32> to vector<1x2x128xf32>
    tpu.vector_store %arg4[%322, %c0_116, %c0_117], %325 {strides = array<i32>} : memref<8x2x128xf32, #tpu.memory_space<vmem>>, vector<1x2x128xf32>,
    %c8_i32 = arith.constant 8 : i32
    %c0_118 = arith.constant 0 : index
    %c0_119 = arith.constant 0 : index
    %326 = vector.load %arg6[%c0_118, %c0_119] : memref<2x128xf32, #tpu.memory_space<vmem>>, vector<2x128xf32>
    tpu.vector_store %arg6[%c0_118, %c0_119], %321 {strides = array<i32>} : memref<2x128xf32, #tpu.memory_space<vmem>>, vector<2x128xf32>,
    %c0_120 = arith.constant 0 : index
    %c0_121 = arith.constant 0 : index
    %327 = vector.load %arg7[%c0_120, %c0_121] : memref<2x128xf32, #tpu.memory_space<vmem>>, vector<2x128xf32>
    tpu.vector_store %arg7[%c0_120, %c0_121], %319 {strides = array<i32>} : memref<2x128xf32, #tpu.memory_space<vmem>>, vector<2x128xf32>,
    %c0_i32_122 = arith.constant 0 : i32
    %328 = arith.cmpi eq, %arg1, %c0_i32_122 : i32
    %329 = arith.extui %328 : i1 to i32
    %c0_i32_123 = arith.constant 0 : i32
    %330 = arith.cmpi ne, %329, %c0_i32_123 : i32
    scf.if %330 {
      %c0_124 = arith.constant 0 : index
      %c0_125 = arith.constant 0 : index
      %331 = vector.load %arg5[%c0_124, %c0_125] : memref<2x128xf32, #tpu.memory_space<vmem>>, vector<2x128xf32>
      tpu.vector_store %arg5[%c0_124, %c0_125], %321 {strides = array<i32>} : memref<2x128xf32, #tpu.memory_space<vmem>>, vector<2x128xf32>,
    } else {
    }
    return
  }
  func.func @transform_0(%arg0: i32, %arg1: i32) -> (i32, i32, i32) {
    %c0_i32 = arith.constant 0 : i32
    %c0_i32_0 = arith.constant 0 : i32
    return %arg1, %arg0, %c0_i32 : i32, i32, i32
  }
  func.func @transform_1(%arg0: i32, %arg1: i32) -> (i32, i32) {
    %c0_i32 = arith.constant 0 : i32
    %c0_i32_0 = arith.constant 0 : i32
    %c0_i32_1 = arith.constant 0 : i32
    return %c0_i32, %c0_i32_0 : i32, i32
  }
  func.func @transform_2(%arg0: i32, %arg1: i32) -> (i32, i32, i32) {
    %c0_i32 = arith.constant 0 : i32
    %c0_i32_0 = arith.constant 0 : i32
    return %arg1, %arg0, %c0_i32 : i32, i32, i32
  }
  func.func @transform_3(%arg0: i32, %arg1: i32) -> (i32, i32) {
    %c0_i32 = arith.constant 0 : i32
    %c0_i32_0 = arith.constant 0 : i32
    return %arg0, %c0_i32 : i32, i32
  }
}

module attributes {stable_mosaic.version = 11 : i64} {
  func.func @_proj_kernel(%arg0: i32, %arg1: memref<8x16xf32, #tpu.memory_space<vmem>>, %arg2: memref<16x512xf32, #tpu.memory_space<vmem>>, %arg3: memref<1x512xf32, #tpu.memory_space<vmem>>, %arg4: memref<8x512xf32, #tpu.memory_space<vmem>>) attributes {dimension_semantics = [#tpu.dimension_semantics<parallel>], iteration_bounds = array<i64: 2>, scalar_prefetch = 0 : i64, scratch_operands = 0 : i64, tpu.core_type = #tpu.core_type<tc>, window_params = [{transform_indices = @transform_0, window_bounds = array<i64: 8, 16>}, {pipeline_mode = #tpu.pipeline_mode<synchronous>, transform_indices = @transform_1, window_bounds = array<i64: 16, 512>}, {pipeline_mode = #tpu.pipeline_mode<synchronous>, transform_indices = @transform_2, window_bounds = array<i64: 1, 512>}, {transform_indices = @transform_3, window_bounds = array<i64: 8, 512>}]} {
    %c0 = arith.constant 0 : index
    %c0_0 = arith.constant 0 : index
    %0 = vector.load %arg1[%c0, %c0_0] : memref<8x16xf32, #tpu.memory_space<vmem>>, vector<8x16xf32>
    %c0_1 = arith.constant 0 : index
    %c0_2 = arith.constant 0 : index
    %1 = vector.load %arg2[%c0_1, %c0_2] : memref<16x512xf32, #tpu.memory_space<vmem>>, vector<16x512xf32>
    %cst = arith.constant dense<0.000000e+00> : vector<8x512xf32>
    %2 = tpu.matmul %0, %1, %cst {dimension_numbers = #tpu.dot_dimension_numbers<[1], [0], [0], [1], [0, 0, 1, 1], [], []>} : vector<8x16xf32>, vector<16x512xf32>, vector<8x512xf32> -> vector<8x512xf32>
    %c0_3 = arith.constant 0 : index
    %c0_4 = arith.constant 0 : index
    %3 = vector.load %arg3[%c0_3, %c0_4] : memref<1x512xf32, #tpu.memory_space<vmem>>, vector<1x512xf32>
    %4 = vector.broadcast %3 : vector<1x512xf32> to vector<8x512xf32>
    %5 = arith.addf %2, %4 : vector<8x512xf32>
    %c0_5 = arith.constant 0 : index
    %c0_6 = arith.constant 0 : index
    %6 = vector.load %arg4[%c0_5, %c0_6] : memref<8x512xf32, #tpu.memory_space<vmem>>, vector<8x512xf32>
    tpu.vector_store %arg4[%c0_5, %c0_6], %5 {strides = array<i32>} : memref<8x512xf32, #tpu.memory_space<vmem>>, vector<8x512xf32>,
    return
  }
  func.func @transform_0(%arg0: i32) -> (i32, i32) {
    %c0_i32 = arith.constant 0 : i32
    %c0_i32_0 = arith.constant 0 : i32
    return %arg0, %c0_i32 : i32, i32
  }
  func.func @transform_1(%arg0: i32) -> (i32, i32) {
    %c0_i32 = arith.constant 0 : i32
    %c0_i32_0 = arith.constant 0 : i32
    %c0_i32_1 = arith.constant 0 : i32
    return %c0_i32, %c0_i32_0 : i32, i32
  }
  func.func @transform_2(%arg0: i32) -> (i32, i32) {
    %c0_i32 = arith.constant 0 : i32
    %c0_i32_0 = arith.constant 0 : i32
    %c0_i32_1 = arith.constant 0 : i32
    return %c0_i32, %c0_i32_0 : i32, i32
  }
  func.func @transform_3(%arg0: i32) -> (i32, i32) {
    %c0_i32 = arith.constant 0 : i32
    %c0_i32_0 = arith.constant 0 : i32
    return %arg0, %c0_i32 : i32, i32
  }
}

module attributes {stable_mosaic.version = 11 : i64} {
  func.func @_proj_kernel(%arg0: i32, %arg1: memref<8x128xf32, #tpu.memory_space<vmem>>, %arg2: memref<128x512xf32, #tpu.memory_space<vmem>>, %arg3: memref<1x512xf32, #tpu.memory_space<vmem>>, %arg4: memref<8x512xf32, #tpu.memory_space<vmem>>) attributes {dimension_semantics = [#tpu.dimension_semantics<parallel>], iteration_bounds = array<i64: 2>, scalar_prefetch = 0 : i64, scratch_operands = 0 : i64, tpu.core_type = #tpu.core_type<tc>, window_params = [{transform_indices = @transform_0, window_bounds = array<i64: 8, 128>}, {pipeline_mode = #tpu.pipeline_mode<synchronous>, transform_indices = @transform_1, window_bounds = array<i64: 128, 512>}, {pipeline_mode = #tpu.pipeline_mode<synchronous>, transform_indices = @transform_2, window_bounds = array<i64: 1, 512>}, {transform_indices = @transform_3, window_bounds = array<i64: 8, 512>}]} {
    %c0 = arith.constant 0 : index
    %c0_0 = arith.constant 0 : index
    %0 = vector.load %arg1[%c0, %c0_0] : memref<8x128xf32, #tpu.memory_space<vmem>>, vector<8x128xf32>
    %c0_1 = arith.constant 0 : index
    %c0_2 = arith.constant 0 : index
    %1 = vector.load %arg2[%c0_1, %c0_2] : memref<128x512xf32, #tpu.memory_space<vmem>>, vector<128x512xf32>
    %cst = arith.constant dense<0.000000e+00> : vector<8x512xf32>
    %2 = tpu.matmul %0, %1, %cst {dimension_numbers = #tpu.dot_dimension_numbers<[1], [0], [0], [1], [0, 0, 1, 1], [], []>} : vector<8x128xf32>, vector<128x512xf32>, vector<8x512xf32> -> vector<8x512xf32>
    %c0_3 = arith.constant 0 : index
    %c0_4 = arith.constant 0 : index
    %3 = vector.load %arg3[%c0_3, %c0_4] : memref<1x512xf32, #tpu.memory_space<vmem>>, vector<1x512xf32>
    %4 = vector.broadcast %3 : vector<1x512xf32> to vector<8x512xf32>
    %5 = arith.addf %2, %4 : vector<8x512xf32>
    %c0_5 = arith.constant 0 : index
    %c0_6 = arith.constant 0 : index
    %6 = vector.load %arg4[%c0_5, %c0_6] : memref<8x512xf32, #tpu.memory_space<vmem>>, vector<8x512xf32>
    tpu.vector_store %arg4[%c0_5, %c0_6], %5 {strides = array<i32>} : memref<8x512xf32, #tpu.memory_space<vmem>>, vector<8x512xf32>,
    return
  }
  func.func @transform_0(%arg0: i32) -> (i32, i32) {
    %c0_i32 = arith.constant 0 : i32
    %c0_i32_0 = arith.constant 0 : i32
    return %arg0, %c0_i32 : i32, i32
  }
  func.func @transform_1(%arg0: i32) -> (i32, i32) {
    %c0_i32 = arith.constant 0 : i32
    %c0_i32_0 = arith.constant 0 : i32
    %c0_i32_1 = arith.constant 0 : i32
    return %c0_i32, %c0_i32_0 : i32, i32
  }
  func.func @transform_2(%arg0: i32) -> (i32, i32) {
    %c0_i32 = arith.constant 0 : i32
    %c0_i32_0 = arith.constant 0 : i32
    %c0_i32_1 = arith.constant 0 : i32
    return %c0_i32, %c0_i32_0 : i32, i32
  }
  func.func @transform_3(%arg0: i32) -> (i32, i32) {
    %c0_i32 = arith.constant 0 : i32
    %c0_i32_0 = arith.constant 0 : i32
    return %arg0, %c0_i32 : i32, i32
  }
}

module attributes {stable_mosaic.version = 11 : i64} {
  func.func @kernel(%arg0: i32, %arg1: i32, %arg2: memref<8x2x512xf32, #tpu.memory_space<vmem>>, %arg3: memref<128x512xf32, #tpu.memory_space<vmem>>, %arg4: memref<2x128xf32, #tpu.memory_space<vmem>>, %arg5: memref<2x128xf32, #tpu.memory_space<vmem>>, %arg6: memref<2x128xf32, #tpu.memory_space<vmem>>) attributes {dimension_semantics = [#tpu.dimension_semantics<parallel>, #tpu.dimension_semantics<arbitrary>], iteration_bounds = array<i64: 1, 1>, scalar_prefetch = 0 : i64, scratch_operands = 2 : i64, tpu.core_type = #tpu.core_type<tc>, window_params = [{transform_indices = @transform_0, window_bounds = array<i64: 8, 2, 512>}, {pipeline_mode = #tpu.pipeline_mode<synchronous>, transform_indices = @transform_1, window_bounds = array<i64: 128, 512>}, {transform_indices = @transform_2, window_bounds = array<i64: 2, 128>}]} {
    %c0_i32 = arith.constant 0 : i32
    %0 = arith.cmpi eq, %arg1, %c0_i32 : i32
    %1 = arith.extui %0 : i1 to i32
    %c0_i32_0 = arith.constant 0 : i32
    %2 = arith.cmpi ne, %1, %c0_i32_0 : i32
    scf.if %2 {
      %cst_108 = arith.constant 0.000000e+00 : f32
      %299 = vector.broadcast %cst_108 : f32 to vector<2x128xf32>
      %c0_109 = arith.constant 0 : index
      %c0_110 = arith.constant 0 : index
      %300 = vector.load %arg5[%c0_109, %c0_110] : memref<2x128xf32, #tpu.memory_space<vmem>>, vector<2x128xf32>
      tpu.vector_store %arg5[%c0_109, %c0_110], %299 {strides = array<i32>} : memref<2x128xf32, #tpu.memory_space<vmem>>, vector<2x128xf32>,
      %cst_111 = arith.constant 0.000000e+00 : f32
      %301 = vector.broadcast %cst_111 : f32 to vector<2x128xf32>
      %c0_112 = arith.constant 0 : index
      %c0_113 = arith.constant 0 : index
      %302 = vector.load %arg6[%c0_112, %c0_113] : memref<2x128xf32, #tpu.memory_space<vmem>>, vector<2x128xf32>
      tpu.vector_store %arg6[%c0_112, %c0_113], %301 {strides = array<i32>} : memref<2x128xf32, #tpu.memory_space<vmem>>, vector<2x128xf32>,
    } else {
    }
    %c0 = arith.constant 0 : index
    %c0_1 = arith.constant 0 : index
    %3 = vector.load %arg3[%c0, %c0_1] : memref<128x512xf32, #tpu.memory_space<vmem>>, vector<128x512xf32>
    %c0_2 = arith.constant 0 : index
    %c0_3 = arith.constant 0 : index
    %4 = vector.load %arg5[%c0_2, %c0_3] : memref<2x128xf32, #tpu.memory_space<vmem>>, vector<2x128xf32>
    %c0_4 = arith.constant 0 : index
    %c0_5 = arith.constant 0 : index
    %5 = vector.load %arg6[%c0_4, %c0_5] : memref<2x128xf32, #tpu.memory_space<vmem>>, vector<2x128xf32>
    %c0_i32_6 = arith.constant 0 : i32
    %6 = arith.index_cast %c0_i32_6 : i32 to index
    %c0_7 = arith.constant 0 : index
    %c0_8 = arith.constant 0 : index
    %7 = vector.load %arg2[%6, %c0_7, %c0_8] : memref<8x2x512xf32, #tpu.memory_space<vmem>>, vector<1x2x512xf32>
    %8 = vector.shape_cast %7 : vector<1x2x512xf32> to vector<2x512xf32>
    %cst = arith.constant dense<0.000000e+00> : vector<2x512xf32>
    %9 = tpu.matmul %4, %3, %cst {dimension_numbers = #tpu.dot_dimension_numbers<[1], [0], [0], [1], [0, 0, 1, 1], [], []>} : vector<2x128xf32>, vector<128x512xf32>, vector<2x512xf32> -> vector<2x512xf32>
    %10 = arith.addf %8, %9 : vector<2x512xf32>
    %11 = vector.extract_strided_slice %10 {offsets = [0, 0], sizes = [2, 128], strides = [1, 1]} : vector<2x512xf32> to vector<2x128xf32>
    %cst_9 = arith.constant 5.000000e-01 : f32
    %12 = vector.broadcast %cst_9 : f32 to vector<2x128xf32>
    %13 = arith.mulf %12, %11 : vector<2x128xf32>
    %14 = math.tanh %13 : vector<2x128xf32>
    %cst_10 = arith.constant 1.000000e+00 : f32
    %15 = vector.broadcast %cst_10 : f32 to vector<2x128xf32>
    %16 = arith.addf %14, %15 : vector<2x128xf32>
    %cst_11 = arith.constant 5.000000e-01 : f32
    %17 = vector.broadcast %cst_11 : f32 to vector<2x128xf32>
    %18 = arith.mulf %17, %16 : vector<2x128xf32>
    %19 = vector.extract_strided_slice %10 {offsets = [0, 128], sizes = [2, 128], strides = [1, 1]} : vector<2x512xf32> to vector<2x128xf32>
    %cst_12 = arith.constant 5.000000e-01 : f32
    %20 = vector.broadcast %cst_12 : f32 to vector<2x128xf32>
    %21 = arith.mulf %20, %19 : vector<2x128xf32>
    %22 = math.tanh %21 : vector<2x128xf32>
    %cst_13 = arith.constant 1.000000e+00 : f32
    %23 = vector.broadcast %cst_13 : f32 to vector<2x128xf32>
    %24 = arith.addf %22, %23 : vector<2x128xf32>
    %cst_14 = arith.constant 5.000000e-01 : f32
    %25 = vector.broadcast %cst_14 : f32 to vector<2x128xf32>
    %26 = arith.mulf %25, %24 : vector<2x128xf32>
    %27 = vector.extract_strided_slice %10 {offsets = [0, 256], sizes = [2, 128], strides = [1, 1]} : vector<2x512xf32> to vector<2x128xf32>
    %28 = math.tanh %27 : vector<2x128xf32>
    %29 = vector.extract_strided_slice %10 {offsets = [0, 384], sizes = [2, 128], strides = [1, 1]} : vector<2x512xf32> to vector<2x128xf32>
    %cst_15 = arith.constant 5.000000e-01 : f32
    %30 = vector.broadcast %cst_15 : f32 to vector<2x128xf32>
    %31 = arith.mulf %30, %29 : vector<2x128xf32>
    %32 = math.tanh %31 : vector<2x128xf32>
    %cst_16 = arith.constant 1.000000e+00 : f32
    %33 = vector.broadcast %cst_16 : f32 to vector<2x128xf32>
    %34 = arith.addf %32, %33 : vector<2x128xf32>
    %cst_17 = arith.constant 5.000000e-01 : f32
    %35 = vector.broadcast %cst_17 : f32 to vector<2x128xf32>
    %36 = arith.mulf %35, %34 : vector<2x128xf32>
    %37 = arith.mulf %26, %5 : vector<2x128xf32>
    %38 = arith.mulf %18, %28 : vector<2x128xf32>
    %39 = arith.addf %37, %38 : vector<2x128xf32>
    %40 = math.tanh %39 : vector<2x128xf32>
    %41 = arith.mulf %36, %40 : vector<2x128xf32>
    %c1_i32 = arith.constant 1 : i32
    %42 = arith.index_cast %c1_i32 : i32 to index
    %c0_18 = arith.constant 0 : index
    %c0_19 = arith.constant 0 : index
    %43 = vector.load %arg2[%42, %c0_18, %c0_19] : memref<8x2x512xf32, #tpu.memory_space<vmem>>, vector<1x2x512xf32>
    %44 = vector.shape_cast %43 : vector<1x2x512xf32> to vector<2x512xf32>
    %cst_20 = arith.constant dense<0.000000e+00> : vector<2x512xf32>
    %45 = tpu.matmul %41, %3, %cst_20 {dimension_numbers = #tpu.dot_dimension_numbers<[1], [0], [0], [1], [0, 0, 1, 1], [], []>} : vector<2x128xf32>, vector<128x512xf32>, vector<2x512xf32> -> vector<2x512xf32>
    %46 = arith.addf %44, %45 : vector<2x512xf32>
    %47 = vector.extract_strided_slice %46 {offsets = [0, 0], sizes = [2, 128], strides = [1, 1]} : vector<2x512xf32> to vector<2x128xf32>
    %cst_21 = arith.constant 5.000000e-01 : f32
    %48 = vector.broadcast %cst_21 : f32 to vector<2x128xf32>
    %49 = arith.mulf %48, %47 : vector<2x128xf32>
    %50 = math.tanh %49 : vector<2x128xf32>
    %cst_22 = arith.constant 1.000000e+00 : f32
    %51 = vector.broadcast %cst_22 : f32 to vector<2x128xf32>
    %52 = arith.addf %50, %51 : vector<2x128xf32>
    %cst_23 = arith.constant 5.000000e-01 : f32
    %53 = vector.broadcast %cst_23 : f32 to vector<2x128xf32>
    %54 = arith.mulf %53, %52 : vector<2x128xf32>
    %55 = vector.extract_strided_slice %46 {offsets = [0, 128], sizes = [2, 128], strides = [1, 1]} : vector<2x512xf32> to vector<2x128xf32>
    %cst_24 = arith.constant 5.000000e-01 : f32
    %56 = vector.broadcast %cst_24 : f32 to vector<2x128xf32>
    %57 = arith.mulf %56, %55 : vector<2x128xf32>
    %58 = math.tanh %57 : vector<2x128xf32>
    %cst_25 = arith.constant 1.000000e+00 : f32
    %59 = vector.broadcast %cst_25 : f32 to vector<2x128xf32>
    %60 = arith.addf %58, %59 : vector<2x128xf32>
    %cst_26 = arith.constant 5.000000e-01 : f32
    %61 = vector.broadcast %cst_26 : f32 to vector<2x128xf32>
    %62 = arith.mulf %61, %60 : vector<2x128xf32>
    %63 = vector.extract_strided_slice %46 {offsets = [0, 256], sizes = [2, 128], strides = [1, 1]} : vector<2x512xf32> to vector<2x128xf32>
    %64 = math.tanh %63 : vector<2x128xf32>
    %65 = vector.extract_strided_slice %46 {offsets = [0, 384], sizes = [2, 128], strides = [1, 1]} : vector<2x512xf32> to vector<2x128xf32>
    %cst_27 = arith.constant 5.000000e-01 : f32
    %66 = vector.broadcast %cst_27 : f32 to vector<2x128xf32>
    %67 = arith.mulf %66, %65 : vector<2x128xf32>
    %68 = math.tanh %67 : vector<2x128xf32>
    %cst_28 = arith.constant 1.000000e+00 : f32
    %69 = vector.broadcast %cst_28 : f32 to vector<2x128xf32>
    %70 = arith.addf %68, %69 : vector<2x128xf32>
    %cst_29 = arith.constant 5.000000e-01 : f32
    %71 = vector.broadcast %cst_29 : f32 to vector<2x128xf32>
    %72 = arith.mulf %71, %70 : vector<2x128xf32>
    %73 = arith.mulf %62, %39 : vector<2x128xf32>
    %74 = arith.mulf %54, %64 : vector<2x128xf32>
    %75 = arith.addf %73, %74 : vector<2x128xf32>
    %76 = math.tanh %75 : vector<2x128xf32>
    %77 = arith.mulf %72, %76 : vector<2x128xf32>
    %c2_i32 = arith.constant 2 : i32
    %78 = arith.index_cast %c2_i32 : i32 to index
    %c0_30 = arith.constant 0 : index
    %c0_31 = arith.constant 0 : index
    %79 = vector.load %arg2[%78, %c0_30, %c0_31] : memref<8x2x512xf32, #tpu.memory_space<vmem>>, vector<1x2x512xf32>
    %80 = vector.shape_cast %79 : vector<1x2x512xf32> to vector<2x512xf32>
    %cst_32 = arith.constant dense<0.000000e+00> : vector<2x512xf32>
    %81 = tpu.matmul %77, %3, %cst_32 {dimension_numbers = #tpu.dot_dimension_numbers<[1], [0], [0], [1], [0, 0, 1, 1], [], []>} : vector<2x128xf32>, vector<128x512xf32>, vector<2x512xf32> -> vector<2x512xf32>
    %82 = arith.addf %80, %81 : vector<2x512xf32>
    %83 = vector.extract_strided_slice %82 {offsets = [0, 0], sizes = [2, 128], strides = [1, 1]} : vector<2x512xf32> to vector<2x128xf32>
    %cst_33 = arith.constant 5.000000e-01 : f32
    %84 = vector.broadcast %cst_33 : f32 to vector<2x128xf32>
    %85 = arith.mulf %84, %83 : vector<2x128xf32>
    %86 = math.tanh %85 : vector<2x128xf32>
    %cst_34 = arith.constant 1.000000e+00 : f32
    %87 = vector.broadcast %cst_34 : f32 to vector<2x128xf32>
    %88 = arith.addf %86, %87 : vector<2x128xf32>
    %cst_35 = arith.constant 5.000000e-01 : f32
    %89 = vector.broadcast %cst_35 : f32 to vector<2x128xf32>
    %90 = arith.mulf %89, %88 : vector<2x128xf32>
    %91 = vector.extract_strided_slice %82 {offsets = [0, 128], sizes = [2, 128], strides = [1, 1]} : vector<2x512xf32> to vector<2x128xf32>
    %cst_36 = arith.constant 5.000000e-01 : f32
    %92 = vector.broadcast %cst_36 : f32 to vector<2x128xf32>
    %93 = arith.mulf %92, %91 : vector<2x128xf32>
    %94 = math.tanh %93 : vector<2x128xf32>
    %cst_37 = arith.constant 1.000000e+00 : f32
    %95 = vector.broadcast %cst_37 : f32 to vector<2x128xf32>
    %96 = arith.addf %94, %95 : vector<2x128xf32>
    %cst_38 = arith.constant 5.000000e-01 : f32
    %97 = vector.broadcast %cst_38 : f32 to vector<2x128xf32>
    %98 = arith.mulf %97, %96 : vector<2x128xf32>
    %99 = vector.extract_strided_slice %82 {offsets = [0, 256], sizes = [2, 128], strides = [1, 1]} : vector<2x512xf32> to vector<2x128xf32>
    %100 = math.tanh %99 : vector<2x128xf32>
    %101 = vector.extract_strided_slice %82 {offsets = [0, 384], sizes = [2, 128], strides = [1, 1]} : vector<2x512xf32> to vector<2x128xf32>
    %cst_39 = arith.constant 5.000000e-01 : f32
    %102 = vector.broadcast %cst_39 : f32 to vector<2x128xf32>
    %103 = arith.mulf %102, %101 : vector<2x128xf32>
    %104 = math.tanh %103 : vector<2x128xf32>
    %cst_40 = arith.constant 1.000000e+00 : f32
    %105 = vector.broadcast %cst_40 : f32 to vector<2x128xf32>
    %106 = arith.addf %104, %105 : vector<2x128xf32>
    %cst_41 = arith.constant 5.000000e-01 : f32
    %107 = vector.broadcast %cst_41 : f32 to vector<2x128xf32>
    %108 = arith.mulf %107, %106 : vector<2x128xf32>
    %109 = arith.mulf %98, %75 : vector<2x128xf32>
    %110 = arith.mulf %90, %100 : vector<2x128xf32>
    %111 = arith.addf %109, %110 : vector<2x128xf32>
    %112 = math.tanh %111 : vector<2x128xf32>
    %113 = arith.mulf %108, %112 : vector<2x128xf32>
    %c3_i32 = arith.constant 3 : i32
    %114 = arith.index_cast %c3_i32 : i32 to index
    %c0_42 = arith.constant 0 : index
    %c0_43 = arith.constant 0 : index
    %115 = vector.load %arg2[%114, %c0_42, %c0_43] : memref<8x2x512xf32, #tpu.memory_space<vmem>>, vector<1x2x512xf32>
    %116 = vector.shape_cast %115 : vector<1x2x512xf32> to vector<2x512xf32>
    %cst_44 = arith.constant dense<0.000000e+00> : vector<2x512xf32>
    %117 = tpu.matmul %113, %3, %cst_44 {dimension_numbers = #tpu.dot_dimension_numbers<[1], [0], [0], [1], [0, 0, 1, 1], [], []>} : vector<2x128xf32>, vector<128x512xf32>, vector<2x512xf32> -> vector<2x512xf32>
    %118 = arith.addf %116, %117 : vector<2x512xf32>
    %119 = vector.extract_strided_slice %118 {offsets = [0, 0], sizes = [2, 128], strides = [1, 1]} : vector<2x512xf32> to vector<2x128xf32>
    %cst_45 = arith.constant 5.000000e-01 : f32
    %120 = vector.broadcast %cst_45 : f32 to vector<2x128xf32>
    %121 = arith.mulf %120, %119 : vector<2x128xf32>
    %122 = math.tanh %121 : vector<2x128xf32>
    %cst_46 = arith.constant 1.000000e+00 : f32
    %123 = vector.broadcast %cst_46 : f32 to vector<2x128xf32>
    %124 = arith.addf %122, %123 : vector<2x128xf32>
    %cst_47 = arith.constant 5.000000e-01 : f32
    %125 = vector.broadcast %cst_47 : f32 to vector<2x128xf32>
    %126 = arith.mulf %125, %124 : vector<2x128xf32>
    %127 = vector.extract_strided_slice %118 {offsets = [0, 128], sizes = [2, 128], strides = [1, 1]} : vector<2x512xf32> to vector<2x128xf32>
    %cst_48 = arith.constant 5.000000e-01 : f32
    %128 = vector.broadcast %cst_48 : f32 to vector<2x128xf32>
    %129 = arith.mulf %128, %127 : vector<2x128xf32>
    %130 = math.tanh %129 : vector<2x128xf32>
    %cst_49 = arith.constant 1.000000e+00 : f32
    %131 = vector.broadcast %cst_49 : f32 to vector<2x128xf32>
    %132 = arith.addf %130, %131 : vector<2x128xf32>
    %cst_50 = arith.constant 5.000000e-01 : f32
    %133 = vector.broadcast %cst_50 : f32 to vector<2x128xf32>
    %134 = arith.mulf %133, %132 : vector<2x128xf32>
    %135 = vector.extract_strided_slice %118 {offsets = [0, 256], sizes = [2, 128], strides = [1, 1]} : vector<2x512xf32> to vector<2x128xf32>
    %136 = math.tanh %135 : vector<2x128xf32>
    %137 = vector.extract_strided_slice %118 {offsets = [0, 384], sizes = [2, 128], strides = [1, 1]} : vector<2x512xf32> to vector<2x128xf32>
    %cst_51 = arith.constant 5.000000e-01 : f32
    %138 = vector.broadcast %cst_51 : f32 to vector<2x128xf32>
    %139 = arith.mulf %138, %137 : vector<2x128xf32>
    %140 = math.tanh %139 : vector<2x128xf32>
    %cst_52 = arith.constant 1.000000e+00 : f32
    %141 = vector.broadcast %cst_52 : f32 to vector<2x128xf32>
    %142 = arith.addf %140, %141 : vector<2x128xf32>
    %cst_53 = arith.constant 5.000000e-01 : f32
    %143 = vector.broadcast %cst_53 : f32 to vector<2x128xf32>
    %144 = arith.mulf %143, %142 : vector<2x128xf32>
    %145 = arith.mulf %134, %111 : vector<2x128xf32>
    %146 = arith.mulf %126, %136 : vector<2x128xf32>
    %147 = arith.addf %145, %146 : vector<2x128xf32>
    %148 = math.tanh %147 : vector<2x128xf32>
    %149 = arith.mulf %144, %148 : vector<2x128xf32>
    %c4_i32 = arith.constant 4 : i32
    %150 = arith.index_cast %c4_i32 : i32 to index
    %c0_54 = arith.constant 0 : index
    %c0_55 = arith.constant 0 : index
    %151 = vector.load %arg2[%150, %c0_54, %c0_55] : memref<8x2x512xf32, #tpu.memory_space<vmem>>, vector<1x2x512xf32>
    %152 = vector.shape_cast %151 : vector<1x2x512xf32> to vector<2x512xf32>
    %cst_56 = arith.constant dense<0.000000e+00> : vector<2x512xf32>
    %153 = tpu.matmul %149, %3, %cst_56 {dimension_numbers = #tpu.dot_dimension_numbers<[1], [0], [0], [1], [0, 0, 1, 1], [], []>} : vector<2x128xf32>, vector<128x512xf32>, vector<2x512xf32> -> vector<2x512xf32>
    %154 = arith.addf %152, %153 : vector<2x512xf32>
    %155 = vector.extract_strided_slice %154 {offsets = [0, 0], sizes = [2, 128], strides = [1, 1]} : vector<2x512xf32> to vector<2x128xf32>
    %cst_57 = arith.constant 5.000000e-01 : f32
    %156 = vector.broadcast %cst_57 : f32 to vector<2x128xf32>
    %157 = arith.mulf %156, %155 : vector<2x128xf32>
    %158 = math.tanh %157 : vector<2x128xf32>
    %cst_58 = arith.constant 1.000000e+00 : f32
    %159 = vector.broadcast %cst_58 : f32 to vector<2x128xf32>
    %160 = arith.addf %158, %159 : vector<2x128xf32>
    %cst_59 = arith.constant 5.000000e-01 : f32
    %161 = vector.broadcast %cst_59 : f32 to vector<2x128xf32>
    %162 = arith.mulf %161, %160 : vector<2x128xf32>
    %163 = vector.extract_strided_slice %154 {offsets = [0, 128], sizes = [2, 128], strides = [1, 1]} : vector<2x512xf32> to vector<2x128xf32>
    %cst_60 = arith.constant 5.000000e-01 : f32
    %164 = vector.broadcast %cst_60 : f32 to vector<2x128xf32>
    %165 = arith.mulf %164, %163 : vector<2x128xf32>
    %166 = math.tanh %165 : vector<2x128xf32>
    %cst_61 = arith.constant 1.000000e+00 : f32
    %167 = vector.broadcast %cst_61 : f32 to vector<2x128xf32>
    %168 = arith.addf %166, %167 : vector<2x128xf32>
    %cst_62 = arith.constant 5.000000e-01 : f32
    %169 = vector.broadcast %cst_62 : f32 to vector<2x128xf32>
    %170 = arith.mulf %169, %168 : vector<2x128xf32>
    %171 = vector.extract_strided_slice %154 {offsets = [0, 256], sizes = [2, 128], strides = [1, 1]} : vector<2x512xf32> to vector<2x128xf32>
    %172 = math.tanh %171 : vector<2x128xf32>
    %173 = vector.extract_strided_slice %154 {offsets = [0, 384], sizes = [2, 128], strides = [1, 1]} : vector<2x512xf32> to vector<2x128xf32>
    %cst_63 = arith.constant 5.000000e-01 : f32
    %174 = vector.broadcast %cst_63 : f32 to vector<2x128xf32>
    %175 = arith.mulf %174, %173 : vector<2x128xf32>
    %176 = math.tanh %175 : vector<2x128xf32>
    %cst_64 = arith.constant 1.000000e+00 : f32
    %177 = vector.broadcast %cst_64 : f32 to vector<2x128xf32>
    %178 = arith.addf %176, %177 : vector<2x128xf32>
    %cst_65 = arith.constant 5.000000e-01 : f32
    %179 = vector.broadcast %cst_65 : f32 to vector<2x128xf32>
    %180 = arith.mulf %179, %178 : vector<2x128xf32>
    %181 = arith.mulf %170, %147 : vector<2x128xf32>
    %182 = arith.mulf %162, %172 : vector<2x128xf32>
    %183 = arith.addf %181, %182 : vector<2x128xf32>
    %184 = math.tanh %183 : vector<2x128xf32>
    %185 = arith.mulf %180, %184 : vector<2x128xf32>
    %c5_i32 = arith.constant 5 : i32
    %186 = arith.index_cast %c5_i32 : i32 to index
    %c0_66 = arith.constant 0 : index
    %c0_67 = arith.constant 0 : index
    %187 = vector.load %arg2[%186, %c0_66, %c0_67] : memref<8x2x512xf32, #tpu.memory_space<vmem>>, vector<1x2x512xf32>
    %188 = vector.shape_cast %187 : vector<1x2x512xf32> to vector<2x512xf32>
    %cst_68 = arith.constant dense<0.000000e+00> : vector<2x512xf32>
    %189 = tpu.matmul %185, %3, %cst_68 {dimension_numbers = #tpu.dot_dimension_numbers<[1], [0], [0], [1], [0, 0, 1, 1], [], []>} : vector<2x128xf32>, vector<128x512xf32>, vector<2x512xf32> -> vector<2x512xf32>
    %190 = arith.addf %188, %189 : vector<2x512xf32>
    %191 = vector.extract_strided_slice %190 {offsets = [0, 0], sizes = [2, 128], strides = [1, 1]} : vector<2x512xf32> to vector<2x128xf32>
    %cst_69 = arith.constant 5.000000e-01 : f32
    %192 = vector.broadcast %cst_69 : f32 to vector<2x128xf32>
    %193 = arith.mulf %192, %191 : vector<2x128xf32>
    %194 = math.tanh %193 : vector<2x128xf32>
    %cst_70 = arith.constant 1.000000e+00 : f32
    %195 = vector.broadcast %cst_70 : f32 to vector<2x128xf32>
    %196 = arith.addf %194, %195 : vector<2x128xf32>
    %cst_71 = arith.constant 5.000000e-01 : f32
    %197 = vector.broadcast %cst_71 : f32 to vector<2x128xf32>
    %198 = arith.mulf %197, %196 : vector<2x128xf32>
    %199 = vector.extract_strided_slice %190 {offsets = [0, 128], sizes = [2, 128], strides = [1, 1]} : vector<2x512xf32> to vector<2x128xf32>
    %cst_72 = arith.constant 5.000000e-01 : f32
    %200 = vector.broadcast %cst_72 : f32 to vector<2x128xf32>
    %201 = arith.mulf %200, %199 : vector<2x128xf32>
    %202 = math.tanh %201 : vector<2x128xf32>
    %cst_73 = arith.constant 1.000000e+00 : f32
    %203 = vector.broadcast %cst_73 : f32 to vector<2x128xf32>
    %204 = arith.addf %202, %203 : vector<2x128xf32>
    %cst_74 = arith.constant 5.000000e-01 : f32
    %205 = vector.broadcast %cst_74 : f32 to vector<2x128xf32>
    %206 = arith.mulf %205, %204 : vector<2x128xf32>
    %207 = vector.extract_strided_slice %190 {offsets = [0, 256], sizes = [2, 128], strides = [1, 1]} : vector<2x512xf32> to vector<2x128xf32>
    %208 = math.tanh %207 : vector<2x128xf32>
    %209 = vector.extract_strided_slice %190 {offsets = [0, 384], sizes = [2, 128], strides = [1, 1]} : vector<2x512xf32> to vector<2x128xf32>
    %cst_75 = arith.constant 5.000000e-01 : f32
    %210 = vector.broadcast %cst_75 : f32 to vector<2x128xf32>
    %211 = arith.mulf %210, %209 : vector<2x128xf32>
    %212 = math.tanh %211 : vector<2x128xf32>
    %cst_76 = arith.constant 1.000000e+00 : f32
    %213 = vector.broadcast %cst_76 : f32 to vector<2x128xf32>
    %214 = arith.addf %212, %213 : vector<2x128xf32>
    %cst_77 = arith.constant 5.000000e-01 : f32
    %215 = vector.broadcast %cst_77 : f32 to vector<2x128xf32>
    %216 = arith.mulf %215, %214 : vector<2x128xf32>
    %217 = arith.mulf %206, %183 : vector<2x128xf32>
    %218 = arith.mulf %198, %208 : vector<2x128xf32>
    %219 = arith.addf %217, %218 : vector<2x128xf32>
    %220 = math.tanh %219 : vector<2x128xf32>
    %221 = arith.mulf %216, %220 : vector<2x128xf32>
    %c6_i32 = arith.constant 6 : i32
    %222 = arith.index_cast %c6_i32 : i32 to index
    %c0_78 = arith.constant 0 : index
    %c0_79 = arith.constant 0 : index
    %223 = vector.load %arg2[%222, %c0_78, %c0_79] : memref<8x2x512xf32, #tpu.memory_space<vmem>>, vector<1x2x512xf32>
    %224 = vector.shape_cast %223 : vector<1x2x512xf32> to vector<2x512xf32>
    %cst_80 = arith.constant dense<0.000000e+00> : vector<2x512xf32>
    %225 = tpu.matmul %221, %3, %cst_80 {dimension_numbers = #tpu.dot_dimension_numbers<[1], [0], [0], [1], [0, 0, 1, 1], [], []>} : vector<2x128xf32>, vector<128x512xf32>, vector<2x512xf32> -> vector<2x512xf32>
    %226 = arith.addf %224, %225 : vector<2x512xf32>
    %227 = vector.extract_strided_slice %226 {offsets = [0, 0], sizes = [2, 128], strides = [1, 1]} : vector<2x512xf32> to vector<2x128xf32>
    %cst_81 = arith.constant 5.000000e-01 : f32
    %228 = vector.broadcast %cst_81 : f32 to vector<2x128xf32>
    %229 = arith.mulf %228, %227 : vector<2x128xf32>
    %230 = math.tanh %229 : vector<2x128xf32>
    %cst_82 = arith.constant 1.000000e+00 : f32
    %231 = vector.broadcast %cst_82 : f32 to vector<2x128xf32>
    %232 = arith.addf %230, %231 : vector<2x128xf32>
    %cst_83 = arith.constant 5.000000e-01 : f32
    %233 = vector.broadcast %cst_83 : f32 to vector<2x128xf32>
    %234 = arith.mulf %233, %232 : vector<2x128xf32>
    %235 = vector.extract_strided_slice %226 {offsets = [0, 128], sizes = [2, 128], strides = [1, 1]} : vector<2x512xf32> to vector<2x128xf32>
    %cst_84 = arith.constant 5.000000e-01 : f32
    %236 = vector.broadcast %cst_84 : f32 to vector<2x128xf32>
    %237 = arith.mulf %236, %235 : vector<2x128xf32>
    %238 = math.tanh %237 : vector<2x128xf32>
    %cst_85 = arith.constant 1.000000e+00 : f32
    %239 = vector.broadcast %cst_85 : f32 to vector<2x128xf32>
    %240 = arith.addf %238, %239 : vector<2x128xf32>
    %cst_86 = arith.constant 5.000000e-01 : f32
    %241 = vector.broadcast %cst_86 : f32 to vector<2x128xf32>
    %242 = arith.mulf %241, %240 : vector<2x128xf32>
    %243 = vector.extract_strided_slice %226 {offsets = [0, 256], sizes = [2, 128], strides = [1, 1]} : vector<2x512xf32> to vector<2x128xf32>
    %244 = math.tanh %243 : vector<2x128xf32>
    %245 = vector.extract_strided_slice %226 {offsets = [0, 384], sizes = [2, 128], strides = [1, 1]} : vector<2x512xf32> to vector<2x128xf32>
    %cst_87 = arith.constant 5.000000e-01 : f32
    %246 = vector.broadcast %cst_87 : f32 to vector<2x128xf32>
    %247 = arith.mulf %246, %245 : vector<2x128xf32>
    %248 = math.tanh %247 : vector<2x128xf32>
    %cst_88 = arith.constant 1.000000e+00 : f32
    %249 = vector.broadcast %cst_88 : f32 to vector<2x128xf32>
    %250 = arith.addf %248, %249 : vector<2x128xf32>
    %cst_89 = arith.constant 5.000000e-01 : f32
    %251 = vector.broadcast %cst_89 : f32 to vector<2x128xf32>
    %252 = arith.mulf %251, %250 : vector<2x128xf32>
    %253 = arith.mulf %242, %219 : vector<2x128xf32>
    %254 = arith.mulf %234, %244 : vector<2x128xf32>
    %255 = arith.addf %253, %254 : vector<2x128xf32>
    %256 = math.tanh %255 : vector<2x128xf32>
    %257 = arith.mulf %252, %256 : vector<2x128xf32>
    %c7_i32 = arith.constant 7 : i32
    %258 = arith.index_cast %c7_i32 : i32 to index
    %c0_90 = arith.constant 0 : index
    %c0_91 = arith.constant 0 : index
    %259 = vector.load %arg2[%258, %c0_90, %c0_91] : memref<8x2x512xf32, #tpu.memory_space<vmem>>, vector<1x2x512xf32>
    %260 = vector.shape_cast %259 : vector<1x2x512xf32> to vector<2x512xf32>
    %cst_92 = arith.constant dense<0.000000e+00> : vector<2x512xf32>
    %261 = tpu.matmul %257, %3, %cst_92 {dimension_numbers = #tpu.dot_dimension_numbers<[1], [0], [0], [1], [0, 0, 1, 1], [], []>} : vector<2x128xf32>, vector<128x512xf32>, vector<2x512xf32> -> vector<2x512xf32>
    %262 = arith.addf %260, %261 : vector<2x512xf32>
    %263 = vector.extract_strided_slice %262 {offsets = [0, 0], sizes = [2, 128], strides = [1, 1]} : vector<2x512xf32> to vector<2x128xf32>
    %cst_93 = arith.constant 5.000000e-01 : f32
    %264 = vector.broadcast %cst_93 : f32 to vector<2x128xf32>
    %265 = arith.mulf %264, %263 : vector<2x128xf32>
    %266 = math.tanh %265 : vector<2x128xf32>
    %cst_94 = arith.constant 1.000000e+00 : f32
    %267 = vector.broadcast %cst_94 : f32 to vector<2x128xf32>
    %268 = arith.addf %266, %267 : vector<2x128xf32>
    %cst_95 = arith.constant 5.000000e-01 : f32
    %269 = vector.broadcast %cst_95 : f32 to vector<2x128xf32>
    %270 = arith.mulf %269, %268 : vector<2x128xf32>
    %271 = vector.extract_strided_slice %262 {offsets = [0, 128], sizes = [2, 128], strides = [1, 1]} : vector<2x512xf32> to vector<2x128xf32>
    %cst_96 = arith.constant 5.000000e-01 : f32
    %272 = vector.broadcast %cst_96 : f32 to vector<2x128xf32>
    %273 = arith.mulf %272, %271 : vector<2x128xf32>
    %274 = math.tanh %273 : vector<2x128xf32>
    %cst_97 = arith.constant 1.000000e+00 : f32
    %275 = vector.broadcast %cst_97 : f32 to vector<2x128xf32>
    %276 = arith.addf %274, %275 : vector<2x128xf32>
    %cst_98 = arith.constant 5.000000e-01 : f32
    %277 = vector.broadcast %cst_98 : f32 to vector<2x128xf32>
    %278 = arith.mulf %277, %276 : vector<2x128xf32>
    %279 = vector.extract_strided_slice %262 {offsets = [0, 256], sizes = [2, 128], strides = [1, 1]} : vector<2x512xf32> to vector<2x128xf32>
    %280 = math.tanh %279 : vector<2x128xf32>
    %281 = vector.extract_strided_slice %262 {offsets = [0, 384], sizes = [2, 128], strides = [1, 1]} : vector<2x512xf32> to vector<2x128xf32>
    %cst_99 = arith.constant 5.000000e-01 : f32
    %282 = vector.broadcast %cst_99 : f32 to vector<2x128xf32>
    %283 = arith.mulf %282, %281 : vector<2x128xf32>
    %284 = math.tanh %283 : vector<2x128xf32>
    %cst_100 = arith.constant 1.000000e+00 : f32
    %285 = vector.broadcast %cst_100 : f32 to vector<2x128xf32>
    %286 = arith.addf %284, %285 : vector<2x128xf32>
    %cst_101 = arith.constant 5.000000e-01 : f32
    %287 = vector.broadcast %cst_101 : f32 to vector<2x128xf32>
    %288 = arith.mulf %287, %286 : vector<2x128xf32>
    %289 = arith.mulf %278, %255 : vector<2x128xf32>
    %290 = arith.mulf %270, %280 : vector<2x128xf32>
    %291 = arith.addf %289, %290 : vector<2x128xf32>
    %292 = math.tanh %291 : vector<2x128xf32>
    %293 = arith.mulf %288, %292 : vector<2x128xf32>
    %c8_i32 = arith.constant 8 : i32
    %c0_102 = arith.constant 0 : index
    %c0_103 = arith.constant 0 : index
    %294 = vector.load %arg5[%c0_102, %c0_103] : memref<2x128xf32, #tpu.memory_space<vmem>>, vector<2x128xf32>
    tpu.vector_store %arg5[%c0_102, %c0_103], %293 {strides = array<i32>} : memref<2x128xf32, #tpu.memory_space<vmem>>, vector<2x128xf32>,
    %c0_104 = arith.constant 0 : index
    %c0_105 = arith.constant 0 : index
    %295 = vector.load %arg6[%c0_104, %c0_105] : memref<2x128xf32, #tpu.memory_space<vmem>>, vector<2x128xf32>
    tpu.vector_store %arg6[%c0_104, %c0_105], %291 {strides = array<i32>} : memref<2x128xf32, #tpu.memory_space<vmem>>, vector<2x128xf32>,
    %c0_i32_106 = arith.constant 0 : i32
    %296 = arith.cmpi eq, %arg1, %c0_i32_106 : i32
    %297 = arith.extui %296 : i1 to i32
    %c0_i32_107 = arith.constant 0 : i32
    %298 = arith.cmpi ne, %297, %c0_i32_107 : i32
    scf.if %298 {
      %c0_108 = arith.constant 0 : index
      %c0_109 = arith.constant 0 : index
      %299 = vector.load %arg4[%c0_108, %c0_109] : memref<2x128xf32, #tpu.memory_space<vmem>>, vector<2x128xf32>
      tpu.vector_store %arg4[%c0_108, %c0_109], %293 {strides = array<i32>} : memref<2x128xf32, #tpu.memory_space<vmem>>, vector<2x128xf32>,
    } else {
    }
    return
  }
  func.func @transform_0(%arg0: i32, %arg1: i32) -> (i32, i32, i32) {
    %c0_i32 = arith.constant 0 : i32
    %c0_i32_0 = arith.constant 0 : i32
    return %arg1, %arg0, %c0_i32 : i32, i32, i32
  }
  func.func @transform_1(%arg0: i32, %arg1: i32) -> (i32, i32) {
    %c0_i32 = arith.constant 0 : i32
    %c0_i32_0 = arith.constant 0 : i32
    %c0_i32_1 = arith.constant 0 : i32
    return %c0_i32, %c0_i32_0 : i32, i32
  }
  func.func @transform_2(%arg0: i32, %arg1: i32) -> (i32, i32) {
    %c0_i32 = arith.constant 0 : i32
    %c0_i32_0 = arith.constant 0 : i32
    return %arg0, %c0_i32 : i32, i32
  }
}

module attributes {stable_mosaic.version = 11 : i64} {
  func.func @_head_kernel(%arg0: memref<4x128xf32, #tpu.memory_space<vmem>>, %arg1: memref<128x128xf32, #tpu.memory_space<vmem>>, %arg2: memref<1x128xf32, #tpu.memory_space<vmem>>, %arg3: memref<128x10xf32, #tpu.memory_space<vmem>>, %arg4: memref<1x10xf32, #tpu.memory_space<vmem>>, %arg5: memref<4x10xf32, #tpu.memory_space<vmem>>) attributes {dimension_semantics = [], scalar_prefetch = 0 : i64, scratch_operands = 0 : i64, tpu.core_type = #tpu.core_type<tc>} {
    %c0 = arith.constant 0 : index
    %c0_0 = arith.constant 0 : index
    %0 = vector.load %arg0[%c0, %c0_0] : memref<4x128xf32, #tpu.memory_space<vmem>>, vector<4x128xf32>
    %cst = arith.constant 0.000000e+00 : f32
    %1 = vector.broadcast %cst : f32 to vector<4x128xf32>
    %2 = arith.maximumf %0, %1 : vector<4x128xf32>
    %c0_1 = arith.constant 0 : index
    %c0_2 = arith.constant 0 : index
    %3 = vector.load %arg1[%c0_1, %c0_2] : memref<128x128xf32, #tpu.memory_space<vmem>>, vector<128x128xf32>
    %cst_3 = arith.constant dense<0.000000e+00> : vector<4x128xf32>
    %4 = tpu.matmul %2, %3, %cst_3 {dimension_numbers = #tpu.dot_dimension_numbers<[1], [0], [0], [1], [0, 0, 1, 1], [], []>} : vector<4x128xf32>, vector<128x128xf32>, vector<4x128xf32> -> vector<4x128xf32>
    %c0_4 = arith.constant 0 : index
    %c0_5 = arith.constant 0 : index
    %5 = vector.load %arg2[%c0_4, %c0_5] : memref<1x128xf32, #tpu.memory_space<vmem>>, vector<1x128xf32>
    %6 = vector.broadcast %5 : vector<1x128xf32> to vector<4x128xf32>
    %7 = arith.addf %4, %6 : vector<4x128xf32>
    %cst_6 = arith.constant 0.000000e+00 : f32
    %8 = vector.broadcast %cst_6 : f32 to vector<4x128xf32>
    %9 = arith.maximumf %7, %8 : vector<4x128xf32>
    %c0_7 = arith.constant 0 : index
    %c0_8 = arith.constant 0 : index
    %10 = vector.load %arg3[%c0_7, %c0_8] : memref<128x10xf32, #tpu.memory_space<vmem>>, vector<128x10xf32>
    %cst_9 = arith.constant dense<0.000000e+00> : vector<4x10xf32>
    %11 = tpu.matmul %9, %10, %cst_9 {dimension_numbers = #tpu.dot_dimension_numbers<[1], [0], [0], [1], [0, 0, 1, 1], [], []>} : vector<4x128xf32>, vector<128x10xf32>, vector<4x10xf32> -> vector<4x10xf32>
    %c0_10 = arith.constant 0 : index
    %c0_11 = arith.constant 0 : index
    %12 = vector.load %arg4[%c0_10, %c0_11] : memref<1x10xf32, #tpu.memory_space<vmem>>, vector<1x10xf32>
    %13 = vector.broadcast %12 : vector<1x10xf32> to vector<4x10xf32>
    %14 = arith.addf %11, %13 : vector<4x10xf32>
    %c0_12 = arith.constant 0 : index
    %c0_13 = arith.constant 0 : index
    %15 = vector.load %arg5[%c0_12, %c0_13] : memref<4x10xf32, #tpu.memory_space<vmem>>, vector<4x10xf32>
    tpu.vector_store %arg5[%c0_12, %c0_13], %14 {strides = array<i32>} : memref<4x10xf32, #tpu.memory_space<vmem>>, vector<4x10xf32>,
    return
  }
}

</mosaic_0001>

<bundles_post_ra>
// kernel: lstm_forward.5
= control target key start
LH: loop header
LB: loop body
LE: loop exit
PB: predicated region body
PF: predicated region fallthrough
CT: control target
= control target key end

     0   :  { %8 = vsyncpa [#allocation3], 0  ;;  %s705_s0 = inlined_call_operand.vmem [shape: f32[16,16], index: 0, kind: input, shape index: {}]   ;;  %s706_s1 = inlined_call_operand.hbm [shape: f32[16,512], index: 1, kind: input, shape index: {}]   ;;  %s707_s2 = inlined_call_operand.hbm [shape: f32[1,512], index: 2, kind: input, shape index: {}]   ;;  %s708_s3 = inlined_call_operand.vmem [shape: f32[16,512], index: 3, kind: output, shape index: {}]  }
   0x1   :  { %9 = vsyncpa [#allocation5], 0  ;;  %s608_s12 = smov 0  }
   0x2 LB: > { %s614_s13 = sadd.s32 4294967295, %s581_s12   ;;  %p456_p0 = scmp.ge.s32.totalorder %s581_s12, 1  ;;  %s581_s12 = sphi %s608_s12, %s15_s12  }
   0x3   : > { %p114_p1 = scmp.lt.s32.totalorder %s581_s12, 3  ;;  %s583_s14 = smov [#allocation2]  }
   0x4   : > { %s126_s15 = sshll.u32 %s583_s14, 4  ;;  %p709_p3 = scmp.eq.s32.totalorder %s614_s13, 0  ;;  %s127_s15 = int_to_ptr.vmem [resolvable:$true] %s126_s15 }
   0x5   : > { %p618_p2 = pnand %p456_p0, %p114_p1  ;;  %s584_s17 = smov [#allocation4]  }
   0x6   : > { %s140_s18 = sshll.u32 %s584_s17, 4  ;;  %s511_s22 = scalar_lea.hbm %s706_s1, 1024  ;;  %s631_s18 = int_to_ptr.vmem [resolvable:$true] %s140_s18 }
   0x7   : > { %s711_s16 = scalar_select %p618_p2, 1, 0 }
   0x8   : > { %p487_p4 = pneg %p618_p2  ;;  %p512_p6 = scmp.ne.s32.totalorder %s706_s1, %s511_s22 }
   0x9   : > { %p518_p10 = scmp.lt.u32.totalorder %s511_s22, %s706_s1 }
   0xa   : > { %p627_p5 = pnand %p709_p3, %p487_p4 }
   0xc   : > { %p513_p7 = pneg %p627_p5 }
   0xe   : > { %p514_p8 = pnand %p513_p7, %p512_p6 }
  0x10   : > { %p515_p9 = pneg %p514_p8 }
  0x12   : > { %p520_p11 = pnand %p518_p10, %p515_p9 }
  0x14   : > { %523 = shalt.err (!%p520_p11)
}
  0x15   : > { %s524_s27 = scalar_lea.vmem %s127_s15, 1024  ;;  %p532_p1 = scmp.lt.s32.totalorder %s127_s15, %s127_s15 }
  0x16   : > { %p525_p12 = scmp.ne.s32.totalorder %s127_s15, %s524_s27  ;;  %p533_p4 = scmp.lt.s32.totalorder %s524_s27, %s524_s27 }
  0x18   : > { %p527_p13 = pnand %p525_p12, %p513_p7  ;;  %p534_p3 = por %p533_p4, %p532_p1 }
  0x1a   : > { %p528_p0 = pneg %p527_p13 }
  0x1c   : > { %p535_p2 = pnand %p534_p3, %p528_p0 }
  0x1e   : > { %538 = shalt.err (!%p535_p2)
}
  0x1f   : > { %s585_s28 = smov 512   ;;  %s586_s29 = smov 32  }
  0x20   : > { %490 = dma.hbm_to_vmem [thread:$0]  (!%p627_p5), %s706_s1, 1024, %s127_s15, [#allocation3], %s585_s28, %s585_s28, %s586_s29  }
  0x21   : > { %s539_s7 = scalar_lea.hbm %s707_s2, 64 }
  0x22   : > { %p540_p6 = scmp.ne.s32.totalorder %s707_s2, %s539_s7  ;;  %p546_p8 = scmp.lt.u32.totalorder %s539_s7, %s707_s2 }
  0x24   : > { %p542_p2 = pnand %p540_p6, %p513_p7 }
  0x26   : > { %p543_p3 = pneg %p542_p2 }
  0x28   : > { %p548_p9 = pnand %p546_p8, %p543_p3 }
  0x2a   : > { %551 = shalt.err (!%p548_p9)
}
  0x2b   : > { %s552_s14 = scalar_lea.vmem %s631_s18, 64  ;;  %p560_p13 = scmp.lt.s32.totalorder %s631_s18, %s631_s18 }
  0x2c   : > { %p553_p10 = scmp.ne.s32.totalorder %s631_s18, %s552_s14  ;;  %p561_p0 = scmp.lt.s32.totalorder %s552_s14, %s552_s14 }
  0x2e   : > { %p555_p11 = pnand %p553_p10, %p513_p7  ;;  %p562_p1 = por %p561_p0, %p560_p13 }
  0x30   : > { %p556_p12 = pneg %p555_p11 }
  0x32   : > { %p563_p4 = pnand %p562_p1, %p556_p12 }
  0x34   : > { %566 = shalt.err (!%p563_p4)
}
  0x35   : > { %493 = dma.hbm_to_vmem [thread:$0]  (!%p627_p5), %s707_s2, 64, %s631_s18, [#allocation5]  }
  0x36   : > { %p713_p6 = scmp.ne.s32.totalorder %s711_s16, 0 }
  0x37   : > { %p714_p2 = scmp.eq.s32.totalorder (!%p713_p6), %s614_s13, 0 }
  0x38   : > { %160 = sbr.rel (%p713_p6) target bundleno = 292 (0x124), region = 32 }
  0x3f   : > { %572 = dma.done.wait (%p714_p2), [#allocation3], 1024   ;;  %p715_p7 = pmov %p714_p2 }
  0x40   : > { %p716_p3 = pmov %p714_p2 }
  0x41   : > { %574 = vsyncadd (%p715_p7), [#allocation3], 4294966272 }
  0x42   : > { %576 = dma.done.wait (%p716_p3), [#allocation5], 64   ;;  %p717_p8 = pmov %p714_p2 }
  0x43   : > { %p187_p9 = scmp.lt.s32.totalorder %s614_s13, 1  ;;  %v587_v0 = vmov 0.0   ;;  %v198_v1 = vld [vmem:[#allocation2 + $0x8] sm:$0xff]  ;;  %v200_v3 = vld [vmem:[#allocation2 + $0x18] sm:$0xff]  ;;  %v197_v6 = vld [vmem:[#allocation2] sm:$0xff]  ;;  %vm227_vm0 = vcmask 130048   ;;  %v207_v14 = vlaneseq }
  0x44   : > { %578 = vsyncadd (%p717_p8), [#allocation5], 4294967232  ;;  %295 = vmatprep.mubr.f32.mxu0 %v587_v0  ;;  %366 = vmatprep.mubr.f32.mxu1 %v587_v0  ;;  %v202_v2 = vld [vmem:[#allocation2 + $0x28] sm:$0xff]  ;;  %v204_v5 = vld [vmem:[#allocation2 + $0x38] sm:$0xff] }
  0x45   : > { %s719_s13 = smov (!%p187_p9, %s614_s13), 1  ;;  %v471_v4 = vpack.c.bf16 %v202_v2, %v198_v1  ;;  %v201_v7 = vld [vmem:[#allocation2 + $0x20] sm:$0xff]  ;;  %v475_v8 = vpack.c.bf16 %v204_v5, %v200_v3  ;;  %v199_v10 = vld [vmem:[#allocation2 + $0x10] sm:$0xff]  ;;  %v208_v15 = vshrl.u32 %v207_v14, 7 }
  0x46   : > { %s463_s16 = sshll.u32 %s719_s13, 3  ;;  %v473_v9 = vpack.c.bf16 %v201_v7, %v197_v6  ;;  %v203_v11 = vld [vmem:[#allocation2 + $0x30] sm:$0xff]  ;;  %v205_v17 = vld [vmem:[#allocation4] sm:$0xf]  ;;  %s470_s21 = sshll.u32 %s719_s13, 5 }
  0x47   : > { %s190_s20 = scalar_lea.vmem %s705_s0, %s463_s16  ;;  %472 = vmatprep.subr.bf16.mxu0 %v471_v4  ;;  %v477_v12 = vpack.c.bf16 %v203_v11, %v199_v10  ;;  %476 = vmatprep.subr.bf16.mxu1 %v475_v8  ;;  %v209_v16 = vsub.s32 0, %v208_v15  ;;  %v217_v18 = vsub.s32 2, %v208_v15  ;;  %v213_v19 = vsub.s32 1, %v208_v15  ;;  %s195_s24 = scalar_lea.vmem %s708_s3, %s470_s21 }
  0x48   : > { %474 = vmatpush1.bf16.msra.mxu0 %v473_v9  ;;  %v196_v13 = vld [vmem:[%s190_s20] sm:$0xff]  ;;  %v221_v20 = vsub.s32 3, %v208_v15 }
  0x49   : > { %478 = vmatpush1.bf16.msra.mxu1 %v477_v12  ;;  %v210_v21 = vrot.slane %v205_v17, %v209_v16  ;;  %v218_v22 = vrot.slane %v205_v17, %v217_v18  ;;  %v214_v23 = vrot.slane %v205_v17, %v213_v19 }
  0x4a   : > { %v222_v24 = vrot.slane %v205_v17, %v221_v20 }
  0x4b   : > { %466 = vmatmul.mubr.msk.f32.vlgmr.msra.gmra.mrb[0].mxu0 %vm227_vm0, %v196_v13 }
  0x4c   : > { %467 = vmatmul.mubr.msk.f32.vlgmr.msra.gmra.mrb[0].mxu1 %vm227_vm0, %v196_v13 }
 0x11e   : > { %v297_v25 = vpop.f32.mrb[0].mxu0 }
 0x11f   : > { %v298_v26 = vadd.f32 %v297_v25, %v210_v21  ;;  %v368_v27 = vpop.f32.mrb[0].mxu1  ;;  %v299_v28 = vpop.f32.mrb[1].mxu0 }
 0x120   : > { %v369_v29 = vadd.f32 %v368_v27, %v218_v22  ;;  %v300_v30 = vadd.f32 %v299_v28, %v214_v23  ;;  %v370_v31 = vpop.f32.mrb[1].mxu1 }
 0x121   : > { %373 = vst [vmem:[%s195_s24] sm:$0xff] %v298_v26  ;;  %v371_v32 = vadd.f32 %v370_v31, %v222_v24 }
 0x122   : > { %375 = vst [vmem:[%s195_s24 + $0x10] sm:$0xff] %v369_v29  ;;  %374 = vst [vmem:[%s195_s24 + $0x8] sm:$0xff] %v300_v30 }
 0x123   : > { %376 = vst [vmem:[%s195_s24 + $0x18] sm:$0xff] %v371_v32 }
 0x124 PF: > { %s15_s12 = sadd.s32 1, %s581_s12  }
 0x125   : > { %p12_p5 = scmp.ge.s32.totalorder %s15_s12, 4  }
 0x127   :  { %14 = sbr.rel (!%p12_p5) target bundleno = 2 (0x2), region = 71 }
 0x12e   :  { %398 = vsyncpa [#allocation3], 1 }
 0x12f   :  { %400 = vsyncpa [#allocation3 + $0x1], 1 }
 0x130   :  { %401 = vsyncpa [#allocation5], 1 }

// kernel: lstm_forward.7
= control target key start
LH: loop header
LB: loop body
LE: loop exit
PB: predicated region body
PF: predicated region fallthrough
CT: control target
= control target key end

     0   :  { %s569_s12 = smov 0   ;;  %s795_s0 = inlined_call_operand.vmem [shape: f32[16,128], index: 0, kind: input, shape index: {}]   ;;  %s796_s1 = inlined_call_operand.vmem [shape: f32[128,512], index: 1, kind: input, shape index: {}]   ;;  %s797_s2 = inlined_call_operand.vmem [shape: f32[1,512], index: 2, kind: input, shape index: {}]   ;;  %s798_s3 = inlined_call_operand.vmem [shape: f32[16,512], index: 3, kind: output, shape index: {}]  }
   0x1 LB: > { %s456_s13 = sadd.s32 4294967295, %s546_s12   ;;  %p460_p0 = scmp.ge.s32.totalorder %s546_s12, 1  ;;  %s546_s12 = sphi %s569_s12, %s13_s12  }
   0x2   : > { %p136_p1 = scmp.lt.s32.totalorder %s546_s12, 3 }
   0x4   : > { %p137_p2 = pnand %p460_p0, %p136_p1 }
   0x5   : > { %v170_v0 = vld [vmem:[%s796_s1 + $0x8] sm:$0xff] (!%p137_p2)  ;;  %v172_v2 = vld [vmem:[%s796_s1 + $0x18] sm:$0xff] (!%p137_p2)  ;;  %v169_v5 = vld [vmem:[%s796_s1] sm:$0xff] (!%p137_p2)  ;;  %v548_v7 = vmov (!%p137_p2), 0.0   ;;  %p729_p3 = scmp.lt.s32.totalorder (!%p137_p2), %s456_s13, 1 }
   0x6   : > { %140 = sbr.rel (%p137_p2) target bundleno = 258 (0x102), region = 32  ;;  %v174_v1 = vld [vmem:[%s796_s1 + $0x28] sm:$0xff] (!%p137_p2)  ;;  %v176_v4 = vld [vmem:[%s796_s1 + $0x38] sm:$0xff] (!%p137_p2)  ;;  %v173_v6 = vld [vmem:[%s796_s1 + $0x20] sm:$0xff] (!%p137_p2)  ;;  %319 = vmatprep.mubr.f32.mxu0 (!%p137_p2), %v548_v7  ;;  %390 = vmatprep.mubr.f32.mxu1 (!%p137_p2), %v548_v7 }
   0x7   : > { %v467_v3 = vpack.c.bf16 (!%p137_p2), %v174_v1, %v170_v0  ;;  %v499_v8 = vpack.c.bf16 (!%p137_p2), %v176_v4, %v172_v2  ;;  %v469_v9 = vpack.c.bf16 (!%p137_p2), %v173_v6, %v169_v5  ;;  %v171_v10 = vld [vmem:[%s796_s1 + $0x10] sm:$0xff] (!%p137_p2)  ;;  %v178_v12 = vld [vmem:[%s796_s1 + $0x48] sm:$0xff] (!%p137_p2)  ;;  %v180_v15 = vld [vmem:[%s796_s1 + $0x58] sm:$0xff] (!%p137_p2) }
   0x8   : > { %v175_v11 = vld [vmem:[%s796_s1 + $0x30] sm:$0xff] (!%p137_p2)  ;;  %v182_v14 = vld [vmem:[%s796_s1 + $0x68] sm:$0xff] (!%p137_p2)  ;;  %v184_v16 = vld [vmem:[%s796_s1 + $0x78] sm:$0xff] (!%p137_p2) }
   0x9   : > { %468 = vmatprep.subr.bf16.mxu0 (!%p137_p2), %v467_v3  ;;  %v501_v13 = vpack.c.bf16 (!%p137_p2), %v175_v11, %v171_v10  ;;  %500 = vmatprep.subr.bf16.mxu1 (!%p137_p2), %v499_v8  ;;  %v471_v17 = vpack.c.bf16 (!%p137_p2), %v182_v14, %v178_v12  ;;  %v503_v18 = vpack.c.bf16 (!%p137_p2), %v184_v16, %v180_v15  ;;  %v177_v19 = vld [vmem:[%s796_s1 + $0x40] sm:$0xff] (!%p137_p2)  ;;  %v179_v21 = vld [vmem:[%s796_s1 + $0x50] sm:$0xff] (!%p137_p2)  ;;  %v186_v24 = vld [vmem:[%s796_s1 + $0x88] sm:$0xff] (!%p137_p2) }
   0xa   : > { %470 = vmatpush1.bf16.msra.mxu0 (!%p137_p2), %v469_v9  ;;  %v181_v20 = vld [vmem:[%s796_s1 + $0x60] sm:$0xff] (!%p137_p2)  ;;  %v183_v23 = vld [vmem:[%s796_s1 + $0x70] sm:$0xff] (!%p137_p2)  ;;  %v190_v25 = vld [vmem:[%s796_s1 + $0xa8] sm:$0xff] (!%p137_p2) }
   0xb   : > { %502 = vmatpush1.bf16.msra.mxu1 (!%p137_p2), %v501_v13  ;;  %v473_v22 = vpack.c.bf16 (!%p137_p2), %v181_v20, %v177_v19  ;;  %472 = vmatprep.subr.bf16.mxu0 (!%p137_p2), %v471_v17  ;;  %v505_v26 = vpack.c.bf16 (!%p137_p2), %v183_v23, %v179_v21  ;;  %v475_v27 = vpack.c.bf16 (!%p137_p2), %v190_v25, %v186_v24  ;;  %v188_v28 = vld [vmem:[%s796_s1 + $0x98] sm:$0xff] (!%p137_p2)  ;;  %v185_v30 = vld [vmem:[%s796_s1 + $0x80] sm:$0xff] (!%p137_p2)  ;;  %v187_v33 = vld [vmem:[%s796_s1 + $0x90] sm:$0xff] (!%p137_p2) }
   0xc   : > { %504 = vmatprep.subr.bf16.mxu1 (!%p137_p2), %v503_v18  ;;  %v192_v29 = vld [vmem:[%s796_s1 + $0xb8] sm:$0xff] (!%p137_p2)  ;;  %v189_v32 = vld [vmem:[%s796_s1 + $0xa0] sm:$0xff] (!%p137_p2)  ;;  %v191_v34 = vld [vmem:[%s796_s1 + $0xb0] sm:$0xff] (!%p137_p2) }
   0xd   : > { %v507_v31 = vpack.c.bf16 %v192_v29, %v188_v28  ;;  %v477_v35 = vpack.c.bf16 %v189_v32, %v185_v30  ;;  %v194_v36 = vld [vmem:[%s796_s1 + $0xc8] sm:$0xff]  ;;  %v196_v38 = vld [vmem:[%s796_s1 + $0xd8] sm:$0xff]  ;;  %v509_v39 = vpack.c.bf16 %v191_v34, %v187_v33  ;;  %v193_v42 = vld [vmem:[%s796_s1 + $0xc0] sm:$0xff]  ;;  %s801_s13 = smov (!%p729_p3, %s456_s13), 1  ;;  %v235_v34 = vlaneseq }
   0xe   : > { %474 = vmatpush1.bf16.msra.mxu0 %v473_v22  ;;  %v198_v37 = vld [vmem:[%s796_s1 + $0xe8] sm:$0xff]  ;;  %v200_v41 = vld [vmem:[%s796_s1 + $0xf8] sm:$0xff]  ;;  %v197_v43 = vld [vmem:[%s796_s1 + $0xe0] sm:$0xff]  ;;  %s461_s18 = sshll.u32 %s801_s13, 3  ;;  %s466_s24 = sshll.u32 %s801_s13, 5 }
   0xf   : > { %506 = vmatpush1.bf16.msra.mxu1 %v505_v26  ;;  %476 = vmatprep.subr.bf16.mxu0 %v475_v27  ;;  %v479_v40 = vpack.c.bf16 %v198_v37, %v194_v36  ;;  %v511_v44 = vpack.c.bf16 %v200_v41, %v196_v38  ;;  %v195_v45 = vld [vmem:[%s796_s1 + $0xd0] sm:$0xff]  ;;  %v202_v47 = vld [vmem:[%s796_s1 + $0x108] sm:$0xff]  ;;  %v204_v49 = vld [vmem:[%s796_s1 + $0x118] sm:$0xff]  ;;  %v481_v51 = vpack.c.bf16 %v197_v43, %v193_v42  ;;  %s162_s21 = scalar_lea.vmem %s795_s0, %s461_s18  ;;  %s167_s27 = scalar_lea.vmem %s798_s3, %s466_s24 }
  0x10   : > { %508 = vmatprep.subr.bf16.mxu1 %v507_v31  ;;  %v199_v46 = vld [vmem:[%s796_s1 + $0xf0] sm:$0xff]  ;;  %v206_v48 = vld [vmem:[%s796_s1 + $0x128] sm:$0xff]  ;;  %v208_v50 = vld [vmem:[%s796_s1 + $0x138] sm:$0xff] }
  0x11   : > { %v513_v52 = vpack.c.bf16 %v199_v46, %v195_v45  ;;  %v483_v53 = vpack.c.bf16 %v206_v48, %v202_v47  ;;  %v201_v54 = vld [vmem:[%s796_s1 + $0x100] sm:$0xff]  ;;  %v203_v56 = vld [vmem:[%s796_s1 + $0x110] sm:$0xff]  ;;  %v515_v57 = vpack.c.bf16 %v208_v50, %v204_v49  ;;  %v210_v59 = vld [vmem:[%s796_s1 + $0x148] sm:$0xff] }
  0x12   : > { %478 = vmatpush1.bf16.msra.mxu0 %v477_v35  ;;  %v205_v55 = vld [vmem:[%s796_s1 + $0x120] sm:$0xff]  ;;  %v207_v58 = vld [vmem:[%s796_s1 + $0x130] sm:$0xff]  ;;  %v214_v60 = vld [vmem:[%s796_s1 + $0x168] sm:$0xff]  ;;  %v236_v35 = vshrl.u32 %v235_v34, 7 }
  0x13   : > { %510 = vmatpush1.bf16.msra.mxu1 %v509_v39  ;;  %480 = vmatprep.subr.bf16.mxu0 %v479_v40  ;;  %v212_v61 = vld [vmem:[%s796_s1 + $0x158] sm:$0xff]  ;;  %v485_v63 = vpack.c.bf16 %v205_v55, %v201_v54  ;;  %v517_v0 = vpack.c.bf16 %v207_v58, %v203_v56  ;;  %v487_v1 = vpack.c.bf16 %v214_v60, %v210_v59  ;;  %v209_v2 = vld [vmem:[%s796_s1 + $0x140] sm:$0xff]  ;;  %v211_v4 = vld [vmem:[%s796_s1 + $0x150] sm:$0xff] }
  0x14   : > { %512 = vmatprep.subr.bf16.mxu1 %v511_v44  ;;  %v216_v62 = vld [vmem:[%s796_s1 + $0x178] sm:$0xff]  ;;  %v213_v3 = vld [vmem:[%s796_s1 + $0x160] sm:$0xff]  ;;  %v215_v6 = vld [vmem:[%s796_s1 + $0x170] sm:$0xff]  ;;  %v237_v36 = vsub.s32 0, %v236_v35  ;;  %v245_v38 = vsub.s32 2, %v236_v35  ;;  %v241_v39 = vsub.s32 1, %v236_v35 }
  0x15   : > { %v519_v5 = vpack.c.bf16 %v216_v62, %v212_v61  ;;  %v218_v7 = vld [vmem:[%s796_s1 + $0x188] sm:$0xff]  ;;  %v220_v9 = vld [vmem:[%s796_s1 + $0x198] sm:$0xff]  ;;  %v489_v11 = vpack.c.bf16 %v213_v3, %v209_v2  ;;  %v521_v12 = vpack.c.bf16 %v215_v6, %v211_v4  ;;  %v217_v14 = vld [vmem:[%s796_s1 + $0x180] sm:$0xff]  ;;  %v249_v40 = vsub.s32 3, %v236_v35 }
  0x16   : > { %482 = vmatpush1.bf16.msra.mxu0 %v481_v51  ;;  %v222_v8 = vld [vmem:[%s796_s1 + $0x1a8] sm:$0xff]  ;;  %v224_v10 = vld [vmem:[%s796_s1 + $0x1b8] sm:$0xff]  ;;  %v221_v15 = vld [vmem:[%s796_s1 + $0x1a0] sm:$0xff] }
  0x17   : > { %514 = vmatpush1.bf16.msra.mxu1 %v513_v52  ;;  %484 = vmatprep.subr.bf16.mxu0 %v483_v53  ;;  %v491_v13 = vpack.c.bf16 %v222_v8, %v218_v7  ;;  %v219_v16 = vld [vmem:[%s796_s1 + $0x190] sm:$0xff]  ;;  %v523_v17 = vpack.c.bf16 %v224_v10, %v220_v9  ;;  %v226_v19 = vld [vmem:[%s796_s1 + $0x1c8] sm:$0xff]  ;;  %v228_v21 = vld [vmem:[%s796_s1 + $0x1d8] sm:$0xff]  ;;  %v493_v23 = vpack.c.bf16 %v221_v15, %v217_v14 }
  0x18   : > { %516 = vmatprep.subr.bf16.mxu1 %v515_v57  ;;  %v223_v18 = vld [vmem:[%s796_s1 + $0x1b0] sm:$0xff]  ;;  %v230_v20 = vld [vmem:[%s796_s1 + $0x1e8] sm:$0xff]  ;;  %v232_v22 = vld [vmem:[%s796_s1 + $0x1f8] sm:$0xff] }
  0x19   : > { %v525_v24 = vpack.c.bf16 %v223_v18, %v219_v16  ;;  %v495_v25 = vpack.c.bf16 %v230_v20, %v226_v19  ;;  %v225_v26 = vld [vmem:[%s796_s1 + $0x1c0] sm:$0xff]  ;;  %v527_v28 = vpack.c.bf16 %v232_v22, %v228_v21  ;;  %v227_v29 = vld [vmem:[%s796_s1 + $0x1d0] sm:$0xff] }
  0x1a   : > { %486 = vmatpush1.bf16.msra.mxu0 %v485_v63  ;;  %v229_v27 = vld [vmem:[%s796_s1 + $0x1e0] sm:$0xff]  ;;  %v231_v30 = vld [vmem:[%s796_s1 + $0x1f0] sm:$0xff] }
  0x1b   : > { %518 = vmatpush1.bf16.msra.mxu1 %v517_v0  ;;  %488 = vmatprep.subr.bf16.mxu0 %v487_v1  ;;  %v497_v31 = vpack.c.bf16 %v229_v27, %v225_v26  ;;  %v529_v32 = vpack.c.bf16 %v231_v30, %v227_v29  ;;  %v168_v33 = vld [vmem:[%s162_s21] sm:$0xff] }
  0x1c   : > { %520 = vmatprep.subr.bf16.mxu1 %v519_v5  ;;  %v233_v37 = vld [vmem:[%s797_s2] sm:$0xf] }
  0x1d   : > { %v238_v41 = vrot.slane %v233_v37, %v237_v36  ;;  %v246_v42 = vrot.slane %v233_v37, %v245_v38  ;;  %v242_v43 = vrot.slane %v233_v37, %v241_v39  ;;  %v250_v44 = vrot.slane %v233_v37, %v249_v40 }
  0x1e   : > { %490 = vmatpush1.bf16.msra.mxu0 %v489_v11 }
  0x1f   : > { %522 = vmatpush1.bf16.msra.mxu1 %v521_v12  ;;  %492 = vmatprep.subr.bf16.mxu0 %v491_v13 }
  0x20   : > { %524 = vmatprep.subr.bf16.mxu1 %v523_v17 }
  0x22   : > { %494 = vmatpush1.bf16.msra.mxu0 %v493_v23 }
  0x23   : > { %526 = vmatpush1.bf16.msra.mxu1 %v525_v24  ;;  %496 = vmatprep.subr.bf16.mxu0 %v495_v25 }
  0x24   : > { %528 = vmatprep.subr.bf16.mxu1 %v527_v28 }
  0x26   : > { %498 = vmatpush1.bf16.msra.mxu0 %v497_v31 }
  0x27   : > { %530 = vmatpush1.bf16.msra.mxu1 %v529_v32 }
  0x29   : > { %320 = vmatmul.mubr.f32.vlgmr.msra.gmra.mrb[0].mxu0 %v168_v33 }
  0x2a   : > { %391 = vmatmul.mubr.f32.vlgmr.msra.gmra.mrb[0].mxu1 %v168_v33 }
  0xfc   : > { %v321_v45 = vpop.f32.mrb[0].mxu0 }
  0xfd   : > { %v322_v46 = vadd.f32 %v321_v45, %v238_v41  ;;  %v392_v47 = vpop.f32.mrb[0].mxu1  ;;  %v323_v48 = vpop.f32.mrb[1].mxu0 }
  0xfe   : > { %v393_v49 = vadd.f32 %v392_v47, %v246_v42  ;;  %v324_v50 = vadd.f32 %v323_v48, %v242_v43  ;;  %v394_v51 = vpop.f32.mrb[1].mxu1 }
  0xff   : > { %397 = vst [vmem:[%s167_s27] sm:$0xff] %v322_v46  ;;  %v395_v52 = vadd.f32 %v394_v51, %v250_v44 }
 0x100   : > { %399 = vst [vmem:[%s167_s27 + $0x10] sm:$0xff] %v393_v49  ;;  %398 = vst [vmem:[%s167_s27 + $0x8] sm:$0xff] %v324_v50 }
 0x101   : > { %400 = vst [vmem:[%s167_s27 + $0x18] sm:$0xff] %v395_v52 }
 0x102 PF: > { %s13_s12 = sadd.s32 1, %s546_s12  }
 0x103   : > { %p10_p4 = scmp.ge.s32.totalorder %s13_s12, 4  }
 0x105   :  { %12 = sbr.rel (!%p10_p4) target bundleno = 1 (0x1), region = 62 }

// kernel: lstm_forward.6
= control target key start
LH: loop header
LB: loop body
LE: loop exit
PB: predicated region body
PF: predicated region fallthrough
CT: control target
= control target key end

     0   :  { %9 = vsyncpa [#allocation5], 0  ;;  %s2299_s12 = smov [#allocation4]   ;;  %s2767_s0 = inlined_call_operand.vmem [shape: f32[8,2,512], index: 0, kind: input, shape index: {}]   ;;  %s2768_s1 = inlined_call_operand.hbm [shape: f32[128,512], index: 1, kind: input, shape index: {}]   ;;  %s2769_s2 = inlined_call_operand.vmem [shape: f32[8,2,128], index: 2, kind: output, shape index: {0}]   ;;  %s2770_s3 = inlined_call_operand.vmem [shape: f32[2,128], index: 3, kind: output, shape index: {1}]  }
   0x1   :  { %s17_s13 = sshll.u32 %s2299_s12, 4  ;;  %s2275_s16 = scalar_lea.hbm %s2768_s1, 8192  ;;  %s18_s13 = int_to_ptr.vmem [resolvable:$true] %s17_s13 }
   0x2   :  { %p2276_p0 = scmp.ne.s32.totalorder %s2768_s1, %s2275_s16  ;;  %p2279_p1 = scmp.lt.u32.totalorder %s2275_s16, %s2768_s1 }
   0x4   :  { %p2281_p2 = pnand %p2279_p1, %p2276_p0 }
   0x6   :  { %2284 = shalt.err (!%p2281_p2)
}
   0x7   :  { %s2285_s21 = scalar_lea.vmem %s18_s13, 8192  ;;  %p2290_p4 = scmp.lt.s32.totalorder %s18_s13, %s18_s13 }
   0x8   :  { %p2286_p3 = scmp.ne.s32.totalorder %s18_s13, %s2285_s21  ;;  %p2291_p5 = scmp.lt.s32.totalorder %s2285_s21, %s2285_s21 }
   0xa   :  { %p2292_p6 = por %p2291_p5, %p2290_p4 }
   0xc   :  { %p2293_p7 = pnand %p2292_p6, %p2286_p3 }
   0xe   :  { %2296 = shalt.err (!%p2293_p7)
}
   0xf   :  { %s2300_s22 = smov 512   ;;  %s2301_s23 = smov 32  }
  0x10   :  { %23 = dma.hbm_to_vmem [thread:$0]  %s2768_s1, 8192, %s18_s13, [#allocation5], %s2300_s22, %s2300_s22, %s2301_s23  }
  0x11   :  { %2297 = dma.done.wait [#allocation5], 8192  }
  0x12   :  { %2298 = vsyncadd [#allocation5], 4294959104  ;;  %v2302_v0 = vmov 0.0   ;;  %v34_v1 = vld [vmem:[#allocation4 + $0x8] sm:$0xff]  ;;  %v36_v3 = vld [vmem:[#allocation4 + $0x18] sm:$0xff] }
  0x13   :  { %164 = vmatprep.mubr.f32.mxu0 %v2302_v0  ;;  %31 = vst [vmem:[#allocation2] sm:$0x3] %v2302_v0  ;;  %32 = vst [vmem:[#allocation3] sm:$0x3] %v2302_v0  ;;  %235 = vmatprep.mubr.f32.mxu1 %v2302_v0  ;;  %v38_v2 = vld [vmem:[#allocation4 + $0x28] sm:$0xff]  ;;  %v40_v5 = vld [vmem:[#allocation4 + $0x38] sm:$0xff] }
  0x14   :  { %v2340_v4 = vpack.c.bf16 %v38_v2, %v34_v1  ;;  %v33_v6 = vld [vmem:[#allocation4] sm:$0xff]  ;;  %v2342_v8 = vpack.c.bf16 %v40_v5, %v36_v3  ;;  %v35_v10 = vld [vmem:[#allocation4 + $0x10] sm:$0xff]  ;;  %v42_v12 = vld [vmem:[#allocation4 + $0x48] sm:$0xff] }
  0x15   :  { %v37_v7 = vld [vmem:[#allocation4 + $0x20] sm:$0xff]  ;;  %v39_v11 = vld [vmem:[#allocation4 + $0x30] sm:$0xff]  ;;  %v46_v14 = vld [vmem:[#allocation4 + $0x68] sm:$0xff] }
  0x16   :  { %v2344_v9 = vpack.c.bf16 %v37_v7, %v33_v6  ;;  %1679 = vmatprep.subr.bf16.mxu0 %v2340_v4  ;;  %v2347_v13 = vpack.c.bf16 %v39_v11, %v35_v10  ;;  %v44_v15 = vld [vmem:[#allocation4 + $0x58] sm:$0xff]  ;;  %1711 = vmatprep.subr.bf16.mxu1 %v2342_v8  ;;  %v2351_v17 = vpack.c.bf16 %v46_v14, %v42_v12  ;;  %v41_v19 = vld [vmem:[#allocation4 + $0x40] sm:$0xff]  ;;  %v43_v21 = vld [vmem:[#allocation4 + $0x50] sm:$0xff] }
  0x17   :  { %v48_v16 = vld [vmem:[#allocation4 + $0x78] sm:$0xff]  ;;  %v45_v20 = vld [vmem:[#allocation4 + $0x60] sm:$0xff]  ;;  %v47_v23 = vld [vmem:[#allocation4 + $0x70] sm:$0xff] }
  0x18   :  { %1681 = vmatpush1.bf16.msra.mxu0 %v2344_v9  ;;  %v2353_v18 = vpack.c.bf16 %v48_v16, %v44_v15  ;;  %1713 = vmatpush1.bf16.msra.mxu1 %v2347_v13  ;;  %v2356_v22 = vpack.c.bf16 %v45_v20, %v41_v19  ;;  %v50_v24 = vld [vmem:[#allocation4 + $0x88] sm:$0xff]  ;;  %v2360_v26 = vpack.c.bf16 %v47_v23, %v43_v21  ;;  %v52_v28 = vld [vmem:[#allocation4 + $0x98] sm:$0xff]  ;;  %v49_v30 = vld [vmem:[#allocation4 + $0x80] sm:$0xff] }
  0x19   :  { %v54_v25 = vld [vmem:[#allocation4 + $0xa8] sm:$0xff]  ;;  %1683 = vmatprep.subr.bf16.mxu0 %v2351_v17  ;;  %v56_v29 = vld [vmem:[#allocation4 + $0xb8] sm:$0xff]  ;;  %v53_v32 = vld [vmem:[#allocation4 + $0xa0] sm:$0xff] }
  0x1a   :  { %1715 = vmatprep.subr.bf16.mxu1 %v2353_v18  ;;  %v2362_v27 = vpack.c.bf16 %v54_v25, %v50_v24  ;;  %v2364_v31 = vpack.c.bf16 %v56_v29, %v52_v28  ;;  %v51_v33 = vld [vmem:[#allocation4 + $0x90] sm:$0xff]  ;;  %v2367_v35 = vpack.c.bf16 %v53_v32, %v49_v30  ;;  %v58_v36 = vld [vmem:[#allocation4 + $0xc8] sm:$0xff]  ;;  %v60_v38 = vld [vmem:[#allocation4 + $0xd8] sm:$0xff] }
  0x1b   :  { %v55_v34 = vld [vmem:[#allocation4 + $0xb0] sm:$0xff]  ;;  %v62_v37 = vld [vmem:[#allocation4 + $0xe8] sm:$0xff]  ;;  %v64_v41 = vld [vmem:[#allocation4 + $0xf8] sm:$0xff] }
  0x1c   :  { %1685 = vmatpush1.bf16.msra.mxu0 %v2356_v22  ;;  %1717 = vmatpush1.bf16.msra.mxu1 %v2360_v26  ;;  %v2371_v39 = vpack.c.bf16 %v55_v34, %v51_v33  ;;  %v2373_v40 = vpack.c.bf16 %v62_v37, %v58_v36  ;;  %v57_v42 = vld [vmem:[#allocation4 + $0xc0] sm:$0xff]  ;;  %v2376_v44 = vpack.c.bf16 %v64_v41, %v60_v38  ;;  %v59_v45 = vld [vmem:[#allocation4 + $0xd0] sm:$0xff]  ;;  %v66_v47 = vld [vmem:[#allocation4 + $0x108] sm:$0xff] }
  0x1d   :  { %1687 = vmatprep.subr.bf16.mxu0 %v2362_v27  ;;  %v61_v43 = vld [vmem:[#allocation4 + $0xe0] sm:$0xff]  ;;  %1719 = vmatprep.subr.bf16.mxu1 %v2364_v31  ;;  %v63_v46 = vld [vmem:[#allocation4 + $0xf0] sm:$0xff]  ;;  %v70_v48 = vld [vmem:[#allocation4 + $0x128] sm:$0xff] }
  0x1e   :  { %v68_v49 = vld [vmem:[#allocation4 + $0x118] sm:$0xff]  ;;  %v2379_v51 = vpack.c.bf16 %v61_v43, %v57_v42  ;;  %v2383_v52 = vpack.c.bf16 %v63_v46, %v59_v45  ;;  %v2385_v53 = vpack.c.bf16 %v70_v48, %v66_v47  ;;  %v65_v54 = vld [vmem:[#allocation4 + $0x100] sm:$0xff]  ;;  %v67_v56 = vld [vmem:[#allocation4 + $0x110] sm:$0xff] }
  0x1f   :  { %v72_v50 = vld [vmem:[#allocation4 + $0x138] sm:$0xff]  ;;  %v69_v55 = vld [vmem:[#allocation4 + $0x120] sm:$0xff]  ;;  %v71_v58 = vld [vmem:[#allocation4 + $0x130] sm:$0xff] }
  0x20   :  { %1689 = vmatpush1.bf16.msra.mxu0 %v2367_v35  ;;  %1721 = vmatpush1.bf16.msra.mxu1 %v2371_v39  ;;  %v2388_v57 = vpack.c.bf16 %v72_v50, %v68_v49  ;;  %v74_v59 = vld [vmem:[#allocation4 + $0x148] sm:$0xff]  ;;  %v76_v61 = vld [vmem:[#allocation4 + $0x158] sm:$0xff]  ;;  %v2391_v63 = vpack.c.bf16 %v69_v55, %v65_v54  ;;  %v2395_v1 = vpack.c.bf16 %v71_v58, %v67_v56  ;;  %v73_v3 = vld [vmem:[#allocation4 + $0x140] sm:$0xff]  ;;  %v2303_v49 = vmov 1983009808  }
  0x21   :  { %1691 = vmatprep.subr.bf16.mxu0 %v2373_v40  ;;  %1723 = vmatprep.subr.bf16.mxu1 %v2376_v44  ;;  %v78_v60 = vld [vmem:[#allocation4 + $0x168] sm:$0xff]  ;;  %v80_v62 = vld [vmem:[#allocation4 + $0x178] sm:$0xff]  ;;  %v77_v5 = vld [vmem:[#allocation4 + $0x160] sm:$0xff]  ;;  %v249_v50 = vunpack.c.l.s4 %v2303_v49  ;;  %v251_v54 = vlaneseq }
  0x22   :  { %v2397_v2 = vpack.c.bf16 %v78_v60, %v74_v59  ;;  %v75_v6 = vld [vmem:[#allocation4 + $0x150] sm:$0xff]  ;;  %v2400_v7 = vpack.c.bf16 %v80_v62, %v76_v61  ;;  %v82_v11 = vld [vmem:[#allocation4 + $0x188] sm:$0xff]  ;;  %v84_v14 = vld [vmem:[#allocation4 + $0x198] sm:$0xff]  ;;  %v2403_v16 = vpack.c.bf16 %v77_v5, %v73_v3 }
  0x23   :  { %v79_v10 = vld [vmem:[#allocation4 + $0x170] sm:$0xff]  ;;  %v86_v12 = vld [vmem:[#allocation4 + $0x1a8] sm:$0xff]  ;;  %v88_v15 = vld [vmem:[#allocation4 + $0x1b8] sm:$0xff]  ;;  %v250_v55 = vunpack.c.0.s8 %v249_v50  ;;  %v252_v56 = vshrl.u32 %v251_v54, 7 }
  0x24   :  { %1693 = vmatpush1.bf16.msra.mxu0 %v2379_v51  ;;  %1725 = vmatpush1.bf16.msra.mxu1 %v2383_v52  ;;  %v2407_v19 = vpack.c.bf16 %v79_v10, %v75_v6  ;;  %v2409_v20 = vpack.c.bf16 %v86_v12, %v82_v11  ;;  %v81_v21 = vld [vmem:[#allocation4 + $0x180] sm:$0xff]  ;;  %v83_v24 = vld [vmem:[#allocation4 + $0x190] sm:$0xff]  ;;  %v2412_v25 = vpack.c.bf16 %v88_v15, %v84_v14  ;;  %v90_v29 = vld [vmem:[#allocation4 + $0x1c8] sm:$0xff] }
  0x25   :  { %1695 = vmatprep.subr.bf16.mxu0 %v2385_v53  ;;  %1727 = vmatprep.subr.bf16.mxu1 %v2388_v57  ;;  %v85_v23 = vld [vmem:[#allocation4 + $0x1a0] sm:$0xff]  ;;  %v87_v28 = vld [vmem:[#allocation4 + $0x1b0] sm:$0xff]  ;;  %v94_v30 = vld [vmem:[#allocation4 + $0x1e8] sm:$0xff]  ;;  %v2472_v59 = vsub.s32 %v250_v55, %v252_v56 }
  0x26   :  { %v92_v32 = vld [vmem:[#allocation4 + $0x1d8] sm:$0xff]  ;;  %v2415_v34 = vpack.c.bf16 %v85_v23, %v81_v21  ;;  %v2419_v36 = vpack.c.bf16 %v87_v28, %v83_v24  ;;  %v2421_v37 = vpack.c.bf16 %v94_v30, %v90_v29  ;;  %v89_v38 = vld [vmem:[#allocation4 + $0x1c0] sm:$0xff]  ;;  %v91_v43 = vld [vmem:[#allocation4 + $0x1d0] sm:$0xff] }
  0x27   :  { %v96_v33 = vld [vmem:[#allocation4 + $0x1f8] sm:$0xff]  ;;  %v93_v41 = vld [vmem:[#allocation4 + $0x1e0] sm:$0xff]  ;;  %v95_v45 = vld [vmem:[#allocation4 + $0x1f0] sm:$0xff] }
  0x28   :  { %1697 = vmatpush1.bf16.msra.mxu0 %v2391_v63  ;;  %1729 = vmatpush1.bf16.msra.mxu1 %v2395_v1  ;;  %v2424_v42 = vpack.c.bf16 %v96_v33, %v92_v32  ;;  %v2427_v46 = vpack.c.bf16 %v93_v41, %v89_v38  ;;  %v2431_v47 = vpack.c.bf16 %v95_v45, %v91_v43  ;;  %v97_v48 = vld [vmem:[#allocation2] sm:$0x3]  ;;  %v98_v43 = vld [vmem:[#allocation3] sm:$0x3] }
  0x29   :  { %1699 = vmatprep.subr.bf16.mxu0 %v2397_v2  ;;  %1731 = vmatprep.subr.bf16.mxu1 %v2400_v7  ;;  %v99_v11 = vld [vmem:[%s2767_s0] sm:$0xff] }
  0x2c   :  { %1701 = vmatpush1.bf16.msra.mxu0 %v2403_v16  ;;  %1733 = vmatpush1.bf16.msra.mxu1 %v2407_v19 }
  0x2d   :  { %1703 = vmatprep.subr.bf16.mxu0 %v2409_v20  ;;  %1735 = vmatprep.subr.bf16.mxu1 %v2412_v25 }
  0x30   :  { %1705 = vmatpush1.bf16.msra.mxu0 %v2415_v34  ;;  %1737 = vmatpush1.bf16.msra.mxu1 %v2419_v36 }
  0x31   :  { %1707 = vmatprep.subr.bf16.mxu0 %v2421_v37  ;;  %1739 = vmatprep.subr.bf16.mxu1 %v2424_v42 }
  0x34   :  { %1709 = vmatpush1.bf16.msra.mxu0 %v2427_v46  ;;  %1741 = vmatpush1.bf16.msra.mxu1 %v2431_v47 }
  0x35   :  { %1743 = vmatprep.subr.bf16.mxu0 %v2340_v4  ;;  %1775 = vmatprep.subr.bf16.mxu1 %v2342_v8 }
  0x37   :  { %165 = vmatmul.mubr.f32.vlgmr.msra.gmra.mrb[0].mxu0 %v97_v48  ;;  %236 = vmatmul.mubr.f32.vlgmr.msra.gmra.mrb[0].mxu1 %v97_v48 }
  0x38   :  { %1745 = vmatpush1.bf16.msra.mxu0 %v2344_v9  ;;  %1777 = vmatpush1.bf16.msra.mxu1 %v2347_v13 }
  0x39   :  { %1747 = vmatprep.subr.bf16.mxu0 %v2351_v17  ;;  %1779 = vmatprep.subr.bf16.mxu1 %v2353_v18 }
  0x3a   :  { %357 = vmatprep.mubr.f32.mxu0 %v2302_v0  ;;  %428 = vmatprep.mubr.f32.mxu1 %v2302_v0 }
  0x3c   :  { %1749 = vmatpush1.bf16.msra.mxu0 %v2356_v22  ;;  %1781 = vmatpush1.bf16.msra.mxu1 %v2360_v26 }
  0x3d   :  { %1751 = vmatprep.subr.bf16.mxu0 %v2362_v27  ;;  %1783 = vmatprep.subr.bf16.mxu1 %v2364_v31 }
  0x40   :  { %1753 = vmatpush1.bf16.msra.mxu0 %v2367_v35  ;;  %1785 = vmatpush1.bf16.msra.mxu1 %v2371_v39 }
  0x41   :  { %1755 = vmatprep.subr.bf16.mxu0 %v2373_v40  ;;  %1787 = vmatprep.subr.bf16.mxu1 %v2376_v44 }
  0x44   :  { %1757 = vmatpush1.bf16.msra.mxu0 %v2379_v51  ;;  %1789 = vmatpush1.bf16.msra.mxu1 %v2383_v52 }
  0x45   :  { %1759 = vmatprep.subr.bf16.mxu0 %v2385_v53  ;;  %1791 = vmatprep.subr.bf16.mxu1 %v2388_v57 }
  0x48   :  { %1761 = vmatpush1.bf16.msra.mxu0 %v2391_v63  ;;  %1793 = vmatpush1.bf16.msra.mxu1 %v2395_v1 }
  0x49   :  { %1763 = vmatprep.subr.bf16.mxu0 %v2397_v2  ;;  %1795 = vmatprep.subr.bf16.mxu1 %v2400_v7 }
  0x4c   :  { %1765 = vmatpush1.bf16.msra.mxu0 %v2403_v16  ;;  %1797 = vmatpush1.bf16.msra.mxu1 %v2407_v19 }
  0x4d   :  { %1767 = vmatprep.subr.bf16.mxu0 %v2409_v20  ;;  %1799 = vmatprep.subr.bf16.mxu1 %v2412_v25 }
  0x50   :  { %1769 = vmatpush1.bf16.msra.mxu0 %v2415_v34  ;;  %1801 = vmatpush1.bf16.msra.mxu1 %v2419_v36 }
  0x51   :  { %1771 = vmatprep.subr.bf16.mxu0 %v2421_v37  ;;  %1803 = vmatprep.subr.bf16.mxu1 %v2424_v42 }
  0x54   :  { %1773 = vmatpush1.bf16.msra.mxu0 %v2427_v46  ;;  %1805 = vmatpush1.bf16.msra.mxu1 %v2431_v47 }
  0x55   :  { %1807 = vmatprep.subr.bf16.mxu0 %v2340_v4  ;;  %1839 = vmatprep.subr.bf16.mxu1 %v2342_v8 }
 0x10a   :  { %v166_v58 = vpop.f32.mrb[0].mxu0  ;;  %v237_v60 = vpop.f32.mrb[0].mxu1 }
 0x10b   :  { %v168_v61 = vpop.f32.mrb[1].mxu0  ;;  %v239_v3 = vpop.f32.mrb[1].mxu1 }
 0x10c   :  { %v246_v62 = vcombine.low %v166_v58, %v168_v61  ;;  %v247_v5 = vcombine.low %v237_v60, %v239_v3 }
 0x10e   :  { %v254_v6 = vrot.slane %v246_v62, %v2472_v59  ;;  %v261_v10 = vrot.slane %v247_v5, %v2472_v59 }
 0x110   :  { %v262_v12 = vcombine.low %v254_v6, %v261_v10 }
 0x112   :  { %v264_v14 = vadd.f32 %v262_v12, %v99_v11 }
 0x114   :  { %v265_v15 = vmul.f32 0.5, %v264_v14  ;;  %v270_v21 = vrot.slane %v264_v14, 2  ;;  %v276_v24 = vrot.slane %v264_v14, 4  ;;  %v279_v28 = vrot.slane %v264_v14, 6 }
 0x116   :  { %2195 = vtanh.f32 %v265_v15  ;;  %v272_v23 = vmul.f32 0.5, %v270_v21  ;;  %v281_v29 = vmul.f32 0.5, %v279_v28  ;;  %v1664_v15 = vld [vmem:[%s2767_s0 + $0x8] sm:$0xff] }
 0x118   :  { %2197 = vtanh.f32 %v272_v23 }
 0x119   :  { %2199 = vtanh.f32 %v276_v24 }
 0x11a   :  { %2201 = vtanh.f32 %v281_v29 }
 0x120   :  { %v2196_v30 = vpop.eup %2195 }
 0x121   :  { %v267_v32 = vadd.f32 1.0, %v2196_v30 }
 0x122   :  { %v2198_v33 = vpop.eup %2197 }
 0x123   :  { %v268_v38 = vmul.f32 0.5, %v267_v32  ;;  %v274_v41 = vadd.f32 1.0, %v2198_v33  ;;  %v2200_v48 = vpop.eup %2199 }
 0x124   :  { %v2202_v55 = vpop.eup %2201 }
 0x125   :  { %v275_v45 = vmul.f32 0.5, %v274_v41  ;;  %v286_v50 = vmul.f32 %v2200_v48, %v268_v38  ;;  %v283_v56 = vadd.f32 1.0, %v2202_v55 }
 0x127   :  { %v285_v49 = vmul.f32 %v275_v45, %v98_v43  ;;  %v284_v58 = vmul.f32 0.5, %v283_v56 }
 0x129   :  { %v2479_v54 = vadd.f32 %v286_v50, %v285_v49 }
 0x12b   :  { %2203 = vtanh.f32 %v2479_v54 }
 0x135   :  { %v2204_v60 = vpop.eup %2203 }
 0x136   :  { %v289_v61 = vmul.f32 %v2204_v60, %v284_v58 }
 0x138   :  { %290 = vst [vmem:[%s2769_s2] sm:$0x3] %v289_v61  ;;  %358 = vmatmul.mubr.f32.vlgmr.msra.gmra.mrb[2].mxu0 %v289_v61  ;;  %429 = vmatmul.mubr.f32.vlgmr.msra.gmra.mrb[2].mxu1 %v289_v61 }
 0x139   :  { %1809 = vmatpush1.bf16.msra.mxu0 %v2344_v9  ;;  %1841 = vmatpush1.bf16.msra.mxu1 %v2347_v13 }
 0x13a   :  { %1811 = vmatprep.subr.bf16.mxu0 %v2351_v17  ;;  %1843 = vmatprep.subr.bf16.mxu1 %v2353_v18 }
 0x13b   :  { %551 = vmatprep.mubr.f32.mxu0 %v2302_v0  ;;  %622 = vmatprep.mubr.f32.mxu1 %v2302_v0 }
 0x13d   :  { %1813 = vmatpush1.bf16.msra.mxu0 %v2356_v22  ;;  %1845 = vmatpush1.bf16.msra.mxu1 %v2360_v26 }
 0x13e   :  { %1815 = vmatprep.subr.bf16.mxu0 %v2362_v27  ;;  %1847 = vmatprep.subr.bf16.mxu1 %v2364_v31 }
 0x141   :  { %1817 = vmatpush1.bf16.msra.mxu0 %v2367_v35  ;;  %1849 = vmatpush1.bf16.msra.mxu1 %v2371_v39 }
 0x142   :  { %1819 = vmatprep.subr.bf16.mxu0 %v2373_v40  ;;  %1851 = vmatprep.subr.bf16.mxu1 %v2376_v44 }
 0x145   :  { %1821 = vmatpush1.bf16.msra.mxu0 %v2379_v51  ;;  %1853 = vmatpush1.bf16.msra.mxu1 %v2383_v52 }
 0x146   :  { %1823 = vmatprep.subr.bf16.mxu0 %v2385_v53  ;;  %1855 = vmatprep.subr.bf16.mxu1 %v2388_v57 }
 0x149   :  { %1825 = vmatpush1.bf16.msra.mxu0 %v2391_v63  ;;  %1857 = vmatpush1.bf16.msra.mxu1 %v2395_v1 }
 0x14a   :  { %1827 = vmatprep.subr.bf16.mxu0 %v2397_v2  ;;  %1859 = vmatprep.subr.bf16.mxu1 %v2400_v7 }
 0x14d   :  { %1829 = vmatpush1.bf16.msra.mxu0 %v2403_v16  ;;  %1861 = vmatpush1.bf16.msra.mxu1 %v2407_v19 }
 0x14e   :  { %1831 = vmatprep.subr.bf16.mxu0 %v2409_v20  ;;  %1863 = vmatprep.subr.bf16.mxu1 %v2412_v25 }
 0x151   :  { %1833 = vmatpush1.bf16.msra.mxu0 %v2415_v34  ;;  %1865 = vmatpush1.bf16.msra.mxu1 %v2419_v36 }
 0x152   :  { %1835 = vmatprep.subr.bf16.mxu0 %v2421_v37  ;;  %1867 = vmatprep.subr.bf16.mxu1 %v2424_v42 }
 0x155   :  { %1837 = vmatpush1.bf16.msra.mxu0 %v2427_v46  ;;  %1869 = vmatpush1.bf16.msra.mxu1 %v2431_v47 }
 0x156   :  { %1871 = vmatprep.subr.bf16.mxu0 %v2340_v4  ;;  %1903 = vmatprep.subr.bf16.mxu1 %v2342_v8 }
 0x20b   :  { %v359_v62 = vpop.f32.mrb[2].mxu0  ;;  %v430_v3 = vpop.f32.mrb[2].mxu1 }
 0x20c   :  { %v361_v5 = vpop.f32.mrb[3].mxu0  ;;  %v432_v6 = vpop.f32.mrb[3].mxu1 }
 0x20d   :  { %v439_v10 = vcombine.low %v359_v62, %v361_v5  ;;  %v440_v11 = vcombine.low %v430_v3, %v432_v6 }
 0x20f   :  { %v447_v12 = vrot.slane %v439_v10, %v2472_v59  ;;  %v454_v14 = vrot.slane %v440_v11, %v2472_v59 }
 0x211   :  { %v455_v21 = vcombine.low %v447_v12, %v454_v14 }
 0x213   :  { %v457_v23 = vadd.f32 %v1664_v15, %v455_v21 }
 0x215   :  { %v458_v24 = vmul.f32 0.5, %v457_v23  ;;  %v463_v28 = vrot.slane %v457_v23, 2  ;;  %v469_v30 = vrot.slane %v457_v23, 4  ;;  %v472_v32 = vrot.slane %v457_v23, 6  ;;  %v1666_v23 = vld [vmem:[%s2767_s0 + $0x10] sm:$0xff] }
 0x217   :  { %2205 = vtanh.f32 %v458_v24  ;;  %v465_v29 = vmul.f32 0.5, %v463_v28  ;;  %v474_v33 = vmul.f32 0.5, %v472_v32 }
 0x219   :  { %2207 = vtanh.f32 %v465_v29 }
 0x21a   :  { %2209 = vtanh.f32 %v469_v30 }
 0x21b   :  { %2211 = vtanh.f32 %v474_v33 }
 0x221   :  { %v2206_v38 = vpop.eup %2205 }
 0x222   :  { %v460_v41 = vadd.f32 1.0, %v2206_v38 }
 0x223   :  { %v2208_v43 = vpop.eup %2207 }
 0x224   :  { %v461_v45 = vmul.f32 0.5, %v460_v41  ;;  %v467_v48 = vadd.f32 1.0, %v2208_v43  ;;  %v2210_v50 = vpop.eup %2209 }
 0x225   :  { %v2212_v60 = vpop.eup %2211 }
 0x226   :  { %v468_v49 = vmul.f32 0.5, %v467_v48  ;;  %v479_v56 = vmul.f32 %v2210_v50, %v461_v45  ;;  %v476_v61 = vadd.f32 1.0, %v2212_v60 }
 0x228   :  { %v478_v55 = vmul.f32 %v468_v49, %v2479_v54  ;;  %v477_v62 = vmul.f32 0.5, %v476_v61 }
 0x22a   :  { %v2525_v58 = vadd.f32 %v479_v56, %v478_v55 }
 0x22c   :  { %2213 = vtanh.f32 %v2525_v58 }
 0x236   :  { %v2214_v3 = vpop.eup %2213 }
 0x237   :  { %v482_v5 = vmul.f32 %v2214_v3, %v477_v62 }
 0x239   :  { %1665 = vst [vmem:[%s2769_s2 + $0x2] sm:$0x3] %v482_v5  ;;  %552 = vmatmul.mubr.f32.vlgmr.msra.gmra.mrb[4].mxu0 %v482_v5  ;;  %623 = vmatmul.mubr.f32.vlgmr.msra.gmra.mrb[4].mxu1 %v482_v5 }
 0x23a   :  { %1873 = vmatpush1.bf16.msra.mxu0 %v2344_v9  ;;  %1905 = vmatpush1.bf16.msra.mxu1 %v2347_v13 }
 0x23b   :  { %1875 = vmatprep.subr.bf16.mxu0 %v2351_v17  ;;  %1907 = vmatprep.subr.bf16.mxu1 %v2353_v18 }
 0x23c   :  { %745 = vmatprep.mubr.f32.mxu0 %v2302_v0  ;;  %816 = vmatprep.mubr.f32.mxu1 %v2302_v0 }
 0x23e   :  { %1877 = vmatpush1.bf16.msra.mxu0 %v2356_v22  ;;  %1909 = vmatpush1.bf16.msra.mxu1 %v2360_v26 }
 0x23f   :  { %1879 = vmatprep.subr.bf16.mxu0 %v2362_v27  ;;  %1911 = vmatprep.subr.bf16.mxu1 %v2364_v31 }
 0x242   :  { %1881 = vmatpush1.bf16.msra.mxu0 %v2367_v35  ;;  %1913 = vmatpush1.bf16.msra.mxu1 %v2371_v39 }
 0x243   :  { %1883 = vmatprep.subr.bf16.mxu0 %v2373_v40  ;;  %1915 = vmatprep.subr.bf16.mxu1 %v2376_v44 }
 0x246   :  { %1885 = vmatpush1.bf16.msra.mxu0 %v2379_v51  ;;  %1917 = vmatpush1.bf16.msra.mxu1 %v2383_v52 }
 0x247   :  { %1887 = vmatprep.subr.bf16.mxu0 %v2385_v53  ;;  %1919 = vmatprep.subr.bf16.mxu1 %v2388_v57 }
 0x24a   :  { %1889 = vmatpush1.bf16.msra.mxu0 %v2391_v63  ;;  %1921 = vmatpush1.bf16.msra.mxu1 %v2395_v1 }
 0x24b   :  { %1891 = vmatprep.subr.bf16.mxu0 %v2397_v2  ;;  %1923 = vmatprep.subr.bf16.mxu1 %v2400_v7 }
 0x24e   :  { %1893 = vmatpush1.bf16.msra.mxu0 %v2403_v16  ;;  %1925 = vmatpush1.bf16.msra.mxu1 %v2407_v19 }
 0x24f   :  { %1895 = vmatprep.subr.bf16.mxu0 %v2409_v20  ;;  %1927 = vmatprep.subr.bf16.mxu1 %v2412_v25 }
 0x252   :  { %1897 = vmatpush1.bf16.msra.mxu0 %v2415_v34  ;;  %1929 = vmatpush1.bf16.msra.mxu1 %v2419_v36 }
 0x253   :  { %1899 = vmatprep.subr.bf16.mxu0 %v2421_v37  ;;  %1931 = vmatprep.subr.bf16.mxu1 %v2424_v42 }
 0x256   :  { %1901 = vmatpush1.bf16.msra.mxu0 %v2427_v46  ;;  %1933 = vmatpush1.bf16.msra.mxu1 %v2431_v47 }
 0x257   :  { %1935 = vmatprep.subr.bf16.mxu0 %v2340_v4  ;;  %1967 = vmatprep.subr.bf16.mxu1 %v2342_v8 }
 0x30c   :  { %v553_v54 = vpop.f32.mrb[4].mxu0  ;;  %v624_v6 = vpop.f32.mrb[4].mxu1 }
 0x30d   :  { %v555_v10 = vpop.f32.mrb[5].mxu0  ;;  %v626_v11 = vpop.f32.mrb[5].mxu1 }
 0x30e   :  { %v633_v12 = vcombine.low %v553_v54, %v555_v10  ;;  %v634_v14 = vcombine.low %v624_v6, %v626_v11 }
 0x310   :  { %v641_v15 = vrot.slane %v633_v12, %v2472_v59  ;;  %v648_v21 = vrot.slane %v634_v14, %v2472_v59 }
 0x312   :  { %v649_v24 = vcombine.low %v641_v15, %v648_v21 }
 0x314   :  { %v651_v28 = vadd.f32 %v1666_v23, %v649_v24 }
 0x316   :  { %v652_v29 = vmul.f32 0.5, %v651_v28  ;;  %v657_v30 = vrot.slane %v651_v28, 2  ;;  %v663_v33 = vrot.slane %v651_v28, 4  ;;  %v666_v38 = vrot.slane %v651_v28, 6  ;;  %v1668_v28 = vld [vmem:[%s2767_s0 + $0x18] sm:$0xff] }
 0x318   :  { %2215 = vtanh.f32 %v652_v29  ;;  %v659_v32 = vmul.f32 0.5, %v657_v30  ;;  %v668_v41 = vmul.f32 0.5, %v666_v38 }
 0x31a   :  { %2217 = vtanh.f32 %v659_v32 }
 0x31b   :  { %2219 = vtanh.f32 %v663_v33 }
 0x31c   :  { %2221 = vtanh.f32 %v668_v41 }
 0x322   :  { %v2216_v43 = vpop.eup %2215 }
 0x323   :  { %v654_v45 = vadd.f32 1.0, %v2216_v43 }
 0x324   :  { %v2218_v48 = vpop.eup %2217 }
 0x325   :  { %v655_v49 = vmul.f32 0.5, %v654_v45  ;;  %v661_v50 = vadd.f32 1.0, %v2218_v48  ;;  %v2220_v56 = vpop.eup %2219 }
 0x326   :  { %v2222_v3 = vpop.eup %2221 }
 0x327   :  { %v662_v55 = vmul.f32 0.5, %v661_v50  ;;  %v673_v61 = vmul.f32 %v2220_v56, %v655_v49  ;;  %v670_v5 = vadd.f32 1.0, %v2222_v3 }
 0x329   :  { %v672_v60 = vmul.f32 %v662_v55, %v2525_v58  ;;  %v671_v54 = vmul.f32 0.5, %v670_v5 }
 0x32b   :  { %v2571_v62 = vadd.f32 %v673_v61, %v672_v60 }
 0x32d   :  { %2223 = vtanh.f32 %v2571_v62 }
 0x337   :  { %v2224_v6 = vpop.eup %2223 }
 0x338   :  { %v676_v10 = vmul.f32 %v2224_v6, %v671_v54 }
 0x33a   :  { %1667 = vst [vmem:[%s2769_s2 + $0x4] sm:$0x3] %v676_v10  ;;  %746 = vmatmul.mubr.f32.vlgmr.msra.gmra.mrb[6].mxu0 %v676_v10  ;;  %817 = vmatmul.mubr.f32.vlgmr.msra.gmra.mrb[6].mxu1 %v676_v10 }
 0x33b   :  { %1937 = vmatpush1.bf16.msra.mxu0 %v2344_v9  ;;  %1969 = vmatpush1.bf16.msra.mxu1 %v2347_v13 }
 0x33c   :  { %1939 = vmatprep.subr.bf16.mxu0 %v2351_v17  ;;  %1971 = vmatprep.subr.bf16.mxu1 %v2353_v18 }
 0x33d   :  { %939 = vmatprep.mubr.f32.mxu0 %v2302_v0  ;;  %1010 = vmatprep.mubr.f32.mxu1 %v2302_v0 }
 0x33f   :  { %1941 = vmatpush1.bf16.msra.mxu0 %v2356_v22  ;;  %1973 = vmatpush1.bf16.msra.mxu1 %v2360_v26 }
 0x340   :  { %1943 = vmatprep.subr.bf16.mxu0 %v2362_v27  ;;  %1975 = vmatprep.subr.bf16.mxu1 %v2364_v31 }
 0x343   :  { %1945 = vmatpush1.bf16.msra.mxu0 %v2367_v35  ;;  %1977 = vmatpush1.bf16.msra.mxu1 %v2371_v39 }
 0x344   :  { %1947 = vmatprep.subr.bf16.mxu0 %v2373_v40  ;;  %1979 = vmatprep.subr.bf16.mxu1 %v2376_v44 }
 0x347   :  { %1949 = vmatpush1.bf16.msra.mxu0 %v2379_v51  ;;  %1981 = vmatpush1.bf16.msra.mxu1 %v2383_v52 }
 0x348   :  { %1951 = vmatprep.subr.bf16.mxu0 %v2385_v53  ;;  %1983 = vmatprep.subr.bf16.mxu1 %v2388_v57 }
 0x34b   :  { %1953 = vmatpush1.bf16.msra.mxu0 %v2391_v63  ;;  %1985 = vmatpush1.bf16.msra.mxu1 %v2395_v1 }
 0x34c   :  { %1955 = vmatprep.subr.bf16.mxu0 %v2397_v2  ;;  %1987 = vmatprep.subr.bf16.mxu1 %v2400_v7 }
 0x34f   :  { %1957 = vmatpush1.bf16.msra.mxu0 %v2403_v16  ;;  %1989 = vmatpush1.bf16.msra.mxu1 %v2407_v19 }
 0x350   :  { %1959 = vmatprep.subr.bf16.mxu0 %v2409_v20  ;;  %1991 = vmatprep.subr.bf16.mxu1 %v2412_v25 }
 0x353   :  { %1961 = vmatpush1.bf16.msra.mxu0 %v2415_v34  ;;  %1993 = vmatpush1.bf16.msra.mxu1 %v2419_v36 }
 0x354   :  { %1963 = vmatprep.subr.bf16.mxu0 %v2421_v37  ;;  %1995 = vmatprep.subr.bf16.mxu1 %v2424_v42 }
 0x357   :  { %1965 = vmatpush1.bf16.msra.mxu0 %v2427_v46  ;;  %1997 = vmatpush1.bf16.msra.mxu1 %v2431_v47 }
 0x358   :  { %1999 = vmatprep.subr.bf16.mxu0 %v2340_v4  ;;  %2031 = vmatprep.subr.bf16.mxu1 %v2342_v8 }
 0x40d   :  { %v747_v58 = vpop.f32.mrb[6].mxu0  ;;  %v818_v11 = vpop.f32.mrb[6].mxu1 }
 0x40e   :  { %v749_v12 = vpop.f32.mrb[7].mxu0  ;;  %v820_v14 = vpop.f32.mrb[7].mxu1 }
 0x40f   :  { %v827_v15 = vcombine.low %v747_v58, %v749_v12  ;;  %v828_v21 = vcombine.low %v818_v11, %v820_v14 }
 0x411   :  { %v835_v23 = vrot.slane %v827_v15, %v2472_v59  ;;  %v842_v24 = vrot.slane %v828_v21, %v2472_v59 }
 0x413   :  { %v843_v29 = vcombine.low %v835_v23, %v842_v24 }
 0x415   :  { %v845_v30 = vadd.f32 %v1668_v28, %v843_v29 }
 0x417   :  { %v846_v32 = vmul.f32 0.5, %v845_v30  ;;  %v851_v33 = vrot.slane %v845_v30, 2  ;;  %v857_v41 = vrot.slane %v845_v30, 4  ;;  %v860_v43 = vrot.slane %v845_v30, 6  ;;  %v1670_v30 = vld [vmem:[%s2767_s0 + $0x20] sm:$0xff] }
 0x419   :  { %2225 = vtanh.f32 %v846_v32  ;;  %v853_v38 = vmul.f32 0.5, %v851_v33  ;;  %v862_v45 = vmul.f32 0.5, %v860_v43 }
 0x41b   :  { %2227 = vtanh.f32 %v853_v38 }
 0x41c   :  { %2229 = vtanh.f32 %v857_v41 }
 0x41d   :  { %2231 = vtanh.f32 %v862_v45 }
 0x423   :  { %v2226_v48 = vpop.eup %2225 }
 0x424   :  { %v848_v49 = vadd.f32 1.0, %v2226_v48 }
 0x425   :  { %v2228_v50 = vpop.eup %2227 }
 0x426   :  { %v849_v55 = vmul.f32 0.5, %v848_v49  ;;  %v855_v56 = vadd.f32 1.0, %v2228_v50  ;;  %v2230_v61 = vpop.eup %2229 }
 0x427   :  { %v2232_v6 = vpop.eup %2231 }
 0x428   :  { %v856_v60 = vmul.f32 0.5, %v855_v56  ;;  %v867_v5 = vmul.f32 %v2230_v61, %v849_v55  ;;  %v864_v10 = vadd.f32 1.0, %v2232_v6 }
 0x42a   :  { %v866_v3 = vmul.f32 %v856_v60, %v2571_v62  ;;  %v865_v58 = vmul.f32 0.5, %v864_v10 }
 0x42c   :  { %v2617_v54 = vadd.f32 %v867_v5, %v866_v3 }
 0x42e   :  { %2233 = vtanh.f32 %v2617_v54 }
 0x438   :  { %v2234_v11 = vpop.eup %2233 }
 0x439   :  { %v870_v12 = vmul.f32 %v2234_v11, %v865_v58 }
 0x43b   :  { %1669 = vst [vmem:[%s2769_s2 + $0x6] sm:$0x3] %v870_v12  ;;  %940 = vmatmul.mubr.f32.vlgmr.msra.gmra.mrb[8].mxu0 %v870_v12  ;;  %1011 = vmatmul.mubr.f32.vlgmr.msra.gmra.mrb[8].mxu1 %v870_v12 }
 0x43c   :  { %2001 = vmatpush1.bf16.msra.mxu0 %v2344_v9  ;;  %2033 = vmatpush1.bf16.msra.mxu1 %v2347_v13 }
 0x43d   :  { %2003 = vmatprep.subr.bf16.mxu0 %v2351_v17  ;;  %2035 = vmatprep.subr.bf16.mxu1 %v2353_v18 }
 0x43e   :  { %1133 = vmatprep.mubr.f32.mxu0 %v2302_v0  ;;  %1204 = vmatprep.mubr.f32.mxu1 %v2302_v0 }
 0x440   :  { %2005 = vmatpush1.bf16.msra.mxu0 %v2356_v22  ;;  %2037 = vmatpush1.bf16.msra.mxu1 %v2360_v26 }
 0x441   :  { %2007 = vmatprep.subr.bf16.mxu0 %v2362_v27  ;;  %2039 = vmatprep.subr.bf16.mxu1 %v2364_v31 }
 0x444   :  { %2009 = vmatpush1.bf16.msra.mxu0 %v2367_v35  ;;  %2041 = vmatpush1.bf16.msra.mxu1 %v2371_v39 }
 0x445   :  { %2011 = vmatprep.subr.bf16.mxu0 %v2373_v40  ;;  %2043 = vmatprep.subr.bf16.mxu1 %v2376_v44 }
 0x448   :  { %2013 = vmatpush1.bf16.msra.mxu0 %v2379_v51  ;;  %2045 = vmatpush1.bf16.msra.mxu1 %v2383_v52 }
 0x449   :  { %2015 = vmatprep.subr.bf16.mxu0 %v2385_v53  ;;  %2047 = vmatprep.subr.bf16.mxu1 %v2388_v57 }
 0x44c   :  { %2017 = vmatpush1.bf16.msra.mxu0 %v2391_v63  ;;  %2049 = vmatpush1.bf16.msra.mxu1 %v2395_v1 }
 0x44d   :  { %2019 = vmatprep.subr.bf16.mxu0 %v2397_v2  ;;  %2051 = vmatprep.subr.bf16.mxu1 %v2400_v7 }
 0x450   :  { %2021 = vmatpush1.bf16.msra.mxu0 %v2403_v16  ;;  %2053 = vmatpush1.bf16.msra.mxu1 %v2407_v19 }
 0x451   :  { %2023 = vmatprep.subr.bf16.mxu0 %v2409_v20  ;;  %2055 = vmatprep.subr.bf16.mxu1 %v2412_v25 }
 0x454   :  { %2025 = vmatpush1.bf16.msra.mxu0 %v2415_v34  ;;  %2057 = vmatpush1.bf16.msra.mxu1 %v2419_v36 }
 0x455   :  { %2027 = vmatprep.subr.bf16.mxu0 %v2421_v37  ;;  %2059 = vmatprep.subr.bf16.mxu1 %v2424_v42 }
 0x458   :  { %2029 = vmatpush1.bf16.msra.mxu0 %v2427_v46  ;;  %2061 = vmatpush1.bf16.msra.mxu1 %v2431_v47 }
 0x459   :  { %2063 = vmatprep.subr.bf16.mxu0 %v2340_v4  ;;  %2095 = vmatprep.subr.bf16.mxu1 %v2342_v8 }
 0x50e   :  { %v941_v62 = vpop.f32.mrb[8].mxu0  ;;  %v1012_v14 = vpop.f32.mrb[8].mxu1 }
 0x50f   :  { %v943_v15 = vpop.f32.mrb[9].mxu0  ;;  %v1014_v21 = vpop.f32.mrb[9].mxu1 }
 0x510   :  { %v1021_v23 = vcombine.low %v941_v62, %v943_v15  ;;  %v1022_v24 = vcombine.low %v1012_v14, %v1014_v21 }
 0x512   :  { %v1029_v28 = vrot.slane %v1021_v23, %v2472_v59  ;;  %v1036_v29 = vrot.slane %v1022_v24, %v2472_v59 }
 0x514   :  { %v1037_v32 = vcombine.low %v1029_v28, %v1036_v29 }
 0x516   :  { %v1039_v33 = vadd.f32 %v1670_v30, %v1037_v32 }
 0x518   :  { %v1040_v38 = vmul.f32 0.5, %v1039_v33  ;;  %v1045_v41 = vrot.slane %v1039_v33, 2  ;;  %v1051_v45 = vrot.slane %v1039_v33, 4  ;;  %v1054_v48 = vrot.slane %v1039_v33, 6  ;;  %v1672_v33 = vld [vmem:[%s2767_s0 + $0x28] sm:$0xff] }
 0x51a   :  { %2235 = vtanh.f32 %v1040_v38  ;;  %v1047_v43 = vmul.f32 0.5, %v1045_v41  ;;  %v1056_v49 = vmul.f32 0.5, %v1054_v48 }
 0x51c   :  { %2237 = vtanh.f32 %v1047_v43 }
 0x51d   :  { %2239 = vtanh.f32 %v1051_v45 }
 0x51e   :  { %2241 = vtanh.f32 %v1056_v49 }
 0x524   :  { %v2236_v50 = vpop.eup %2235 }
 0x525   :  { %v1042_v55 = vadd.f32 1.0, %v2236_v50 }
 0x526   :  { %v2238_v56 = vpop.eup %2237 }
 0x527   :  { %v1043_v60 = vmul.f32 0.5, %v1042_v55  ;;  %v1049_v61 = vadd.f32 1.0, %v2238_v56  ;;  %v2240_v5 = vpop.eup %2239 }
 0x528   :  { %v2242_v11 = vpop.eup %2241 }
 0x529   :  { %v1050_v3 = vmul.f32 0.5, %v1049_v61  ;;  %v1061_v10 = vmul.f32 %v2240_v5, %v1043_v60  ;;  %v1058_v12 = vadd.f32 1.0, %v2242_v11 }
 0x52b   :  { %v1060_v6 = vmul.f32 %v1050_v3, %v2617_v54  ;;  %v1059_v62 = vmul.f32 0.5, %v1058_v12 }
 0x52d   :  { %v2663_v58 = vadd.f32 %v1061_v10, %v1060_v6 }
 0x52f   :  { %2243 = vtanh.f32 %v2663_v58 }
 0x539   :  { %v2244_v14 = vpop.eup %2243 }
 0x53a   :  { %v1064_v15 = vmul.f32 %v2244_v14, %v1059_v62 }
 0x53c   :  { %1671 = vst [vmem:[%s2769_s2 + $0x8] sm:$0x3] %v1064_v15  ;;  %1134 = vmatmul.mubr.f32.vlgmr.msra.gmra.mrb[10].mxu0 %v1064_v15  ;;  %1205 = vmatmul.mubr.f32.vlgmr.msra.gmra.mrb[10].mxu1 %v1064_v15 }
 0x53d   :  { %2065 = vmatpush1.bf16.msra.mxu0 %v2344_v9  ;;  %2097 = vmatpush1.bf16.msra.mxu1 %v2347_v13 }
 0x53e   :  { %2067 = vmatprep.subr.bf16.mxu0 %v2351_v17  ;;  %2099 = vmatprep.subr.bf16.mxu1 %v2353_v18 }
 0x53f   :  { %1327 = vmatprep.mubr.f32.mxu0 %v2302_v0  ;;  %1398 = vmatprep.mubr.f32.mxu1 %v2302_v0 }
 0x541   :  { %2069 = vmatpush1.bf16.msra.mxu0 %v2356_v22  ;;  %2101 = vmatpush1.bf16.msra.mxu1 %v2360_v26 }
 0x542   :  { %2071 = vmatprep.subr.bf16.mxu0 %v2362_v27  ;;  %2103 = vmatprep.subr.bf16.mxu1 %v2364_v31 }
 0x545   :  { %2073 = vmatpush1.bf16.msra.mxu0 %v2367_v35  ;;  %2105 = vmatpush1.bf16.msra.mxu1 %v2371_v39 }
 0x546   :  { %2075 = vmatprep.subr.bf16.mxu0 %v2373_v40  ;;  %2107 = vmatprep.subr.bf16.mxu1 %v2376_v44 }
 0x549   :  { %2077 = vmatpush1.bf16.msra.mxu0 %v2379_v51  ;;  %2109 = vmatpush1.bf16.msra.mxu1 %v2383_v52 }
 0x54a   :  { %2079 = vmatprep.subr.bf16.mxu0 %v2385_v53  ;;  %2111 = vmatprep.subr.bf16.mxu1 %v2388_v57 }
 0x54d   :  { %2081 = vmatpush1.bf16.msra.mxu0 %v2391_v63  ;;  %2113 = vmatpush1.bf16.msra.mxu1 %v2395_v1 }
 0x54e   :  { %2083 = vmatprep.subr.bf16.mxu0 %v2397_v2  ;;  %2115 = vmatprep.subr.bf16.mxu1 %v2400_v7 }
 0x551   :  { %2085 = vmatpush1.bf16.msra.mxu0 %v2403_v16  ;;  %2117 = vmatpush1.bf16.msra.mxu1 %v2407_v19 }
 0x552   :  { %2087 = vmatprep.subr.bf16.mxu0 %v2409_v20  ;;  %2119 = vmatprep.subr.bf16.mxu1 %v2412_v25 }
 0x555   :  { %2089 = vmatpush1.bf16.msra.mxu0 %v2415_v34  ;;  %2121 = vmatpush1.bf16.msra.mxu1 %v2419_v36 }
 0x556   :  { %2091 = vmatprep.subr.bf16.mxu0 %v2421_v37  ;;  %2123 = vmatprep.subr.bf16.mxu1 %v2424_v42 }
 0x559   :  { %2093 = vmatpush1.bf16.msra.mxu0 %v2427_v46  ;;  %2125 = vmatpush1.bf16.msra.mxu1 %v2431_v47 }
 0x55a   :  { %2127 = vmatprep.subr.bf16.mxu0 %v2340_v4  ;;  %2159 = vmatprep.subr.bf16.mxu1 %v2342_v8 }
 0x60f   :  { %v1135_v54 = vpop.f32.mrb[10].mxu0  ;;  %v1206_v21 = vpop.f32.mrb[10].mxu1 }
 0x610   :  { %v1137_v23 = vpop.f32.mrb[11].mxu0  ;;  %v1208_v24 = vpop.f32.mrb[11].mxu1 }
 0x611   :  { %v1215_v28 = vcombine.low %v1135_v54, %v1137_v23  ;;  %v1216_v29 = vcombine.low %v1206_v21, %v1208_v24 }
 0x613   :  { %v1223_v30 = vrot.slane %v1215_v28, %v2472_v59  ;;  %v1230_v32 = vrot.slane %v1216_v29, %v2472_v59 }
 0x615   :  { %v1231_v38 = vcombine.low %v1223_v30, %v1230_v32 }
 0x617   :  { %v1233_v41 = vadd.f32 %v1672_v33, %v1231_v38  ;;  %v1676_v38 = vld [vmem:[%s2767_s0 + $0x38] sm:$0xff] }
 0x619   :  { %v1234_v43 = vmul.f32 0.5, %v1233_v41  ;;  %v1239_v4 = vrot.slane %v1233_v41, 2  ;;  %v1245_v45 = vrot.slane %v1233_v41, 4  ;;  %v1248_v48 = vrot.slane %v1233_v41, 6 }
 0x61b   :  { %2245 = vtanh.f32 %v1234_v43  ;;  %v1241_v8 = vmul.f32 0.5, %v1239_v4  ;;  %v1250_v49 = vmul.f32 0.5, %v1248_v48 }
 0x61d   :  { %2247 = vtanh.f32 %v1241_v8 }
 0x61e   :  { %2249 = vtanh.f32 %v1245_v45 }
 0x61f   :  { %2251 = vtanh.f32 %v1250_v49 }
 0x625   :  { %v2246_v50 = vpop.eup %2245 }
 0x626   :  { %v1236_v55 = vadd.f32 1.0, %v2246_v50 }
 0x627   :  { %v2248_v56 = vpop.eup %2247 }
 0x628   :  { %v1237_v60 = vmul.f32 0.5, %v1236_v55  ;;  %v1243_v61 = vadd.f32 1.0, %v2248_v56  ;;  %v2250_v5 = vpop.eup %2249 }
 0x629   :  { %v2252_v12 = vpop.eup %2251 }
 0x62a   :  { %v1244_v3 = vmul.f32 0.5, %v1243_v61  ;;  %v1255_v10 = vmul.f32 %v2250_v5, %v1237_v60  ;;  %v1252_v62 = vadd.f32 1.0, %v2252_v12 }
 0x62c   :  { %v1254_v6 = vmul.f32 %v1244_v3, %v2663_v58  ;;  %v1253_v14 = vmul.f32 0.5, %v1252_v62 }
 0x62e   :  { %v2709_v11 = vadd.f32 %v1255_v10, %v1254_v6 }
 0x630   :  { %2253 = vtanh.f32 %v2709_v11 }
 0x63a   :  { %v2254_v15 = vpop.eup %2253 }
 0x63b   :  { %v1258_v54 = vmul.f32 %v2254_v15, %v1253_v14 }
 0x63d   :  { %1673 = vst [vmem:[%s2769_s2 + $0xa] sm:$0x3] %v1258_v54  ;;  %1328 = vmatmul.mubr.f32.vlgmr.msra.gmra.mrb[12].mxu0 %v1258_v54  ;;  %1399 = vmatmul.mubr.f32.vlgmr.msra.gmra.mrb[12].mxu1 %v1258_v54 }
 0x63e   :  { %2129 = vmatpush1.bf16.msra.mxu0 %v2344_v9  ;;  %2161 = vmatpush1.bf16.msra.mxu1 %v2347_v13 }
 0x63f   :  { %2131 = vmatprep.subr.bf16.mxu0 %v2351_v17  ;;  %2163 = vmatprep.subr.bf16.mxu1 %v2353_v18 }
 0x640   :  { %1521 = vmatprep.mubr.f32.mxu0 %v2302_v0  ;;  %1592 = vmatprep.mubr.f32.mxu1 %v2302_v0 }
 0x642   :  { %2133 = vmatpush1.bf16.msra.mxu0 %v2356_v22  ;;  %2165 = vmatpush1.bf16.msra.mxu1 %v2360_v26 }
 0x643   :  { %2135 = vmatprep.subr.bf16.mxu0 %v2362_v27  ;;  %2167 = vmatprep.subr.bf16.mxu1 %v2364_v31  ;;  %v1674_v31 = vld [vmem:[%s2767_s0 + $0x30] sm:$0xff] }
 0x646   :  { %2137 = vmatpush1.bf16.msra.mxu0 %v2367_v35  ;;  %2169 = vmatpush1.bf16.msra.mxu1 %v2371_v39 }
 0x647   :  { %2139 = vmatprep.subr.bf16.mxu0 %v2373_v40  ;;  %2171 = vmatprep.subr.bf16.mxu1 %v2376_v44 }
 0x64a   :  { %2141 = vmatpush1.bf16.msra.mxu0 %v2379_v51  ;;  %2173 = vmatpush1.bf16.msra.mxu1 %v2383_v52 }
 0x64b   :  { %2143 = vmatprep.subr.bf16.mxu0 %v2385_v53  ;;  %2175 = vmatprep.subr.bf16.mxu1 %v2388_v57 }
 0x64e   :  { %2145 = vmatpush1.bf16.msra.mxu0 %v2391_v63  ;;  %2177 = vmatpush1.bf16.msra.mxu1 %v2395_v1 }
 0x64f   :  { %2147 = vmatprep.subr.bf16.mxu0 %v2397_v2  ;;  %2179 = vmatprep.subr.bf16.mxu1 %v2400_v7 }
 0x652   :  { %2149 = vmatpush1.bf16.msra.mxu0 %v2403_v16  ;;  %2181 = vmatpush1.bf16.msra.mxu1 %v2407_v19 }
 0x653   :  { %2151 = vmatprep.subr.bf16.mxu0 %v2409_v20  ;;  %2183 = vmatprep.subr.bf16.mxu1 %v2412_v25 }
 0x656   :  { %2153 = vmatpush1.bf16.msra.mxu0 %v2415_v34  ;;  %2185 = vmatpush1.bf16.msra.mxu1 %v2419_v36 }
 0x657   :  { %2155 = vmatprep.subr.bf16.mxu0 %v2421_v37  ;;  %2187 = vmatprep.subr.bf16.mxu1 %v2424_v42 }
 0x65a   :  { %2157 = vmatpush1.bf16.msra.mxu0 %v2427_v46  ;;  %2189 = vmatpush1.bf16.msra.mxu1 %v2431_v47 }
 0x710   :  { %v1329_v0 = vpop.f32.mrb[12].mxu0  ;;  %v1400_v9 = vpop.f32.mrb[12].mxu1 }
 0x711   :  { %v1331_v13 = vpop.f32.mrb[13].mxu0  ;;  %v1402_v17 = vpop.f32.mrb[13].mxu1 }
 0x712   :  { %v1409_v18 = vcombine.low %v1329_v0, %v1331_v13  ;;  %v1410_v22 = vcombine.low %v1400_v9, %v1402_v17 }
 0x714   :  { %v1417_v26 = vrot.slane %v1409_v18, %v2472_v59  ;;  %v1424_v27 = vrot.slane %v1410_v22, %v2472_v59 }
 0x716   :  { %v1425_v35 = vcombine.low %v1417_v26, %v1424_v27 }
 0x718   :  { %v1427_v39 = vadd.f32 %v1674_v31, %v1425_v35 }
 0x71a   :  { %v1428_v40 = vmul.f32 0.5, %v1427_v39  ;;  %v1433_v44 = vrot.slane %v1427_v39, 2  ;;  %v1439_v52 = vrot.slane %v1427_v39, 4  ;;  %v1442_v53 = vrot.slane %v1427_v39, 6 }
 0x71c   :  { %2255 = vtanh.f32 %v1428_v40  ;;  %v1435_v51 = vmul.f32 0.5, %v1433_v44  ;;  %v1444_v57 = vmul.f32 0.5, %v1442_v53 }
 0x71e   :  { %2257 = vtanh.f32 %v1435_v51 }
 0x71f   :  { %2259 = vtanh.f32 %v1439_v52 }
 0x720   :  { %2261 = vtanh.f32 %v1444_v57 }
 0x726   :  { %v2256_v63 = vpop.eup %2255 }
 0x727   :  { %v1430_v1 = vadd.f32 1.0, %v2256_v63 }
 0x728   :  { %v2258_v2 = vpop.eup %2257 }
 0x729   :  { %v1431_v7 = vmul.f32 0.5, %v1430_v1  ;;  %v1437_v16 = vadd.f32 1.0, %v2258_v2  ;;  %v2260_v20 = vpop.eup %2259 }
 0x72a   :  { %v2262_v37 = vpop.eup %2261 }
 0x72b   :  { %v1438_v19 = vmul.f32 0.5, %v1437_v16  ;;  %v1449_v34 = vmul.f32 %v2260_v20, %v1431_v7  ;;  %v1446_v42 = vadd.f32 1.0, %v2262_v37 }
 0x72d   :  { %v1448_v25 = vmul.f32 %v1438_v19, %v2709_v11  ;;  %v1447_v46 = vmul.f32 0.5, %v1446_v42 }
 0x72f   :  { %v1450_v36 = vadd.f32 %v1449_v34, %v1448_v25 }
 0x731   :  { %2263 = vtanh.f32 %v1450_v36 }
 0x73b   :  { %v2264_v47 = vpop.eup %2263 }
 0x73c   :  { %v1452_v58 = vmul.f32 %v2264_v47, %v1447_v46 }
 0x73e   :  { %1675 = vst [vmem:[%s2769_s2 + $0xc] sm:$0x3] %v1452_v58  ;;  %1522 = vmatmul.mubr.f32.vlgmr.msra.gmra.mrb[14].mxu0 %v1452_v58  ;;  %1593 = vmatmul.mubr.f32.vlgmr.msra.gmra.mrb[14].mxu1 %v1452_v58 }
 0x811   :  { %v1523_v21 = vpop.f32.mrb[14].mxu0  ;;  %v1594_v23 = vpop.f32.mrb[14].mxu1 }
 0x812   :  { %v1525_v24 = vpop.f32.mrb[15].mxu0  ;;  %v1596_v28 = vpop.f32.mrb[15].mxu1 }
 0x813   :  { %v1603_v29 = vcombine.low %v1523_v21, %v1525_v24  ;;  %v1604_v30 = vcombine.low %v1594_v23, %v1596_v28 }
 0x815   :  { %v1611_v32 = vrot.slane %v1603_v29, %v2472_v59  ;;  %v1618_v33 = vrot.slane %v1604_v30, %v2472_v59 }
 0x817   :  { %v1619_v41 = vcombine.low %v1611_v32, %v1618_v33 }
 0x819   :  { %v1621_v43 = vadd.f32 %v1676_v38, %v1619_v41 }
 0x81b   :  { %v1622_v4 = vmul.f32 0.5, %v1621_v43  ;;  %v1627_v8 = vrot.slane %v1621_v43, 2  ;;  %v1633_v48 = vrot.slane %v1621_v43, 4  ;;  %v1636_v49 = vrot.slane %v1621_v43, 6 }
 0x81d   :  { %2265 = vtanh.f32 %v1622_v4  ;;  %v1629_v45 = vmul.f32 0.5, %v1627_v8  ;;  %v1638_v50 = vmul.f32 0.5, %v1636_v49 }
 0x81f   :  { %2267 = vtanh.f32 %v1629_v45 }
 0x820   :  { %2269 = vtanh.f32 %v1633_v48 }
 0x821   :  { %2271 = vtanh.f32 %v1638_v50 }
 0x827   :  { %v2266_v55 = vpop.eup %2265 }
 0x828   :  { %v1624_v56 = vadd.f32 1.0, %v2266_v55 }
 0x829   :  { %v2268_v60 = vpop.eup %2267 }
 0x82a   :  { %v1625_v61 = vmul.f32 0.5, %v1624_v56  ;;  %v1631_v59 = vadd.f32 1.0, %v2268_v60  ;;  %v2270_v5 = vpop.eup %2269 }
 0x82b   :  { %v2272_v12 = vpop.eup %2271 }
 0x82c   :  { %v1632_v3 = vmul.f32 0.5, %v1631_v59  ;;  %v1643_v10 = vmul.f32 %v2270_v5, %v1625_v61  ;;  %v1640_v62 = vadd.f32 1.0, %v2272_v12 }
 0x82e   :  { %v1642_v6 = vmul.f32 %v1632_v3, %v1450_v36  ;;  %v1641_v14 = vmul.f32 0.5, %v1640_v62 }
 0x830   :  { %v1644_v11 = vadd.f32 %v1643_v10, %v1642_v6 }
 0x832   :  { %2273 = vtanh.f32 %v1644_v11  ;;  %1650 = vst [vmem:[#allocation3] sm:$0x3] %v1644_v11 }
 0x83c   :  { %v2274_v15 = vpop.eup %2273 }
 0x83d   :  { %v1646_v54 = vmul.f32 %v2274_v15, %v1641_v14 }
 0x83f   :  { %1677 = vst [vmem:[%s2769_s2 + $0xe] sm:$0x3] %v1646_v54  ;;  %1649 = vst [vmem:[#allocation2] sm:$0x3] %v1646_v54 }
 0x840   :  { %1654 = vst [vmem:[%s2770_s3] sm:$0x3] %v1646_v54 }
 0x841   :  { %1663 = vsyncpa [#allocation5], 1 }

// kernel: lstm_forward.9
= control target key start
LH: loop header
LB: loop body
LE: loop exit
PB: predicated region body
PF: predicated region fallthrough
CT: control target
= control target key end

     0   :  { %v408_v3 = vmov 0.0|0.0   ;;  %vm409_vm0 = vmmov 0   ;;  %v410_v6 = vmov 0.0   ;;  %s575_s0 = inlined_call_operand.vmem [shape: f32[4,128], index: 0, kind: input, shape index: {}]   ;;  %s576_s1 = inlined_call_operand.vmem [shape: f32[128,128], index: 1, kind: input, shape index: {}]   ;;  %s577_s2 = inlined_call_operand.vmem [shape: f32[1,128], index: 2, kind: input, shape index: {}]   ;;  %s578_s3 = inlined_call_operand.vmem [shape: f32[128,10], index: 3, kind: input, shape index: {}]   ;;  %s579_s4 = inlined_call_operand.vmem [shape: f32[1,10], index: 4, kind: input, shape index: {}]   ;;  %s580_s5 = inlined_call_operand.hbm [shape: f32[4,10], index: 5, kind: output, shape index: {}]  }
   0x1   :  { %v23_v0 = vld [vmem:[%s576_s1] sm:$0xff]  ;;  %v24_v1 = vld [vmem:[%s576_s1 + $0x8] sm:$0xff]  ;;  %v25_v2 = vld [vmem:[%s576_s1 + $0x10] sm:$0xff]  ;;  %332 = vmatprep.subr.bf16.mxu0 %v408_v3  ;;  %294 = vmatprep.mubr.msk.f32.mxu0 %vm409_vm0, %v410_v6 }
   0x2   :  { %v333_v4 = vpack.c.bf16 %v24_v1, %v23_v0  ;;  %v26_v5 = vld [vmem:[%s576_s1 + $0x18] sm:$0xff]  ;;  %356 = vmatprep.subr.bf16.mxu1 %v408_v3  ;;  %329 = vmatprep.mubr.msk.f32.mxu1 %vm409_vm0, %v410_v6  ;;  %v27_v8 = vld [vmem:[%s576_s1 + $0x20] sm:$0xff]  ;;  %v28_v9 = vld [vmem:[%s576_s1 + $0x28] sm:$0xff] }
   0x3   :  { %v336_v7 = vpack.c.bf16 %v26_v5, %v25_v2  ;;  %v117_v10 = vld [vmem:[%s578_s3] sm:$0xff]  ;;  %v118_v11 = vld [vmem:[%s578_s3 + $0x8] sm:$0xff]  ;;  %v119_v12 = vld [vmem:[%s578_s3 + $0x10] sm:$0xff]  ;;  %v339_v14 = vpack.c.bf16 %v28_v9, %v27_v8 }
   0x4   :  { %334 = vmatpush3.bf16.msra.mxu0 %v333_v4  ;;  %v120_v13 = vld [vmem:[%s578_s3 + $0x18] sm:$0xff]  ;;  %v357_v15 = vpack.c.bf16 %v118_v11, %v117_v10  ;;  %v29_v16 = vld [vmem:[%s576_s1 + $0x30] sm:$0xff]  ;;  %v121_v19 = vld [vmem:[%s578_s3 + $0x20] sm:$0xff] }
   0x5   :  { %335 = vmatprep.subr.bf16.mxu0 %v408_v3  ;;  %v30_v17 = vld [vmem:[%s576_s1 + $0x38] sm:$0xff]  ;;  %v360_v18 = vpack.c.bf16 %v120_v13, %v119_v12  ;;  %v122_v20 = vld [vmem:[%s578_s3 + $0x28] sm:$0xff] }
   0x6   :  { %358 = vmatpush3.bf16.msra.mxu1 %v357_v15 }
   0x7   :  { %359 = vmatprep.subr.bf16.mxu1 %v408_v3 }
   0x8   :  { %337 = vmatpush3.bf16.msra.mxu0 %v336_v7 }
   0x9   :  { %338 = vmatprep.subr.bf16.mxu0 %v408_v3 }
   0xa   :  { %10 = vsyncpa [#allocation3], 0  ;;  %v342_v21 = vpack.c.bf16 %v30_v17, %v29_v16  ;;  %v31_v22 = vld [vmem:[%s576_s1 + $0x40] sm:$0xff]  ;;  %v32_v23 = vld [vmem:[%s576_s1 + $0x48] sm:$0xff]  ;;  %361 = vmatpush3.bf16.msra.mxu1 %v360_v18  ;;  %v363_v24 = vpack.c.bf16 %v122_v20, %v121_v19  ;;  %s411_s11 = smov [#allocation2]   ;;  %vm210_vm1 = vcmask 76800  }
   0xb   :  { %362 = vmatprep.subr.bf16.mxu1 %v408_v3  ;;  %v123_v25 = vld [vmem:[%s578_s3 + $0x30] sm:$0xff]  ;;  %v124_v26 = vld [vmem:[%s578_s3 + $0x38] sm:$0xff]  ;;  %v345_v27 = vpack.c.bf16 %v32_v23, %v31_v22  ;;  %v125_v31 = vld [vmem:[%s578_s3 + $0x40] sm:$0xff]  ;;  %s218_s12 = sshll.u32 %s411_s11, 4  ;;  %s219_s12 = int_to_ptr.vmem [resolvable:$true] %s218_s12 }
   0xc   :  { %340 = vmatpush3.bf16.msra.mxu0 %v339_v14  ;;  %v33_v28 = vld [vmem:[%s576_s1 + $0x50] sm:$0xff]  ;;  %v34_v29 = vld [vmem:[%s576_s1 + $0x58] sm:$0xff]  ;;  %v366_v30 = vpack.c.bf16 %v124_v26, %v123_v25  ;;  %v126_v32 = vld [vmem:[%s578_s3 + $0x48] sm:$0xff]  ;;  %p389_p1 = scmp.lt.s32.totalorder %s219_s12, %s219_s12 }
   0xd   :  { %341 = vmatprep.subr.bf16.mxu0 %v408_v3  ;;  %v348_v33 = vpack.c.bf16 %v34_v29, %v33_v28  ;;  %v35_v34 = vld [vmem:[%s576_s1 + $0x60] sm:$0xff]  ;;  %v36_v35 = vld [vmem:[%s576_s1 + $0x68] sm:$0xff]  ;;  %v369_v36 = vpack.c.bf16 %v126_v32, %v125_v31  ;;  %v127_v37 = vld [vmem:[%s578_s3 + $0x50] sm:$0xff] }
   0xe   :  { %364 = vmatpush3.bf16.msra.mxu1 %v363_v24  ;;  %v128_v38 = vld [vmem:[%s578_s3 + $0x58] sm:$0xff]  ;;  %v351_v39 = vpack.c.bf16 %v36_v35, %v35_v34  ;;  %v37_v40 = vld [vmem:[%s576_s1 + $0x70] sm:$0xff]  ;;  %v129_v43 = vld [vmem:[%s578_s3 + $0x60] sm:$0xff] }
   0xf   :  { %365 = vmatprep.subr.bf16.mxu1 %v408_v3  ;;  %v38_v41 = vld [vmem:[%s576_s1 + $0x78] sm:$0xff]  ;;  %v372_v42 = vpack.c.bf16 %v128_v38, %v127_v37  ;;  %v130_v44 = vld [vmem:[%s578_s3 + $0x68] sm:$0xff]  ;;  %v21_v46 = vld [vmem:[%s575_s0] sm:$0xf] }
  0x10   :  { %343 = vmatpush3.bf16.msra.mxu0 %v342_v21  ;;  %v354_v45 = vpack.c.bf16 %v38_v41, %v37_v40  ;;  %v375_v47 = vpack.c.bf16 %v130_v44, %v129_v43  ;;  %v22_v48 = vmax.f32 %v21_v46, 0.0  ;;  %v131_v49 = vld [vmem:[%s578_s3 + $0x70] sm:$0xff]  ;;  %v132_v50 = vld [vmem:[%s578_s3 + $0x78] sm:$0xff]  ;;  %v226_v52 = vld [vmem:[%s577_s2] ss:$0 sm:$0xff]  ;;  %s384_s3 = scalar_lea.vmem %s219_s12, 64 }
  0x11   :  { %344 = vmatprep.subr.bf16.mxu0 %v408_v3  ;;  %v378_v51 = vpack.c.bf16 %v132_v50, %v131_v49  ;;  %v227_v57 = vld [vmem:[%s579_s4] ss:$0 sm:$0xff]  ;;  %p385_p0 = scmp.ne.s32.totalorder %s219_s12, %s384_s3  ;;  %p390_p2 = scmp.lt.s32.totalorder %s384_s3, %s384_s3 }
  0x12   :  { %367 = vmatpush3.bf16.msra.mxu1 %v366_v30 }
  0x13   :  { %368 = vmatprep.subr.bf16.mxu1 %v408_v3  ;;  %p391_p3 = por %p390_p2, %p389_p1 }
  0x14   :  { %346 = vmatpush3.bf16.msra.mxu0 %v345_v27 }
  0x15   :  { %347 = vmatprep.subr.bf16.mxu0 %v408_v3  ;;  %p392_p4 = pnand %p391_p3, %p385_p0 }
  0x16   :  { %370 = vmatpush3.bf16.msra.mxu1 %v369_v36 }
  0x17   :  { %371 = vmatprep.subr.bf16.mxu1 %v408_v3 }
  0x18   :  { %349 = vmatpush3.bf16.msra.mxu0 %v348_v33 }
  0x19   :  { %350 = vmatprep.subr.bf16.mxu0 %v408_v3 }
  0x1a   :  { %373 = vmatpush3.bf16.msra.mxu1 %v372_v42 }
  0x1b   :  { %374 = vmatprep.subr.bf16.mxu1 %v408_v3 }
  0x1c   :  { %352 = vmatpush3.bf16.msra.mxu0 %v351_v39 }
  0x1d   :  { %353 = vmatprep.subr.bf16.mxu0 %v408_v3 }
  0x1e   :  { %376 = vmatpush3.bf16.msra.mxu1 %v375_v47 }
  0x1f   :  { %377 = vmatprep.subr.bf16.mxu1 %v408_v3 }
  0x20   :  { %355 = vmatpush3.bf16.msra.mxu0 %v354_v45 }
  0x22   :  { %379 = vmatpush3.bf16.msra.mxu1 %v378_v51 }
  0x23   :  { %295 = vmatmul.mubr.f32.vlgmr.msra.gmra.mrb[0].mxu0 %v22_v48 }
  0xf6   :  { %v112_v53 = vpop.f32.mrb[0].mxu0 }
  0xf7   :  { %v113_v54 = vadd.f32 %v226_v52, %v112_v53  ;;  %v296_v55 = vpop.f32.mrb[1].mxu0 }
  0xf9   :  { %v116_v56 = vmax.f32 %v113_v54, 0.0 }
  0xfb   :  { %330 = vmatmul.mubr.f32.vlgmr.msra.gmra.mrb[0].mxu1 %v116_v56 }
 0x1ce   :  { %v206_v58 = vpop.f32.mrb[0].mxu1 }
 0x1cf   :  { %v207_v59 = vadd.f32 %v227_v57, %v206_v58  ;;  %v331_v60 = vpop.f32.mrb[1].mxu1 }
 0x1d1   :  { %211 = vst.msk [vmem:[#allocation2] sm:$0xf] %vm210_vm1, %v207_v59 }
 0x1d2   :  { %395 = shalt.err (!%p392_p4)
}
 0x1d3   :  { %s396_s14 = scalar_lea.hbm %s580_s5, 64 }
 0x1d4   :  { %p397_p5 = scmp.ne.s32.totalorder %s580_s5, %s396_s14  ;;  %p400_p6 = scmp.lt.u32.totalorder %s396_s14, %s580_s5 }
 0x1d6   :  { %p402_p7 = pnand %p400_p6, %p397_p5 }
 0x1d8   :  { %405 = shalt.err (!%p402_p7)
}
 0x1d9   :  { %221 = dma.vmem_to_hbm [thread:$0]  %s219_s12, 64, %s580_s5, [#allocation3]  }
 0x1da   :  { %406 = dma.done.wait [#allocation3], 64  }
 0x1db   :  { %407 = vsyncadd [#allocation3], 4294967232 }
 0x1dc   :  { %225 = vsyncpa [#allocation3], 1 }

// kernel: lstm_forward.8
= control target key start
LH: loop header
LB: loop body
LE: loop exit
PB: predicated region body
PF: predicated region fallthrough
CT: control target
= control target key end

     0   :  { %v2229_v3 = vmov 0.0   ;;  %s2845_s1 = inlined_call_operand.vmem [shape: f32[128,512], index: 1, kind: input, shape index: {}]   ;;  %s2846_s0 = inlined_call_operand.vmem [shape: f32[8,2,512], index: 0, kind: input, shape index: {}]   ;;  %s2847_s2 = inlined_call_operand.vmem [shape: f32[2,128], index: 2, kind: output, shape index: {}]  }
   0x1   :  { %v18_v0 = vld [vmem:[%s2845_s1 + $0x8] sm:$0xff]  ;;  %v20_v2 = vld [vmem:[%s2845_s1 + $0x18] sm:$0xff]  ;;  %148 = vmatprep.mubr.f32.mxu0 %v2229_v3  ;;  %15 = vst [vmem:[#allocation2] sm:$0x3] %v2229_v3  ;;  %16 = vst [vmem:[#allocation3] sm:$0x3] %v2229_v3  ;;  %219 = vmatprep.mubr.f32.mxu1 %v2229_v3 }
   0x2   :  { %v22_v1 = vld [vmem:[%s2845_s1 + $0x28] sm:$0xff]  ;;  %v24_v5 = vld [vmem:[%s2845_s1 + $0x38] sm:$0xff]  ;;  %v17_v6 = vld [vmem:[%s2845_s1] sm:$0xff] }
   0x3   :  { %v2259_v4 = vpack.c.bf16 %v22_v1, %v18_v0  ;;  %v21_v7 = vld [vmem:[%s2845_s1 + $0x20] sm:$0xff]  ;;  %v2270_v8 = vpack.c.bf16 %v24_v5, %v20_v2  ;;  %v19_v10 = vld [vmem:[%s2845_s1 + $0x10] sm:$0xff]  ;;  %v26_v12 = vld [vmem:[%s2845_s1 + $0x48] sm:$0xff] }
   0x4   :  { %v2272_v9 = vpack.c.bf16 %v21_v7, %v17_v6  ;;  %v23_v11 = vld [vmem:[%s2845_s1 + $0x30] sm:$0xff]  ;;  %v30_v14 = vld [vmem:[%s2845_s1 + $0x68] sm:$0xff]  ;;  %v28_v15 = vld [vmem:[%s2845_s1 + $0x58] sm:$0xff] }
   0x5   :  { %1636 = vmatprep.subr.bf16.mxu0 %v2259_v4  ;;  %v2284_v13 = vpack.c.bf16 %v23_v11, %v19_v10  ;;  %v32_v16 = vld [vmem:[%s2845_s1 + $0x78] sm:$0xff]  ;;  %1668 = vmatprep.subr.bf16.mxu1 %v2270_v8  ;;  %v2297_v17 = vpack.c.bf16 %v30_v14, %v26_v12  ;;  %v25_v19 = vld [vmem:[%s2845_s1 + $0x40] sm:$0xff]  ;;  %v27_v21 = vld [vmem:[%s2845_s1 + $0x50] sm:$0xff] }
   0x6   :  { %1638 = vmatpush1.bf16.msra.mxu0 %v2272_v9  ;;  %v2299_v18 = vpack.c.bf16 %v32_v16, %v28_v15  ;;  %v29_v20 = vld [vmem:[%s2845_s1 + $0x60] sm:$0xff]  ;;  %v31_v23 = vld [vmem:[%s2845_s1 + $0x70] sm:$0xff]  ;;  %v34_v24 = vld [vmem:[%s2845_s1 + $0x88] sm:$0xff] }
   0x7   :  { %1670 = vmatpush1.bf16.msra.mxu1 %v2284_v13  ;;  %v2311_v22 = vpack.c.bf16 %v29_v20, %v25_v19  ;;  %v38_v25 = vld [vmem:[%s2845_s1 + $0xa8] sm:$0xff]  ;;  %1640 = vmatprep.subr.bf16.mxu0 %v2297_v17  ;;  %v2324_v26 = vpack.c.bf16 %v31_v23, %v27_v21  ;;  %v36_v28 = vld [vmem:[%s2845_s1 + $0x98] sm:$0xff]  ;;  %v33_v30 = vld [vmem:[%s2845_s1 + $0x80] sm:$0xff] }
   0x8   :  { %1672 = vmatprep.subr.bf16.mxu1 %v2299_v18  ;;  %v2326_v27 = vpack.c.bf16 %v38_v25, %v34_v24  ;;  %v40_v29 = vld [vmem:[%s2845_s1 + $0xb8] sm:$0xff]  ;;  %v37_v32 = vld [vmem:[%s2845_s1 + $0xa0] sm:$0xff]  ;;  %v35_v33 = vld [vmem:[%s2845_s1 + $0x90] sm:$0xff] }
   0x9   :  { %v2337_v31 = vpack.c.bf16 %v40_v29, %v36_v28  ;;  %v39_v34 = vld [vmem:[%s2845_s1 + $0xb0] sm:$0xff]  ;;  %v2349_v35 = vpack.c.bf16 %v37_v32, %v33_v30  ;;  %v42_v36 = vld [vmem:[%s2845_s1 + $0xc8] sm:$0xff]  ;;  %v44_v38 = vld [vmem:[%s2845_s1 + $0xd8] sm:$0xff] }
   0xa   :  { %1642 = vmatpush1.bf16.msra.mxu0 %v2311_v22  ;;  %v46_v37 = vld [vmem:[%s2845_s1 + $0xe8] sm:$0xff]  ;;  %v2362_v39 = vpack.c.bf16 %v39_v34, %v35_v33  ;;  %v48_v41 = vld [vmem:[%s2845_s1 + $0xf8] sm:$0xff]  ;;  %v41_v42 = vld [vmem:[%s2845_s1 + $0xc0] sm:$0xff] }
   0xb   :  { %1674 = vmatpush1.bf16.msra.mxu1 %v2324_v26  ;;  %1644 = vmatprep.subr.bf16.mxu0 %v2326_v27  ;;  %v2364_v40 = vpack.c.bf16 %v46_v37, %v42_v36  ;;  %v45_v43 = vld [vmem:[%s2845_s1 + $0xe0] sm:$0xff]  ;;  %v2376_v44 = vpack.c.bf16 %v48_v41, %v44_v38  ;;  %v43_v45 = vld [vmem:[%s2845_s1 + $0xd0] sm:$0xff]  ;;  %v50_v47 = vld [vmem:[%s2845_s1 + $0x108] sm:$0xff] }
   0xc   :  { %1676 = vmatprep.subr.bf16.mxu1 %v2337_v31  ;;  %v47_v46 = vld [vmem:[%s2845_s1 + $0xf0] sm:$0xff]  ;;  %v54_v48 = vld [vmem:[%s2845_s1 + $0x128] sm:$0xff]  ;;  %v52_v49 = vld [vmem:[%s2845_s1 + $0x118] sm:$0xff]  ;;  %v2397_v51 = vpack.c.bf16 %v45_v43, %v41_v42 }
   0xd   :  { %v56_v50 = vld [vmem:[%s2845_s1 + $0x138] sm:$0xff]  ;;  %v2401_v52 = vpack.c.bf16 %v47_v46, %v43_v45  ;;  %v2403_v53 = vpack.c.bf16 %v54_v48, %v50_v47  ;;  %v49_v54 = vld [vmem:[%s2845_s1 + $0x100] sm:$0xff]  ;;  %v51_v56 = vld [vmem:[%s2845_s1 + $0x110] sm:$0xff] }
   0xe   :  { %1646 = vmatpush1.bf16.msra.mxu0 %v2349_v35  ;;  %v53_v55 = vld [vmem:[%s2845_s1 + $0x120] sm:$0xff]  ;;  %v2415_v57 = vpack.c.bf16 %v56_v50, %v52_v49  ;;  %v55_v58 = vld [vmem:[%s2845_s1 + $0x130] sm:$0xff]  ;;  %v58_v59 = vld [vmem:[%s2845_s1 + $0x148] sm:$0xff]  ;;  %v2230_v49 = vmov 1983009808  }
   0xf   :  { %1678 = vmatpush1.bf16.msra.mxu1 %v2362_v39  ;;  %1648 = vmatprep.subr.bf16.mxu0 %v2364_v40  ;;  %v62_v60 = vld [vmem:[%s2845_s1 + $0x168] sm:$0xff]  ;;  %v60_v61 = vld [vmem:[%s2845_s1 + $0x158] sm:$0xff]  ;;  %v2433_v63 = vpack.c.bf16 %v53_v55, %v49_v54  ;;  %v2437_v0 = vpack.c.bf16 %v55_v58, %v51_v56  ;;  %v57_v2 = vld [vmem:[%s2845_s1 + $0x140] sm:$0xff]  ;;  %v233_v50 = vunpack.c.l.s4 %v2230_v49  ;;  %v235_v54 = vlaneseq }
  0x10   :  { %1680 = vmatprep.subr.bf16.mxu1 %v2376_v44  ;;  %v64_v62 = vld [vmem:[%s2845_s1 + $0x178] sm:$0xff]  ;;  %v2439_v1 = vpack.c.bf16 %v62_v60, %v58_v59  ;;  %v61_v5 = vld [vmem:[%s2845_s1 + $0x160] sm:$0xff]  ;;  %v59_v6 = vld [vmem:[%s2845_s1 + $0x150] sm:$0xff] }
  0x11   :  { %v2451_v7 = vpack.c.bf16 %v64_v62, %v60_v61  ;;  %v63_v10 = vld [vmem:[%s2845_s1 + $0x170] sm:$0xff]  ;;  %v66_v11 = vld [vmem:[%s2845_s1 + $0x188] sm:$0xff]  ;;  %v68_v14 = vld [vmem:[%s2845_s1 + $0x198] sm:$0xff]  ;;  %v2469_v16 = vpack.c.bf16 %v61_v5, %v57_v2  ;;  %v234_v55 = vunpack.c.0.s8 %v233_v50  ;;  %v236_v56 = vshrl.u32 %v235_v54, 7 }
  0x12   :  { %1650 = vmatpush1.bf16.msra.mxu0 %v2397_v51  ;;  %v70_v12 = vld [vmem:[%s2845_s1 + $0x1a8] sm:$0xff]  ;;  %v72_v15 = vld [vmem:[%s2845_s1 + $0x1b8] sm:$0xff]  ;;  %v2473_v19 = vpack.c.bf16 %v63_v10, %v59_v6  ;;  %v65_v21 = vld [vmem:[%s2845_s1 + $0x180] sm:$0xff] }
  0x13   :  { %1682 = vmatpush1.bf16.msra.mxu1 %v2401_v52  ;;  %1652 = vmatprep.subr.bf16.mxu0 %v2403_v53  ;;  %v2475_v20 = vpack.c.bf16 %v70_v12, %v66_v11  ;;  %v69_v23 = vld [vmem:[%s2845_s1 + $0x1a0] sm:$0xff]  ;;  %v67_v24 = vld [vmem:[%s2845_s1 + $0x190] sm:$0xff]  ;;  %v2487_v25 = vpack.c.bf16 %v72_v15, %v68_v14  ;;  %v74_v29 = vld [vmem:[%s2845_s1 + $0x1c8] sm:$0xff]  ;;  %v2574_v59 = vsub.s32 %v234_v55, %v236_v56 }
  0x14   :  { %1684 = vmatprep.subr.bf16.mxu1 %v2415_v57  ;;  %v71_v28 = vld [vmem:[%s2845_s1 + $0x1b0] sm:$0xff]  ;;  %v78_v30 = vld [vmem:[%s2845_s1 + $0x1e8] sm:$0xff]  ;;  %v76_v32 = vld [vmem:[%s2845_s1 + $0x1d8] sm:$0xff]  ;;  %v2505_v34 = vpack.c.bf16 %v69_v23, %v65_v21 }
  0x15   :  { %v80_v33 = vld [vmem:[%s2845_s1 + $0x1f8] sm:$0xff]  ;;  %v2509_v36 = vpack.c.bf16 %v71_v28, %v67_v24  ;;  %v2511_v37 = vpack.c.bf16 %v78_v30, %v74_v29  ;;  %v73_v38 = vld [vmem:[%s2845_s1 + $0x1c0] sm:$0xff]  ;;  %v75_v43 = vld [vmem:[%s2845_s1 + $0x1d0] sm:$0xff] }
  0x16   :  { %1654 = vmatpush1.bf16.msra.mxu0 %v2433_v63  ;;  %v77_v41 = vld [vmem:[%s2845_s1 + $0x1e0] sm:$0xff]  ;;  %v2520_v42 = vpack.c.bf16 %v80_v33, %v76_v32  ;;  %v79_v45 = vld [vmem:[%s2845_s1 + $0x1f0] sm:$0xff] }
  0x17   :  { %1686 = vmatpush1.bf16.msra.mxu1 %v2437_v0  ;;  %1656 = vmatprep.subr.bf16.mxu0 %v2439_v1  ;;  %v2529_v46 = vpack.c.bf16 %v77_v41, %v73_v38  ;;  %v2533_v47 = vpack.c.bf16 %v79_v45, %v75_v43  ;;  %v81_v48 = vld [vmem:[#allocation2] sm:$0x3]  ;;  %v82_v43 = vld [vmem:[#allocation3] sm:$0x3] }
  0x18   :  { %1688 = vmatprep.subr.bf16.mxu1 %v2451_v7  ;;  %v83_v11 = vld [vmem:[%s2846_s0] sm:$0xff] }
  0x1a   :  { %1658 = vmatpush1.bf16.msra.mxu0 %v2469_v16 }
  0x1b   :  { %1690 = vmatpush1.bf16.msra.mxu1 %v2473_v19  ;;  %1660 = vmatprep.subr.bf16.mxu0 %v2475_v20 }
  0x1c   :  { %1692 = vmatprep.subr.bf16.mxu1 %v2487_v25 }
  0x1e   :  { %1662 = vmatpush1.bf16.msra.mxu0 %v2505_v34 }
  0x1f   :  { %1694 = vmatpush1.bf16.msra.mxu1 %v2509_v36  ;;  %1664 = vmatprep.subr.bf16.mxu0 %v2511_v37 }
  0x20   :  { %1696 = vmatprep.subr.bf16.mxu1 %v2520_v42 }
  0x22   :  { %1666 = vmatpush1.bf16.msra.mxu0 %v2529_v46 }
  0x23   :  { %1698 = vmatpush1.bf16.msra.mxu1 %v2533_v47  ;;  %1700 = vmatprep.subr.bf16.mxu0 %v2259_v4 }
  0x24   :  { %1732 = vmatprep.subr.bf16.mxu1 %v2270_v8 }
  0x25   :  { %149 = vmatmul.mubr.f32.vlgmr.msra.gmra.mrb[0].mxu0 %v81_v48 }
  0x26   :  { %220 = vmatmul.mubr.f32.vlgmr.msra.gmra.mrb[0].mxu1 %v81_v48  ;;  %1702 = vmatpush1.bf16.msra.mxu0 %v2272_v9 }
  0x27   :  { %1734 = vmatpush1.bf16.msra.mxu1 %v2284_v13  ;;  %1704 = vmatprep.subr.bf16.mxu0 %v2297_v17 }
  0x28   :  { %1736 = vmatprep.subr.bf16.mxu1 %v2299_v18  ;;  %340 = vmatprep.mubr.f32.mxu0 %v2229_v3 }
  0x29   :  { %411 = vmatprep.mubr.f32.mxu1 %v2229_v3 }
  0x2a   :  { %1706 = vmatpush1.bf16.msra.mxu0 %v2311_v22 }
  0x2b   :  { %1738 = vmatpush1.bf16.msra.mxu1 %v2324_v26  ;;  %1708 = vmatprep.subr.bf16.mxu0 %v2326_v27 }
  0x2c   :  { %1740 = vmatprep.subr.bf16.mxu1 %v2337_v31 }
  0x2e   :  { %1710 = vmatpush1.bf16.msra.mxu0 %v2349_v35 }
  0x2f   :  { %1742 = vmatpush1.bf16.msra.mxu1 %v2362_v39  ;;  %1712 = vmatprep.subr.bf16.mxu0 %v2364_v40 }
  0x30   :  { %1744 = vmatprep.subr.bf16.mxu1 %v2376_v44 }
  0x32   :  { %1714 = vmatpush1.bf16.msra.mxu0 %v2397_v51 }
  0x33   :  { %1746 = vmatpush1.bf16.msra.mxu1 %v2401_v52  ;;  %1716 = vmatprep.subr.bf16.mxu0 %v2403_v53 }
  0x34   :  { %1748 = vmatprep.subr.bf16.mxu1 %v2415_v57 }
  0x36   :  { %1718 = vmatpush1.bf16.msra.mxu0 %v2433_v63 }
  0x37   :  { %1750 = vmatpush1.bf16.msra.mxu1 %v2437_v0  ;;  %1720 = vmatprep.subr.bf16.mxu0 %v2439_v1 }
  0x38   :  { %1752 = vmatprep.subr.bf16.mxu1 %v2451_v7 }
  0x3a   :  { %1722 = vmatpush1.bf16.msra.mxu0 %v2469_v16 }
  0x3b   :  { %1754 = vmatpush1.bf16.msra.mxu1 %v2473_v19  ;;  %1724 = vmatprep.subr.bf16.mxu0 %v2475_v20 }
  0x3c   :  { %1756 = vmatprep.subr.bf16.mxu1 %v2487_v25 }
  0x3e   :  { %1726 = vmatpush1.bf16.msra.mxu0 %v2505_v34 }
  0x3f   :  { %1758 = vmatpush1.bf16.msra.mxu1 %v2509_v36  ;;  %1728 = vmatprep.subr.bf16.mxu0 %v2511_v37 }
  0x40   :  { %1760 = vmatprep.subr.bf16.mxu1 %v2520_v42 }
  0x42   :  { %1730 = vmatpush1.bf16.msra.mxu0 %v2529_v46 }
  0x43   :  { %1762 = vmatpush1.bf16.msra.mxu1 %v2533_v47  ;;  %1764 = vmatprep.subr.bf16.mxu0 %v2259_v4 }
  0x44   :  { %1796 = vmatprep.subr.bf16.mxu1 %v2270_v8 }
  0xf8   :  { %v150_v58 = vpop.f32.mrb[0].mxu0 }
  0xf9   :  { %v221_v60 = vpop.f32.mrb[0].mxu1  ;;  %v152_v61 = vpop.f32.mrb[1].mxu0 }
  0xfa   :  { %v230_v62 = vcombine.low %v150_v58, %v152_v61  ;;  %v223_v2 = vpop.f32.mrb[1].mxu1 }
  0xfb   :  { %v231_v5 = vcombine.low %v221_v60, %v223_v2 }
  0xfc   :  { %v238_v6 = vrot.slane %v230_v62, %v2574_v59 }
  0xfd   :  { %v245_v10 = vrot.slane %v231_v5, %v2574_v59 }
  0xff   :  { %v246_v12 = vcombine.low %v238_v6, %v245_v10 }
 0x101   :  { %v248_v14 = vadd.f32 %v246_v12, %v83_v11 }
 0x103   :  { %v249_v15 = vmul.f32 0.5, %v248_v14  ;;  %v254_v21 = vrot.slane %v248_v14, 2  ;;  %v260_v24 = vrot.slane %v248_v14, 4  ;;  %v263_v28 = vrot.slane %v248_v14, 6 }
 0x105   :  { %2149 = vtanh.f32 %v249_v15  ;;  %v256_v23 = vmul.f32 0.5, %v254_v21  ;;  %v265_v29 = vmul.f32 0.5, %v263_v28  ;;  %v1628_v15 = vld [vmem:[%s2846_s0 + $0x8] sm:$0xff] }
 0x107   :  { %2151 = vtanh.f32 %v256_v23 }
 0x108   :  { %2153 = vtanh.f32 %v260_v24 }
 0x109   :  { %2155 = vtanh.f32 %v265_v29 }
 0x10f   :  { %v2150_v30 = vpop.eup %2149 }
 0x110   :  { %v251_v32 = vadd.f32 1.0, %v2150_v30 }
 0x111   :  { %v2152_v33 = vpop.eup %2151 }
 0x112   :  { %v252_v38 = vmul.f32 0.5, %v251_v32  ;;  %v258_v41 = vadd.f32 1.0, %v2152_v33  ;;  %v2154_v48 = vpop.eup %2153 }
 0x113   :  { %v2156_v55 = vpop.eup %2155 }
 0x114   :  { %v259_v45 = vmul.f32 0.5, %v258_v41  ;;  %v270_v50 = vmul.f32 %v2154_v48, %v252_v38  ;;  %v267_v56 = vadd.f32 1.0, %v2156_v55 }
 0x116   :  { %v269_v49 = vmul.f32 %v259_v45, %v82_v43  ;;  %v268_v58 = vmul.f32 0.5, %v267_v56 }
 0x118   :  { %v2581_v54 = vadd.f32 %v270_v50, %v269_v49 }
 0x11a   :  { %2157 = vtanh.f32 %v2581_v54 }
 0x124   :  { %v2158_v60 = vpop.eup %2157 }
 0x125   :  { %v273_v61 = vmul.f32 %v2158_v60, %v268_v58 }
 0x127   :  { %341 = vmatmul.mubr.f32.vlgmr.msra.gmra.mrb[2].mxu0 %v273_v61  ;;  %412 = vmatmul.mubr.f32.vlgmr.msra.gmra.mrb[2].mxu1 %v273_v61 }
 0x128   :  { %1766 = vmatpush1.bf16.msra.mxu0 %v2272_v9  ;;  %1798 = vmatpush1.bf16.msra.mxu1 %v2284_v13 }
 0x129   :  { %1768 = vmatprep.subr.bf16.mxu0 %v2297_v17  ;;  %1800 = vmatprep.subr.bf16.mxu1 %v2299_v18 }
 0x12a   :  { %532 = vmatprep.mubr.f32.mxu0 %v2229_v3  ;;  %603 = vmatprep.mubr.f32.mxu1 %v2229_v3 }
 0x12c   :  { %1770 = vmatpush1.bf16.msra.mxu0 %v2311_v22  ;;  %1802 = vmatpush1.bf16.msra.mxu1 %v2324_v26 }
 0x12d   :  { %1772 = vmatprep.subr.bf16.mxu0 %v2326_v27  ;;  %1804 = vmatprep.subr.bf16.mxu1 %v2337_v31 }
 0x130   :  { %1774 = vmatpush1.bf16.msra.mxu0 %v2349_v35  ;;  %1806 = vmatpush1.bf16.msra.mxu1 %v2362_v39 }
 0x131   :  { %1776 = vmatprep.subr.bf16.mxu0 %v2364_v40  ;;  %1808 = vmatprep.subr.bf16.mxu1 %v2376_v44 }
 0x134   :  { %1778 = vmatpush1.bf16.msra.mxu0 %v2397_v51  ;;  %1810 = vmatpush1.bf16.msra.mxu1 %v2401_v52 }
 0x135   :  { %1780 = vmatprep.subr.bf16.mxu0 %v2403_v53  ;;  %1812 = vmatprep.subr.bf16.mxu1 %v2415_v57 }
 0x138   :  { %1782 = vmatpush1.bf16.msra.mxu0 %v2433_v63  ;;  %1814 = vmatpush1.bf16.msra.mxu1 %v2437_v0 }
 0x139   :  { %1784 = vmatprep.subr.bf16.mxu0 %v2439_v1  ;;  %1816 = vmatprep.subr.bf16.mxu1 %v2451_v7 }
 0x13c   :  { %1786 = vmatpush1.bf16.msra.mxu0 %v2469_v16  ;;  %1818 = vmatpush1.bf16.msra.mxu1 %v2473_v19 }
 0x13d   :  { %1788 = vmatprep.subr.bf16.mxu0 %v2475_v20  ;;  %1820 = vmatprep.subr.bf16.mxu1 %v2487_v25 }
 0x140   :  { %1790 = vmatpush1.bf16.msra.mxu0 %v2505_v34  ;;  %1822 = vmatpush1.bf16.msra.mxu1 %v2509_v36 }
 0x141   :  { %1792 = vmatprep.subr.bf16.mxu0 %v2511_v37  ;;  %1824 = vmatprep.subr.bf16.mxu1 %v2520_v42 }
 0x144   :  { %1794 = vmatpush1.bf16.msra.mxu0 %v2529_v46  ;;  %1826 = vmatpush1.bf16.msra.mxu1 %v2533_v47 }
 0x145   :  { %1828 = vmatprep.subr.bf16.mxu0 %v2259_v4  ;;  %1860 = vmatprep.subr.bf16.mxu1 %v2270_v8 }
 0x1fa   :  { %v342_v62 = vpop.f32.mrb[2].mxu0  ;;  %v413_v2 = vpop.f32.mrb[2].mxu1 }
 0x1fb   :  { %v344_v5 = vpop.f32.mrb[3].mxu0  ;;  %v415_v6 = vpop.f32.mrb[3].mxu1 }
 0x1fc   :  { %v422_v10 = vcombine.low %v342_v62, %v344_v5  ;;  %v423_v11 = vcombine.low %v413_v2, %v415_v6 }
 0x1fe   :  { %v430_v12 = vrot.slane %v422_v10, %v2574_v59  ;;  %v437_v14 = vrot.slane %v423_v11, %v2574_v59 }
 0x200   :  { %v438_v21 = vcombine.low %v430_v12, %v437_v14 }
 0x202   :  { %v440_v23 = vadd.f32 %v1628_v15, %v438_v21 }
 0x204   :  { %v441_v24 = vmul.f32 0.5, %v440_v23  ;;  %v446_v28 = vrot.slane %v440_v23, 2  ;;  %v452_v30 = vrot.slane %v440_v23, 4  ;;  %v455_v32 = vrot.slane %v440_v23, 6  ;;  %v1629_v23 = vld [vmem:[%s2846_s0 + $0x10] sm:$0xff] }
 0x206   :  { %2159 = vtanh.f32 %v441_v24  ;;  %v448_v29 = vmul.f32 0.5, %v446_v28  ;;  %v457_v33 = vmul.f32 0.5, %v455_v32 }
 0x208   :  { %2161 = vtanh.f32 %v448_v29 }
 0x209   :  { %2163 = vtanh.f32 %v452_v30 }
 0x20a   :  { %2165 = vtanh.f32 %v457_v33 }
 0x210   :  { %v2160_v38 = vpop.eup %2159 }
 0x211   :  { %v443_v41 = vadd.f32 1.0, %v2160_v38 }
 0x212   :  { %v2162_v43 = vpop.eup %2161 }
 0x213   :  { %v444_v45 = vmul.f32 0.5, %v443_v41  ;;  %v450_v48 = vadd.f32 1.0, %v2162_v43  ;;  %v2164_v50 = vpop.eup %2163 }
 0x214   :  { %v2166_v60 = vpop.eup %2165 }
 0x215   :  { %v451_v49 = vmul.f32 0.5, %v450_v48  ;;  %v462_v56 = vmul.f32 %v2164_v50, %v444_v45  ;;  %v459_v61 = vadd.f32 1.0, %v2166_v60 }
 0x217   :  { %v461_v55 = vmul.f32 %v451_v49, %v2581_v54  ;;  %v460_v62 = vmul.f32 0.5, %v459_v61 }
 0x219   :  { %v2624_v58 = vadd.f32 %v462_v56, %v461_v55 }
 0x21b   :  { %2167 = vtanh.f32 %v2624_v58 }
 0x225   :  { %v2168_v2 = vpop.eup %2167 }
 0x226   :  { %v465_v5 = vmul.f32 %v2168_v2, %v460_v62 }
 0x228   :  { %533 = vmatmul.mubr.f32.vlgmr.msra.gmra.mrb[4].mxu0 %v465_v5  ;;  %604 = vmatmul.mubr.f32.vlgmr.msra.gmra.mrb[4].mxu1 %v465_v5 }
 0x229   :  { %1830 = vmatpush1.bf16.msra.mxu0 %v2272_v9  ;;  %1862 = vmatpush1.bf16.msra.mxu1 %v2284_v13 }
 0x22a   :  { %1832 = vmatprep.subr.bf16.mxu0 %v2297_v17  ;;  %1864 = vmatprep.subr.bf16.mxu1 %v2299_v18 }
 0x22b   :  { %724 = vmatprep.mubr.f32.mxu0 %v2229_v3  ;;  %795 = vmatprep.mubr.f32.mxu1 %v2229_v3 }
 0x22d   :  { %1834 = vmatpush1.bf16.msra.mxu0 %v2311_v22  ;;  %1866 = vmatpush1.bf16.msra.mxu1 %v2324_v26 }
 0x22e   :  { %1836 = vmatprep.subr.bf16.mxu0 %v2326_v27  ;;  %1868 = vmatprep.subr.bf16.mxu1 %v2337_v31 }
 0x231   :  { %1838 = vmatpush1.bf16.msra.mxu0 %v2349_v35  ;;  %1870 = vmatpush1.bf16.msra.mxu1 %v2362_v39 }
 0x232   :  { %1840 = vmatprep.subr.bf16.mxu0 %v2364_v40  ;;  %1872 = vmatprep.subr.bf16.mxu1 %v2376_v44 }
 0x235   :  { %1842 = vmatpush1.bf16.msra.mxu0 %v2397_v51  ;;  %1874 = vmatpush1.bf16.msra.mxu1 %v2401_v52 }
 0x236   :  { %1844 = vmatprep.subr.bf16.mxu0 %v2403_v53  ;;  %1876 = vmatprep.subr.bf16.mxu1 %v2415_v57 }
 0x239   :  { %1846 = vmatpush1.bf16.msra.mxu0 %v2433_v63  ;;  %1878 = vmatpush1.bf16.msra.mxu1 %v2437_v0 }
 0x23a   :  { %1848 = vmatprep.subr.bf16.mxu0 %v2439_v1  ;;  %1880 = vmatprep.subr.bf16.mxu1 %v2451_v7 }
 0x23d   :  { %1850 = vmatpush1.bf16.msra.mxu0 %v2469_v16  ;;  %1882 = vmatpush1.bf16.msra.mxu1 %v2473_v19 }
 0x23e   :  { %1852 = vmatprep.subr.bf16.mxu0 %v2475_v20  ;;  %1884 = vmatprep.subr.bf16.mxu1 %v2487_v25 }
 0x241   :  { %1854 = vmatpush1.bf16.msra.mxu0 %v2505_v34  ;;  %1886 = vmatpush1.bf16.msra.mxu1 %v2509_v36 }
 0x242   :  { %1856 = vmatprep.subr.bf16.mxu0 %v2511_v37  ;;  %1888 = vmatprep.subr.bf16.mxu1 %v2520_v42 }
 0x245   :  { %1858 = vmatpush1.bf16.msra.mxu0 %v2529_v46  ;;  %1890 = vmatpush1.bf16.msra.mxu1 %v2533_v47 }
 0x246   :  { %1892 = vmatprep.subr.bf16.mxu0 %v2259_v4  ;;  %1924 = vmatprep.subr.bf16.mxu1 %v2270_v8 }
 0x2fb   :  { %v534_v54 = vpop.f32.mrb[4].mxu0  ;;  %v605_v6 = vpop.f32.mrb[4].mxu1 }
 0x2fc   :  { %v536_v10 = vpop.f32.mrb[5].mxu0  ;;  %v607_v11 = vpop.f32.mrb[5].mxu1 }
 0x2fd   :  { %v614_v12 = vcombine.low %v534_v54, %v536_v10  ;;  %v615_v14 = vcombine.low %v605_v6, %v607_v11 }
 0x2ff   :  { %v622_v15 = vrot.slane %v614_v12, %v2574_v59  ;;  %v629_v21 = vrot.slane %v615_v14, %v2574_v59 }
 0x301   :  { %v630_v24 = vcombine.low %v622_v15, %v629_v21 }
 0x303   :  { %v632_v28 = vadd.f32 %v1629_v23, %v630_v24 }
 0x305   :  { %v633_v29 = vmul.f32 0.5, %v632_v28  ;;  %v638_v30 = vrot.slane %v632_v28, 2  ;;  %v644_v33 = vrot.slane %v632_v28, 4  ;;  %v647_v38 = vrot.slane %v632_v28, 6  ;;  %v1630_v28 = vld [vmem:[%s2846_s0 + $0x18] sm:$0xff] }
 0x307   :  { %2169 = vtanh.f32 %v633_v29  ;;  %v640_v32 = vmul.f32 0.5, %v638_v30  ;;  %v649_v41 = vmul.f32 0.5, %v647_v38 }
 0x309   :  { %2171 = vtanh.f32 %v640_v32 }
 0x30a   :  { %2173 = vtanh.f32 %v644_v33 }
 0x30b   :  { %2175 = vtanh.f32 %v649_v41 }
 0x311   :  { %v2170_v43 = vpop.eup %2169 }
 0x312   :  { %v635_v45 = vadd.f32 1.0, %v2170_v43 }
 0x313   :  { %v2172_v48 = vpop.eup %2171 }
 0x314   :  { %v636_v49 = vmul.f32 0.5, %v635_v45  ;;  %v642_v50 = vadd.f32 1.0, %v2172_v48  ;;  %v2174_v56 = vpop.eup %2173 }
 0x315   :  { %v2176_v2 = vpop.eup %2175 }
 0x316   :  { %v643_v55 = vmul.f32 0.5, %v642_v50  ;;  %v654_v61 = vmul.f32 %v2174_v56, %v636_v49  ;;  %v651_v5 = vadd.f32 1.0, %v2176_v2 }
 0x318   :  { %v653_v60 = vmul.f32 %v643_v55, %v2624_v58  ;;  %v652_v54 = vmul.f32 0.5, %v651_v5 }
 0x31a   :  { %v2667_v62 = vadd.f32 %v654_v61, %v653_v60 }
 0x31c   :  { %2177 = vtanh.f32 %v2667_v62 }
 0x326   :  { %v2178_v6 = vpop.eup %2177 }
 0x327   :  { %v657_v10 = vmul.f32 %v2178_v6, %v652_v54 }
 0x329   :  { %725 = vmatmul.mubr.f32.vlgmr.msra.gmra.mrb[6].mxu0 %v657_v10  ;;  %796 = vmatmul.mubr.f32.vlgmr.msra.gmra.mrb[6].mxu1 %v657_v10 }
 0x32a   :  { %1894 = vmatpush1.bf16.msra.mxu0 %v2272_v9  ;;  %1926 = vmatpush1.bf16.msra.mxu1 %v2284_v13 }
 0x32b   :  { %1896 = vmatprep.subr.bf16.mxu0 %v2297_v17  ;;  %1928 = vmatprep.subr.bf16.mxu1 %v2299_v18 }
 0x32c   :  { %916 = vmatprep.mubr.f32.mxu0 %v2229_v3  ;;  %987 = vmatprep.mubr.f32.mxu1 %v2229_v3 }
 0x32e   :  { %1898 = vmatpush1.bf16.msra.mxu0 %v2311_v22  ;;  %1930 = vmatpush1.bf16.msra.mxu1 %v2324_v26 }
 0x32f   :  { %1900 = vmatprep.subr.bf16.mxu0 %v2326_v27  ;;  %1932 = vmatprep.subr.bf16.mxu1 %v2337_v31 }
 0x332   :  { %1902 = vmatpush1.bf16.msra.mxu0 %v2349_v35  ;;  %1934 = vmatpush1.bf16.msra.mxu1 %v2362_v39 }
 0x333   :  { %1904 = vmatprep.subr.bf16.mxu0 %v2364_v40  ;;  %1936 = vmatprep.subr.bf16.mxu1 %v2376_v44 }
 0x336   :  { %1906 = vmatpush1.bf16.msra.mxu0 %v2397_v51  ;;  %1938 = vmatpush1.bf16.msra.mxu1 %v2401_v52 }
 0x337   :  { %1908 = vmatprep.subr.bf16.mxu0 %v2403_v53  ;;  %1940 = vmatprep.subr.bf16.mxu1 %v2415_v57 }
 0x33a   :  { %1910 = vmatpush1.bf16.msra.mxu0 %v2433_v63  ;;  %1942 = vmatpush1.bf16.msra.mxu1 %v2437_v0 }
 0x33b   :  { %1912 = vmatprep.subr.bf16.mxu0 %v2439_v1  ;;  %1944 = vmatprep.subr.bf16.mxu1 %v2451_v7 }
 0x33e   :  { %1914 = vmatpush1.bf16.msra.mxu0 %v2469_v16  ;;  %1946 = vmatpush1.bf16.msra.mxu1 %v2473_v19 }
 0x33f   :  { %1916 = vmatprep.subr.bf16.mxu0 %v2475_v20  ;;  %1948 = vmatprep.subr.bf16.mxu1 %v2487_v25 }
 0x342   :  { %1918 = vmatpush1.bf16.msra.mxu0 %v2505_v34  ;;  %1950 = vmatpush1.bf16.msra.mxu1 %v2509_v36 }
 0x343   :  { %1920 = vmatprep.subr.bf16.mxu0 %v2511_v37  ;;  %1952 = vmatprep.subr.bf16.mxu1 %v2520_v42 }
 0x346   :  { %1922 = vmatpush1.bf16.msra.mxu0 %v2529_v46  ;;  %1954 = vmatpush1.bf16.msra.mxu1 %v2533_v47 }
 0x347   :  { %1956 = vmatprep.subr.bf16.mxu0 %v2259_v4  ;;  %1988 = vmatprep.subr.bf16.mxu1 %v2270_v8 }
 0x3fc   :  { %v726_v58 = vpop.f32.mrb[6].mxu0  ;;  %v797_v11 = vpop.f32.mrb[6].mxu1 }
 0x3fd   :  { %v728_v12 = vpop.f32.mrb[7].mxu0  ;;  %v799_v14 = vpop.f32.mrb[7].mxu1 }
 0x3fe   :  { %v806_v15 = vcombine.low %v726_v58, %v728_v12  ;;  %v807_v21 = vcombine.low %v797_v11, %v799_v14 }
 0x400   :  { %v814_v23 = vrot.slane %v806_v15, %v2574_v59  ;;  %v821_v24 = vrot.slane %v807_v21, %v2574_v59 }
 0x402   :  { %v822_v29 = vcombine.low %v814_v23, %v821_v24 }
 0x404   :  { %v824_v30 = vadd.f32 %v1630_v28, %v822_v29 }
 0x406   :  { %v825_v32 = vmul.f32 0.5, %v824_v30  ;;  %v830_v33 = vrot.slane %v824_v30, 2  ;;  %v836_v41 = vrot.slane %v824_v30, 4  ;;  %v839_v43 = vrot.slane %v824_v30, 6  ;;  %v1631_v30 = vld [vmem:[%s2846_s0 + $0x20] sm:$0xff] }
 0x408   :  { %2179 = vtanh.f32 %v825_v32  ;;  %v832_v38 = vmul.f32 0.5, %v830_v33  ;;  %v841_v45 = vmul.f32 0.5, %v839_v43 }
 0x40a   :  { %2181 = vtanh.f32 %v832_v38 }
 0x40b   :  { %2183 = vtanh.f32 %v836_v41 }
 0x40c   :  { %2185 = vtanh.f32 %v841_v45 }
 0x412   :  { %v2180_v48 = vpop.eup %2179 }
 0x413   :  { %v827_v49 = vadd.f32 1.0, %v2180_v48 }
 0x414   :  { %v2182_v50 = vpop.eup %2181 }
 0x415   :  { %v828_v55 = vmul.f32 0.5, %v827_v49  ;;  %v834_v56 = vadd.f32 1.0, %v2182_v50  ;;  %v2184_v61 = vpop.eup %2183 }
 0x416   :  { %v2186_v6 = vpop.eup %2185 }
 0x417   :  { %v835_v60 = vmul.f32 0.5, %v834_v56  ;;  %v846_v5 = vmul.f32 %v2184_v61, %v828_v55  ;;  %v843_v10 = vadd.f32 1.0, %v2186_v6 }
 0x419   :  { %v845_v2 = vmul.f32 %v835_v60, %v2667_v62  ;;  %v844_v58 = vmul.f32 0.5, %v843_v10 }
 0x41b   :  { %v2710_v54 = vadd.f32 %v846_v5, %v845_v2 }
 0x41d   :  { %2187 = vtanh.f32 %v2710_v54 }
 0x427   :  { %v2188_v11 = vpop.eup %2187 }
 0x428   :  { %v849_v12 = vmul.f32 %v2188_v11, %v844_v58 }
 0x42a   :  { %917 = vmatmul.mubr.f32.vlgmr.msra.gmra.mrb[8].mxu0 %v849_v12  ;;  %988 = vmatmul.mubr.f32.vlgmr.msra.gmra.mrb[8].mxu1 %v849_v12 }
 0x42b   :  { %1958 = vmatpush1.bf16.msra.mxu0 %v2272_v9  ;;  %1990 = vmatpush1.bf16.msra.mxu1 %v2284_v13 }
 0x42c   :  { %1960 = vmatprep.subr.bf16.mxu0 %v2297_v17  ;;  %1992 = vmatprep.subr.bf16.mxu1 %v2299_v18 }
 0x42d   :  { %1108 = vmatprep.mubr.f32.mxu0 %v2229_v3  ;;  %1179 = vmatprep.mubr.f32.mxu1 %v2229_v3 }
 0x42f   :  { %1962 = vmatpush1.bf16.msra.mxu0 %v2311_v22  ;;  %1994 = vmatpush1.bf16.msra.mxu1 %v2324_v26 }
 0x430   :  { %1964 = vmatprep.subr.bf16.mxu0 %v2326_v27  ;;  %1996 = vmatprep.subr.bf16.mxu1 %v2337_v31 }
 0x433   :  { %1966 = vmatpush1.bf16.msra.mxu0 %v2349_v35  ;;  %1998 = vmatpush1.bf16.msra.mxu1 %v2362_v39 }
 0x434   :  { %1968 = vmatprep.subr.bf16.mxu0 %v2364_v40  ;;  %2000 = vmatprep.subr.bf16.mxu1 %v2376_v44 }
 0x437   :  { %1970 = vmatpush1.bf16.msra.mxu0 %v2397_v51  ;;  %2002 = vmatpush1.bf16.msra.mxu1 %v2401_v52 }
 0x438   :  { %1972 = vmatprep.subr.bf16.mxu0 %v2403_v53  ;;  %2004 = vmatprep.subr.bf16.mxu1 %v2415_v57 }
 0x43b   :  { %1974 = vmatpush1.bf16.msra.mxu0 %v2433_v63  ;;  %2006 = vmatpush1.bf16.msra.mxu1 %v2437_v0 }
 0x43c   :  { %1976 = vmatprep.subr.bf16.mxu0 %v2439_v1  ;;  %2008 = vmatprep.subr.bf16.mxu1 %v2451_v7 }
 0x43f   :  { %1978 = vmatpush1.bf16.msra.mxu0 %v2469_v16  ;;  %2010 = vmatpush1.bf16.msra.mxu1 %v2473_v19 }
 0x440   :  { %1980 = vmatprep.subr.bf16.mxu0 %v2475_v20  ;;  %2012 = vmatprep.subr.bf16.mxu1 %v2487_v25 }
 0x443   :  { %1982 = vmatpush1.bf16.msra.mxu0 %v2505_v34  ;;  %2014 = vmatpush1.bf16.msra.mxu1 %v2509_v36 }
 0x444   :  { %1984 = vmatprep.subr.bf16.mxu0 %v2511_v37  ;;  %2016 = vmatprep.subr.bf16.mxu1 %v2520_v42 }
 0x447   :  { %1986 = vmatpush1.bf16.msra.mxu0 %v2529_v46  ;;  %2018 = vmatpush1.bf16.msra.mxu1 %v2533_v47 }
 0x448   :  { %2020 = vmatprep.subr.bf16.mxu0 %v2259_v4  ;;  %2052 = vmatprep.subr.bf16.mxu1 %v2270_v8 }
 0x4fd   :  { %v918_v62 = vpop.f32.mrb[8].mxu0  ;;  %v989_v14 = vpop.f32.mrb[8].mxu1 }
 0x4fe   :  { %v920_v15 = vpop.f32.mrb[9].mxu0  ;;  %v991_v21 = vpop.f32.mrb[9].mxu1 }
 0x4ff   :  { %v998_v23 = vcombine.low %v918_v62, %v920_v15  ;;  %v999_v24 = vcombine.low %v989_v14, %v991_v21 }
 0x501   :  { %v1006_v28 = vrot.slane %v998_v23, %v2574_v59  ;;  %v1013_v29 = vrot.slane %v999_v24, %v2574_v59 }
 0x503   :  { %v1014_v32 = vcombine.low %v1006_v28, %v1013_v29 }
 0x505   :  { %v1016_v33 = vadd.f32 %v1631_v30, %v1014_v32 }
 0x507   :  { %v1017_v38 = vmul.f32 0.5, %v1016_v33  ;;  %v1022_v41 = vrot.slane %v1016_v33, 2  ;;  %v1028_v45 = vrot.slane %v1016_v33, 4  ;;  %v1031_v48 = vrot.slane %v1016_v33, 6  ;;  %v1632_v33 = vld [vmem:[%s2846_s0 + $0x28] sm:$0xff] }
 0x509   :  { %2189 = vtanh.f32 %v1017_v38  ;;  %v1024_v43 = vmul.f32 0.5, %v1022_v41  ;;  %v1033_v49 = vmul.f32 0.5, %v1031_v48 }
 0x50b   :  { %2191 = vtanh.f32 %v1024_v43 }
 0x50c   :  { %2193 = vtanh.f32 %v1028_v45 }
 0x50d   :  { %2195 = vtanh.f32 %v1033_v49 }
 0x513   :  { %v2190_v50 = vpop.eup %2189 }
 0x514   :  { %v1019_v55 = vadd.f32 1.0, %v2190_v50 }
 0x515   :  { %v2192_v56 = vpop.eup %2191 }
 0x516   :  { %v1020_v60 = vmul.f32 0.5, %v1019_v55  ;;  %v1026_v61 = vadd.f32 1.0, %v2192_v56  ;;  %v2194_v5 = vpop.eup %2193 }
 0x517   :  { %v2196_v11 = vpop.eup %2195 }
 0x518   :  { %v1027_v2 = vmul.f32 0.5, %v1026_v61  ;;  %v1038_v10 = vmul.f32 %v2194_v5, %v1020_v60  ;;  %v1035_v12 = vadd.f32 1.0, %v2196_v11 }
 0x51a   :  { %v1037_v6 = vmul.f32 %v1027_v2, %v2710_v54  ;;  %v1036_v62 = vmul.f32 0.5, %v1035_v12 }
 0x51c   :  { %v2753_v58 = vadd.f32 %v1038_v10, %v1037_v6 }
 0x51e   :  { %2197 = vtanh.f32 %v2753_v58 }
 0x528   :  { %v2198_v14 = vpop.eup %2197 }
 0x529   :  { %v1041_v15 = vmul.f32 %v2198_v14, %v1036_v62 }
 0x52b   :  { %1109 = vmatmul.mubr.f32.vlgmr.msra.gmra.mrb[10].mxu0 %v1041_v15  ;;  %1180 = vmatmul.mubr.f32.vlgmr.msra.gmra.mrb[10].mxu1 %v1041_v15 }
 0x52c   :  { %2022 = vmatpush1.bf16.msra.mxu0 %v2272_v9  ;;  %2054 = vmatpush1.bf16.msra.mxu1 %v2284_v13 }
 0x52d   :  { %2024 = vmatprep.subr.bf16.mxu0 %v2297_v17  ;;  %2056 = vmatprep.subr.bf16.mxu1 %v2299_v18 }
 0x52e   :  { %1300 = vmatprep.mubr.f32.mxu0 %v2229_v3  ;;  %1371 = vmatprep.mubr.f32.mxu1 %v2229_v3 }
 0x530   :  { %2026 = vmatpush1.bf16.msra.mxu0 %v2311_v22  ;;  %2058 = vmatpush1.bf16.msra.mxu1 %v2324_v26 }
 0x531   :  { %2028 = vmatprep.subr.bf16.mxu0 %v2326_v27  ;;  %2060 = vmatprep.subr.bf16.mxu1 %v2337_v31 }
 0x534   :  { %2030 = vmatpush1.bf16.msra.mxu0 %v2349_v35  ;;  %2062 = vmatpush1.bf16.msra.mxu1 %v2362_v39 }
 0x535   :  { %2032 = vmatprep.subr.bf16.mxu0 %v2364_v40  ;;  %2064 = vmatprep.subr.bf16.mxu1 %v2376_v44 }
 0x538   :  { %2034 = vmatpush1.bf16.msra.mxu0 %v2397_v51  ;;  %2066 = vmatpush1.bf16.msra.mxu1 %v2401_v52 }
 0x539   :  { %2036 = vmatprep.subr.bf16.mxu0 %v2403_v53  ;;  %2068 = vmatprep.subr.bf16.mxu1 %v2415_v57 }
 0x53c   :  { %2038 = vmatpush1.bf16.msra.mxu0 %v2433_v63  ;;  %2070 = vmatpush1.bf16.msra.mxu1 %v2437_v0 }
 0x53d   :  { %2040 = vmatprep.subr.bf16.mxu0 %v2439_v1  ;;  %2072 = vmatprep.subr.bf16.mxu1 %v2451_v7 }
 0x540   :  { %2042 = vmatpush1.bf16.msra.mxu0 %v2469_v16  ;;  %2074 = vmatpush1.bf16.msra.mxu1 %v2473_v19 }
 0x541   :  { %2044 = vmatprep.subr.bf16.mxu0 %v2475_v20  ;;  %2076 = vmatprep.subr.bf16.mxu1 %v2487_v25 }
 0x544   :  { %2046 = vmatpush1.bf16.msra.mxu0 %v2505_v34  ;;  %2078 = vmatpush1.bf16.msra.mxu1 %v2509_v36 }
 0x545   :  { %2048 = vmatprep.subr.bf16.mxu0 %v2511_v37  ;;  %2080 = vmatprep.subr.bf16.mxu1 %v2520_v42 }
 0x548   :  { %2050 = vmatpush1.bf16.msra.mxu0 %v2529_v46  ;;  %2082 = vmatpush1.bf16.msra.mxu1 %v2533_v47 }
 0x549   :  { %2084 = vmatprep.subr.bf16.mxu0 %v2259_v4  ;;  %2116 = vmatprep.subr.bf16.mxu1 %v2270_v8 }
 0x5fe   :  { %v1110_v54 = vpop.f32.mrb[10].mxu0  ;;  %v1181_v21 = vpop.f32.mrb[10].mxu1 }
 0x5ff   :  { %v1112_v23 = vpop.f32.mrb[11].mxu0  ;;  %v1183_v24 = vpop.f32.mrb[11].mxu1 }
 0x600   :  { %v1190_v28 = vcombine.low %v1110_v54, %v1112_v23  ;;  %v1191_v29 = vcombine.low %v1181_v21, %v1183_v24 }
 0x602   :  { %v1198_v30 = vrot.slane %v1190_v28, %v2574_v59  ;;  %v1205_v32 = vrot.slane %v1191_v29, %v2574_v59 }
 0x604   :  { %v1206_v38 = vcombine.low %v1198_v30, %v1205_v32 }
 0x606   :  { %v1208_v41 = vadd.f32 %v1632_v33, %v1206_v38  ;;  %v1634_v38 = vld [vmem:[%s2846_s0 + $0x38] sm:$0xff] }
 0x608   :  { %v1209_v43 = vmul.f32 0.5, %v1208_v41  ;;  %v1214_v4 = vrot.slane %v1208_v41, 2  ;;  %v1220_v45 = vrot.slane %v1208_v41, 4  ;;  %v1223_v48 = vrot.slane %v1208_v41, 6 }
 0x60a   :  { %2199 = vtanh.f32 %v1209_v43  ;;  %v1216_v8 = vmul.f32 0.5, %v1214_v4  ;;  %v1225_v49 = vmul.f32 0.5, %v1223_v48 }
 0x60c   :  { %2201 = vtanh.f32 %v1216_v8 }
 0x60d   :  { %2203 = vtanh.f32 %v1220_v45 }
 0x60e   :  { %2205 = vtanh.f32 %v1225_v49 }
 0x614   :  { %v2200_v50 = vpop.eup %2199 }
 0x615   :  { %v1211_v55 = vadd.f32 1.0, %v2200_v50 }
 0x616   :  { %v2202_v56 = vpop.eup %2201 }
 0x617   :  { %v1212_v60 = vmul.f32 0.5, %v1211_v55  ;;  %v1218_v61 = vadd.f32 1.0, %v2202_v56  ;;  %v2204_v5 = vpop.eup %2203 }
 0x618   :  { %v2206_v12 = vpop.eup %2205 }
 0x619   :  { %v1219_v2 = vmul.f32 0.5, %v1218_v61  ;;  %v1230_v10 = vmul.f32 %v2204_v5, %v1212_v60  ;;  %v1227_v62 = vadd.f32 1.0, %v2206_v12 }
 0x61b   :  { %v1229_v6 = vmul.f32 %v1219_v2, %v2753_v58  ;;  %v1228_v14 = vmul.f32 0.5, %v1227_v62 }
 0x61d   :  { %v2796_v11 = vadd.f32 %v1230_v10, %v1229_v6 }
 0x61f   :  { %2207 = vtanh.f32 %v2796_v11 }
 0x629   :  { %v2208_v15 = vpop.eup %2207 }
 0x62a   :  { %v1233_v54 = vmul.f32 %v2208_v15, %v1228_v14 }
 0x62c   :  { %1301 = vmatmul.mubr.f32.vlgmr.msra.gmra.mrb[12].mxu0 %v1233_v54  ;;  %1372 = vmatmul.mubr.f32.vlgmr.msra.gmra.mrb[12].mxu1 %v1233_v54 }
 0x62d   :  { %2086 = vmatpush1.bf16.msra.mxu0 %v2272_v9  ;;  %2118 = vmatpush1.bf16.msra.mxu1 %v2284_v13 }
 0x62e   :  { %2088 = vmatprep.subr.bf16.mxu0 %v2297_v17  ;;  %2120 = vmatprep.subr.bf16.mxu1 %v2299_v18 }
 0x62f   :  { %1492 = vmatprep.mubr.f32.mxu0 %v2229_v3  ;;  %1563 = vmatprep.mubr.f32.mxu1 %v2229_v3 }
 0x631   :  { %2090 = vmatpush1.bf16.msra.mxu0 %v2311_v22  ;;  %2122 = vmatpush1.bf16.msra.mxu1 %v2324_v26 }
 0x632   :  { %2092 = vmatprep.subr.bf16.mxu0 %v2326_v27  ;;  %2124 = vmatprep.subr.bf16.mxu1 %v2337_v31  ;;  %v1633_v31 = vld [vmem:[%s2846_s0 + $0x30] sm:$0xff] }
 0x635   :  { %2094 = vmatpush1.bf16.msra.mxu0 %v2349_v35  ;;  %2126 = vmatpush1.bf16.msra.mxu1 %v2362_v39 }
 0x636   :  { %2096 = vmatprep.subr.bf16.mxu0 %v2364_v40  ;;  %2128 = vmatprep.subr.bf16.mxu1 %v2376_v44 }
 0x639   :  { %2098 = vmatpush1.bf16.msra.mxu0 %v2397_v51  ;;  %2130 = vmatpush1.bf16.msra.mxu1 %v2401_v52 }
 0x63a   :  { %2100 = vmatprep.subr.bf16.mxu0 %v2403_v53  ;;  %2132 = vmatprep.subr.bf16.mxu1 %v2415_v57 }
 0x63d   :  { %2102 = vmatpush1.bf16.msra.mxu0 %v2433_v63  ;;  %2134 = vmatpush1.bf16.msra.mxu1 %v2437_v0 }
 0x63e   :  { %2104 = vmatprep.subr.bf16.mxu0 %v2439_v1  ;;  %2136 = vmatprep.subr.bf16.mxu1 %v2451_v7 }
 0x641   :  { %2106 = vmatpush1.bf16.msra.mxu0 %v2469_v16  ;;  %2138 = vmatpush1.bf16.msra.mxu1 %v2473_v19 }
 0x642   :  { %2108 = vmatprep.subr.bf16.mxu0 %v2475_v20  ;;  %2140 = vmatprep.subr.bf16.mxu1 %v2487_v25 }
 0x645   :  { %2110 = vmatpush1.bf16.msra.mxu0 %v2505_v34  ;;  %2142 = vmatpush1.bf16.msra.mxu1 %v2509_v36 }
 0x646   :  { %2112 = vmatprep.subr.bf16.mxu0 %v2511_v37  ;;  %2144 = vmatprep.subr.bf16.mxu1 %v2520_v42 }
 0x649   :  { %2114 = vmatpush1.bf16.msra.mxu0 %v2529_v46  ;;  %2146 = vmatpush1.bf16.msra.mxu1 %v2533_v47 }
 0x6ff   :  { %v1302_v3 = vpop.f32.mrb[12].mxu0  ;;  %v1373_v9 = vpop.f32.mrb[12].mxu1 }
 0x700   :  { %v1304_v13 = vpop.f32.mrb[13].mxu0  ;;  %v1375_v17 = vpop.f32.mrb[13].mxu1 }
 0x701   :  { %v1382_v18 = vcombine.low %v1302_v3, %v1304_v13  ;;  %v1383_v22 = vcombine.low %v1373_v9, %v1375_v17 }
 0x703   :  { %v1390_v26 = vrot.slane %v1382_v18, %v2574_v59  ;;  %v1397_v27 = vrot.slane %v1383_v22, %v2574_v59 }
 0x705   :  { %v1398_v35 = vcombine.low %v1390_v26, %v1397_v27 }
 0x707   :  { %v1400_v39 = vadd.f32 %v1633_v31, %v1398_v35 }
 0x709   :  { %v1401_v40 = vmul.f32 0.5, %v1400_v39  ;;  %v1406_v44 = vrot.slane %v1400_v39, 2  ;;  %v1412_v52 = vrot.slane %v1400_v39, 4  ;;  %v1415_v53 = vrot.slane %v1400_v39, 6 }
 0x70b   :  { %2209 = vtanh.f32 %v1401_v40  ;;  %v1408_v51 = vmul.f32 0.5, %v1406_v44  ;;  %v1417_v57 = vmul.f32 0.5, %v1415_v53 }
 0x70d   :  { %2211 = vtanh.f32 %v1408_v51 }
 0x70e   :  { %2213 = vtanh.f32 %v1412_v52 }
 0x70f   :  { %2215 = vtanh.f32 %v1417_v57 }
 0x715   :  { %v2210_v63 = vpop.eup %2209 }
 0x716   :  { %v1403_v0 = vadd.f32 1.0, %v2210_v63 }
 0x717   :  { %v2212_v1 = vpop.eup %2211 }
 0x718   :  { %v1404_v7 = vmul.f32 0.5, %v1403_v0  ;;  %v1410_v16 = vadd.f32 1.0, %v2212_v1  ;;  %v2214_v20 = vpop.eup %2213 }
 0x719   :  { %v2216_v37 = vpop.eup %2215 }
 0x71a   :  { %v1411_v19 = vmul.f32 0.5, %v1410_v16  ;;  %v1422_v34 = vmul.f32 %v2214_v20, %v1404_v7  ;;  %v1419_v42 = vadd.f32 1.0, %v2216_v37 }
 0x71c   :  { %v1421_v25 = vmul.f32 %v1411_v19, %v2796_v11  ;;  %v1420_v46 = vmul.f32 0.5, %v1419_v42 }
 0x71e   :  { %v1423_v36 = vadd.f32 %v1422_v34, %v1421_v25 }
 0x720   :  { %2217 = vtanh.f32 %v1423_v36 }
 0x72a   :  { %v2218_v47 = vpop.eup %2217 }
 0x72b   :  { %v1425_v58 = vmul.f32 %v2218_v47, %v1420_v46 }
 0x72d   :  { %1493 = vmatmul.mubr.f32.vlgmr.msra.gmra.mrb[14].mxu0 %v1425_v58  ;;  %1564 = vmatmul.mubr.f32.vlgmr.msra.gmra.mrb[14].mxu1 %v1425_v58 }
 0x800   :  { %v1494_v21 = vpop.f32.mrb[14].mxu0  ;;  %v1565_v23 = vpop.f32.mrb[14].mxu1 }
 0x801   :  { %v1496_v24 = vpop.f32.mrb[15].mxu0  ;;  %v1567_v28 = vpop.f32.mrb[15].mxu1 }
 0x802   :  { %v1574_v29 = vcombine.low %v1494_v21, %v1496_v24  ;;  %v1575_v30 = vcombine.low %v1565_v23, %v1567_v28 }
 0x804   :  { %v1582_v32 = vrot.slane %v1574_v29, %v2574_v59  ;;  %v1589_v33 = vrot.slane %v1575_v30, %v2574_v59 }
 0x806   :  { %v1590_v41 = vcombine.low %v1582_v32, %v1589_v33 }
 0x808   :  { %v1592_v43 = vadd.f32 %v1634_v38, %v1590_v41 }
 0x80a   :  { %v1593_v4 = vmul.f32 0.5, %v1592_v43  ;;  %v1598_v8 = vrot.slane %v1592_v43, 2  ;;  %v1604_v48 = vrot.slane %v1592_v43, 4  ;;  %v1607_v49 = vrot.slane %v1592_v43, 6 }
 0x80c   :  { %2219 = vtanh.f32 %v1593_v4  ;;  %v1600_v45 = vmul.f32 0.5, %v1598_v8  ;;  %v1609_v50 = vmul.f32 0.5, %v1607_v49 }
 0x80e   :  { %2221 = vtanh.f32 %v1600_v45 }
 0x80f   :  { %2223 = vtanh.f32 %v1604_v48 }
 0x810   :  { %2225 = vtanh.f32 %v1609_v50 }
 0x816   :  { %v2220_v55 = vpop.eup %2219 }
 0x817   :  { %v1595_v56 = vadd.f32 1.0, %v2220_v55 }
 0x818   :  { %v2222_v60 = vpop.eup %2221 }
 0x819   :  { %v1596_v61 = vmul.f32 0.5, %v1595_v56  ;;  %v1602_v59 = vadd.f32 1.0, %v2222_v60  ;;  %v2224_v5 = vpop.eup %2223 }
 0x81a   :  { %v2226_v12 = vpop.eup %2225 }
 0x81b   :  { %v1603_v2 = vmul.f32 0.5, %v1602_v59  ;;  %v1614_v10 = vmul.f32 %v2224_v5, %v1596_v61  ;;  %v1611_v62 = vadd.f32 1.0, %v2226_v12 }
 0x81d   :  { %v1613_v6 = vmul.f32 %v1603_v2, %v1423_v36  ;;  %v1612_v14 = vmul.f32 0.5, %v1611_v62 }
 0x81f   :  { %v1615_v11 = vadd.f32 %v1614_v10, %v1613_v6 }
 0x821   :  { %2227 = vtanh.f32 %v1615_v11  ;;  %1619 = vst [vmem:[#allocation3] sm:$0x3] %v1615_v11 }
 0x82b   :  { %v2228_v15 = vpop.eup %2227 }
 0x82c   :  { %v1617_v54 = vmul.f32 %v2228_v15, %v1612_v14 }
 0x82e   :  { %1618 = vst [vmem:[#allocation2] sm:$0x3] %v1617_v54  ;;  %1623 = vst [vmem:[%s2847_s2] sm:$0x3] %v1617_v54 }

</bundles_post_ra>
